<compile_context>
chip_gen: v7x
topology: tpu7x:2x2x1
jax: 0.10.0
libtpu: 0.0.40
codegen_flags: <defaults>
</compile_context>

<pallas_src>
import jax
import jax.numpy as jnp
from jax import lax
from jax.experimental import pallas as pl
from jax.experimental.pallas import tpu as pltpu


SOS_token = 2


# ----------------------------------------------------------------------------
# Fused Pallas kernel: encoder GRU + decoder GRU + generator + NLL(sum)
# ----------------------------------------------------------------------------

def _make_seq2seq_kernel(T_in, T_tgt, B, H):
    """Build the fused kernel body for static (T_in, T_tgt, B, H)."""

    def kernel(enc_x_ref, dec_x_ref, tgt_ref,
               enc_w_ih_ref, enc_w_hh_ref, enc_b_in_ref, enc_b_hn_ref,
               dec_w_ih_ref, dec_w_hh_ref, dec_b_in_ref, dec_b_hn_ref,
               gen_w_ref, gen_b_ref,
               loss_ref,
               enc_gi_scr, dec_gi_scr, dec_h_scr):
        f32 = jnp.float32

        # ---- Hoisted input projections (all timesteps at once, off the serial path) ----
        # enc_gi[t*B:(t+1)*B] = x_t @ W_ih + (b_ih + [b_hh_r, b_hh_z, 0])
        enc_gi_scr[...] = (
            jnp.dot(enc_x_ref[...], enc_w_ih_ref[...], preferred_element_type=f32)
            + enc_b_in_ref[...])
        dec_gi_scr[...] = (
            jnp.dot(dec_x_ref[...], dec_w_ih_ref[...], preferred_element_type=f32)
            + dec_b_in_ref[...])

        # Hoist weight / bias loads out of the time loops.
        enc_w_hh = enc_w_hh_ref[...]
        enc_b_hn = enc_b_hn_ref[...]
        dec_w_hh = dec_w_hh_ref[...]
        dec_b_hn = dec_b_hn_ref[...]

        def gru_step(gi, h, w_hh, b_hn):
            # PyTorch GRUCell math with r/z hidden-biases pre-folded into gi.
            gh = jnp.dot(h, w_hh, preferred_element_type=f32)
            r = jax.nn.sigmoid(gi[:, 0:H] + gh[:, 0:H])
            z = jax.nn.sigmoid(gi[:, H:2 * H] + gh[:, H:2 * H])
            n = jnp.tanh(gi[:, 2 * H:3 * H] + r * (gh[:, 2 * H:3 * H] + b_hn))
            return (1.0 - z) * n + z * h

        # ---- encoder recurrence (serial, only the h-dependent matmul stays inside) ----
        def enc_body(t, h):
            off = pl.multiple_of(t * B, B)
            gi = enc_gi_scr[pl.ds(off, B), :]
            return gru_step(gi, h, enc_w_hh, enc_b_hn)

        h_enc = lax.fori_loop(0, T_in, enc_body,
                              jnp.zeros((B, H), f32), unroll=True)

        # ---- decoder recurrence (teacher forcing); stash every h_t for the batched generator ----
        def dec_body(t, h):
            off = pl.multiple_of(t * B, B)
            gi = dec_gi_scr[pl.ds(off, B), :]
            h_new = gru_step(gi, h, dec_w_hh, dec_b_hn)
            dec_h_scr[pl.ds(off, B), :] = h_new
            return h_new

        _ = lax.fori_loop(0, T_tgt, dec_body, h_enc, unroll=True)

        # ---- generator + NLL(sum) over all timesteps in one shot ----
        logits = (jnp.dot(dec_h_scr[...], gen_w_ref[...],
                          preferred_element_type=f32)
                  + gen_b_ref[...])                                  # (T_tgt*B, V)
        m = jnp.max(logits, axis=-1, keepdims=True)
        lse = jnp.log(jnp.sum(jnp.exp(logits - m), axis=-1, keepdims=True)) + m

        # NLL(sum) = sum(lse) - sum(logits[target]); log-probs never materialized.
        col = lax.broadcasted_iota(jnp.int32, logits.shape, 1)        # (T_tgt*B, V)
        picked = jnp.sum(jnp.where(col == tgt_ref[...], logits, 0.0), keepdims=True)
        loss_ref[...] = jnp.sum(lse, keepdims=True) - picked

    return kernel


def seq2seq_fused_loss(enc_x, dec_x, tgt,
                       enc_w_ih, enc_w_hh, enc_b_in, enc_b_hn,
                       dec_w_ih, dec_w_hh, dec_b_in, dec_b_hn,
                       gen_w, gen_b, *, T_in, T_tgt, B, H):
    """Single kernel launch: whole encoder + decoder + generator + summed NLL."""
    kernel = _make_seq2seq_kernel(T_in, T_tgt, B, H)
    loss = pl.pallas_call(
        kernel,
        out_shape=jax.ShapeDtypeStruct((1, 1), jnp.float32),
        scratch_shapes=[
            pltpu.VMEM((T_in * B, 3 * H), jnp.float32),   # hoisted encoder input projections
            pltpu.VMEM((T_tgt * B, 3 * H), jnp.float32),  # hoisted decoder input projections
            pltpu.VMEM((T_tgt * B, H), jnp.float32),      # all decoder hidden states
        ],
    )(enc_x, dec_x, tgt,
      enc_w_ih, enc_w_hh, enc_b_in, enc_b_hn,
      dec_w_ih, dec_w_hh, dec_b_in, dec_b_hn,
      gen_w, gen_b)
    return loss[0, 0]


# ----------------------------------------------------------------------------
# Parameter construction (deterministic, PyTorch-style uniform(-1/sqrt(H), 1/sqrt(H)))
# ----------------------------------------------------------------------------

def init_params(key, vocab_size, hidden_size):
    H, V = hidden_size, vocab_size
    bound = 1.0 / jnp.sqrt(jnp.float32(H))
    keys = jax.random.split(key, 12)
    u = lambda k, shp: jax.random.uniform(k, shp, jnp.float32, -bound, bound)
    return {
        "emb_enc": u(keys[0], (V, H)),
        "emb_dec": u(keys[1], (V, H)),
        # encoder GRU cell (weights stored pre-transposed: (H, 3H), gate order r|z|n)
        "enc_w_ih": u(keys[2], (H, 3 * H)),
        "enc_w_hh": u(keys[3], (H, 3 * H)),
        "enc_b_ih": u(keys[4], (1, 3 * H)),
        "enc_b_hh": u(keys[5], (1, 3 * H)),
        # decoder GRU cell
        "dec_w_ih": u(keys[6], (H, 3 * H)),
        "dec_w_hh": u(keys[7], (H, 3 * H)),
        "dec_b_ih": u(keys[8], (1, 3 * H)),
        "dec_b_hh": u(keys[9], (1, 3 * H)),
        # generator: fc (H -> V) + log_softmax
        "gen_w": u(keys[10], (H, V)),
        "gen_b": u(keys[11], (1, V)),
    }


def _fold_bias(b_ih, b_hh, H):
    """Fold hidden-side r/z biases into the hoisted input-projection bias.

    gi = x@W_ih + b_in with b_in = b_ih + [b_hh_r, b_hh_z, 0]; the n-gate hidden bias b_hh_n
    must stay separate because of r * (h@W_hn + b_hh_n).
    """
    b_in = b_ih.at[:, 0:2 * H].add(b_hh[:, 0:2 * H])
    b_hn = b_hh[:, 2 * H:3 * H]
    return b_in, b_hn


# ----------------------------------------------------------------------------
# Seq2Seq forward (teacher forcing), mirroring Seq2SeqGru.forward semantics
# ----------------------------------------------------------------------------

@jax.jit
def seq2seq_gru_forward(params, cw_idxs, qw_idxs):
    """Returns loss / target_length (teacher forcing path)."""
    B, T_in = cw_idxs.shape
    _, T_tgt = qw_idxs.shape
    H = params["enc_w_ih"].shape[0]

    # Embedding gathers stay as XLA glue (data-dependent gather); everything else is the kernel.
    enc_x = jnp.take(params["emb_enc"], cw_idxs.T, axis=0).reshape(T_in * B, H)

    # Teacher forcing: decoder inputs are [SOS, tgt[:-1]], relu(embedded).
    dec_in_idx = jnp.concatenate(
        [jnp.full((B, 1), SOS_token, dtype=qw_idxs.dtype), qw_idxs[:, :-1]], axis=1)
    dec_x = jax.nn.relu(
        jnp.take(params["emb_dec"], dec_in_idx.T, axis=0)).reshape(T_tgt * B, H)
    tgt = qw_idxs.T.reshape(T_tgt * B, 1).astype(jnp.int32)

    enc_b_in, enc_b_hn = _fold_bias(params["enc_b_ih"], params["enc_b_hh"], H)
    dec_b_in, dec_b_hn = _fold_bias(params["dec_b_ih"], params["dec_b_hh"], H)

    total_loss = seq2seq_fused_loss(
        enc_x, dec_x, tgt,
        params["enc_w_ih"], params["enc_w_hh"], enc_b_in, enc_b_hn,
        params["dec_w_ih"], params["dec_w_hh"], dec_b_in, dec_b_hn,
        params["gen_w"], params["gen_b"],
        T_in=T_in, T_tgt=T_tgt, B=B, H=H)

    return total_loss / jnp.float32(T_tgt)


# ----------------------------------------------------------------------------
# Pure-JAX reference (step-by-step GRU, log_softmax, NLL sum) for correctness check
# ----------------------------------------------------------------------------

def seq2seq_gru_reference(params, cw_idxs, qw_idxs):
    B, T_in = cw_idxs.shape
    _, T_tgt = qw_idxs.shape
    H = params["enc_w_ih"].shape[0]

    def gru_cell(x, h, w_ih, w_hh, b_ih, b_hh):
        gi = x @ w_ih + b_ih
        gh = h @ w_hh + b_hh
        r = jax.nn.sigmoid(gi[:, 0:H] + gh[:, 0:H])
        z = jax.nn.sigmoid(gi[:, H:2 * H] + gh[:, H:2 * H])
        n = jnp.tanh(gi[:, 2 * H:3 * H] + r * gh[:, 2 * H:3 * H])
        return (1.0 - z) * n + z * h

    h = jnp.zeros((B, H), jnp.float32)
    for t in range(T_in):
        x = jnp.take(params["emb_enc"], cw_idxs[:, t], axis=0)
        h = gru_cell(x, h, params["enc_w_ih"], params["enc_w_hh"],
                     params["enc_b_ih"], params["enc_b_hh"])

    dec_in_idx = jnp.concatenate(
        [jnp.full((B, 1), SOS_token, dtype=qw_idxs.dtype), qw_idxs[:, :-1]], axis=1)
    loss = jnp.float32(0.0)
    for t in range(T_tgt):
        x = jax.nn.relu(jnp.take(params["emb_dec"], dec_in_idx[:, t], axis=0))
        h = gru_cell(x, h, params["dec_w_ih"], params["dec_w_hh"],
                     params["dec_b_ih"], params["dec_b_hh"])
        logits = h @ params["gen_w"] + params["gen_b"]
        logprobs = jax.nn.log_softmax(logits, axis=-1)
        picked = jnp.take_along_axis(
            logprobs, qw_idxs[:, t:t + 1].astype(jnp.int32), axis=1)
        loss = loss - jnp.sum(picked)
    return loss / jnp.float32(T_tgt)


# ----------------------------------------------------------------------------
# main
# ----------------------------------------------------------------------------

if __name__ == "__main__":
    B = 8            # batch
    H = 128          # hidden_size
    V = 256          # output_size / vocab size
    S_IN = 8         # source sequence length
    S_TGT = 8        # target sequence length

    key = jax.random.PRNGKey(0)
    k_params, k_cw, k_qw = jax.random.split(key, 3)

    params = init_params(k_params, V, H)
    cw_idxs = jax.random.randint(k_cw, (B, S_IN), 0, V, dtype=jnp.int32)
    qw_idxs = jax.random.randint(k_qw, (B, S_TGT), 0, V, dtype=jnp.int32)

    loss = seq2seq_gru_forward(params, cw_idxs, qw_idxs)
    loss = jax.block_until_ready(loss)

    loss_ref = seq2seq_gru_reference(params, cw_idxs, qw_idxs)
    loss_ref = jax.block_until_ready(loss_ref)

    assert jnp.isfinite(loss), "loss is not finite"
    assert jnp.allclose(loss, loss_ref, rtol=2e-3, atol=1e-2), (
        f"kernel loss {loss} != reference loss {loss_ref}")
    print("KERNEL_OK")
</pallas_src>

<mosaic_0001>
module attributes {stable_mosaic.version = 11 : i64} {
  func.func @kernel(%arg0: memref<64x128xf32, #tpu.memory_space<vmem>>, %arg1: memref<64x128xf32, #tpu.memory_space<vmem>>, %arg2: memref<64x1xi32, #tpu.memory_space<vmem>>, %arg3: memref<128x384xf32, #tpu.memory_space<vmem>>, %arg4: memref<128x384xf32, #tpu.memory_space<vmem>>, %arg5: memref<1x384xf32, #tpu.memory_space<vmem>>, %arg6: memref<1x128xf32, #tpu.memory_space<vmem>>, %arg7: memref<128x384xf32, #tpu.memory_space<vmem>>, %arg8: memref<128x384xf32, #tpu.memory_space<vmem>>, %arg9: memref<1x384xf32, #tpu.memory_space<vmem>>, %arg10: memref<1x128xf32, #tpu.memory_space<vmem>>, %arg11: memref<128x256xf32, #tpu.memory_space<vmem>>, %arg12: memref<1x256xf32, #tpu.memory_space<vmem>>, %arg13: memref<1x1xf32, #tpu.memory_space<vmem>>, %arg14: memref<64x384xf32, #tpu.memory_space<vmem>>, %arg15: memref<64x384xf32, #tpu.memory_space<vmem>>, %arg16: memref<64x128xf32, #tpu.memory_space<vmem>>) attributes {dimension_semantics = [], scalar_prefetch = 0 : i64, scratch_operands = 3 : i64, tpu.core_type = #tpu.core_type<tc>} {
    %c0 = arith.constant 0 : index
    %c0_0 = arith.constant 0 : index
    %0 = vector.load %arg0[%c0, %c0_0] : memref<64x128xf32, #tpu.memory_space<vmem>>, vector<64x128xf32>
    %c0_1 = arith.constant 0 : index
    %c0_2 = arith.constant 0 : index
    %1 = vector.load %arg3[%c0_1, %c0_2] : memref<128x384xf32, #tpu.memory_space<vmem>>, vector<128x384xf32>
    %cst = arith.constant dense<0.000000e+00> : vector<64x384xf32>
    %2 = tpu.matmul %0, %1, %cst {dimension_numbers = #tpu.dot_dimension_numbers<[1], [0], [0], [1], [0, 0, 1, 1], [], []>} : vector<64x128xf32>, vector<128x384xf32>, vector<64x384xf32> -> vector<64x384xf32>
    %c0_3 = arith.constant 0 : index
    %c0_4 = arith.constant 0 : index
    %3 = vector.load %arg5[%c0_3, %c0_4] : memref<1x384xf32, #tpu.memory_space<vmem>>, vector<1x384xf32>
    %4 = vector.broadcast %3 : vector<1x384xf32> to vector<64x384xf32>
    %5 = arith.addf %2, %4 : vector<64x384xf32>
    %c0_5 = arith.constant 0 : index
    %c0_6 = arith.constant 0 : index
    %6 = vector.load %arg14[%c0_5, %c0_6] : memref<64x384xf32, #tpu.memory_space<vmem>>, vector<64x384xf32>
    tpu.vector_store %arg14[%c0_5, %c0_6], %5 {strides = array<i32>} : memref<64x384xf32, #tpu.memory_space<vmem>>, vector<64x384xf32>,
    %c0_7 = arith.constant 0 : index
    %c0_8 = arith.constant 0 : index
    %7 = vector.load %arg1[%c0_7, %c0_8] : memref<64x128xf32, #tpu.memory_space<vmem>>, vector<64x128xf32>
    %c0_9 = arith.constant 0 : index
    %c0_10 = arith.constant 0 : index
    %8 = vector.load %arg7[%c0_9, %c0_10] : memref<128x384xf32, #tpu.memory_space<vmem>>, vector<128x384xf32>
    %cst_11 = arith.constant dense<0.000000e+00> : vector<64x384xf32>
    %9 = tpu.matmul %7, %8, %cst_11 {dimension_numbers = #tpu.dot_dimension_numbers<[1], [0], [0], [1], [0, 0, 1, 1], [], []>} : vector<64x128xf32>, vector<128x384xf32>, vector<64x384xf32> -> vector<64x384xf32>
    %c0_12 = arith.constant 0 : index
    %c0_13 = arith.constant 0 : index
    %10 = vector.load %arg9[%c0_12, %c0_13] : memref<1x384xf32, #tpu.memory_space<vmem>>, vector<1x384xf32>
    %11 = vector.broadcast %10 : vector<1x384xf32> to vector<64x384xf32>
    %12 = arith.addf %9, %11 : vector<64x384xf32>
    %c0_14 = arith.constant 0 : index
    %c0_15 = arith.constant 0 : index
    %13 = vector.load %arg15[%c0_14, %c0_15] : memref<64x384xf32, #tpu.memory_space<vmem>>, vector<64x384xf32>
    tpu.vector_store %arg15[%c0_14, %c0_15], %12 {strides = array<i32>} : memref<64x384xf32, #tpu.memory_space<vmem>>, vector<64x384xf32>,
    %c0_16 = arith.constant 0 : index
    %c0_17 = arith.constant 0 : index
    %14 = vector.load %arg4[%c0_16, %c0_17] : memref<128x384xf32, #tpu.memory_space<vmem>>, vector<128x384xf32>
    %c0_18 = arith.constant 0 : index
    %c0_19 = arith.constant 0 : index
    %15 = vector.load %arg6[%c0_18, %c0_19] : memref<1x128xf32, #tpu.memory_space<vmem>>, vector<1x128xf32>
    %c0_20 = arith.constant 0 : index
    %c0_21 = arith.constant 0 : index
    %16 = vector.load %arg8[%c0_20, %c0_21] : memref<128x384xf32, #tpu.memory_space<vmem>>, vector<128x384xf32>
    %c0_22 = arith.constant 0 : index
    %c0_23 = arith.constant 0 : index
    %17 = vector.load %arg10[%c0_22, %c0_23] : memref<1x128xf32, #tpu.memory_space<vmem>>, vector<1x128xf32>
    %cst_24 = arith.constant 0.000000e+00 : f32
    %18 = vector.broadcast %cst_24 : f32 to vector<8x128xf32>
    %c0_i32 = arith.constant 0 : i32
    %c8_i32 = arith.constant 8 : i32
    %19 = arith.muli %c0_i32, %c8_i32 : i32
    %20 = tpu.assume_multiple %19, 8 : i32
    %21 = arith.index_cast %20 : i32 to index
    %c0_25 = arith.constant 0 : index
    %22 = vector.load %arg14[%21, %c0_25] : memref<64x384xf32, #tpu.memory_space<vmem>>, vector<8x384xf32>
    %cst_26 = arith.constant dense<0.000000e+00> : vector<8x384xf32>
    %23 = tpu.matmul %18, %14, %cst_26 {dimension_numbers = #tpu.dot_dimension_numbers<[1], [0], [0], [1], [0, 0, 1, 1], [], []>} : vector<8x128xf32>, vector<128x384xf32>, vector<8x384xf32> -> vector<8x384xf32>
    %24 = vector.extract_strided_slice %22 {offsets = [0, 0], sizes = [8, 128], strides = [1, 1]} : vector<8x384xf32> to vector<8x128xf32>
    %25 = vector.extract_strided_slice %23 {offsets = [0, 0], sizes = [8, 128], strides = [1, 1]} : vector<8x384xf32> to vector<8x128xf32>
    %26 = arith.addf %24, %25 : vector<8x128xf32>
    %27 = arith.negf %26 : vector<8x128xf32>
    %28 = math.exp %27 : vector<8x128xf32>
    %cst_27 = arith.constant 1.000000e+00 : f32
    %29 = vector.broadcast %cst_27 : f32 to vector<8x128xf32>
    %30 = arith.addf %29, %28 : vector<8x128xf32>
    %31 = arith.divf %29, %30 : vector<8x128xf32>
    %32 = vector.extract_strided_slice %22 {offsets = [0, 128], sizes = [8, 128], strides = [1, 1]} : vector<8x384xf32> to vector<8x128xf32>
    %33 = vector.extract_strided_slice %23 {offsets = [0, 128], sizes = [8, 128], strides = [1, 1]} : vector<8x384xf32> to vector<8x128xf32>
    %34 = arith.addf %32, %33 : vector<8x128xf32>
    %35 = arith.negf %34 : vector<8x128xf32>
    %36 = math.exp %35 : vector<8x128xf32>
    %cst_28 = arith.constant 1.000000e+00 : f32
    %37 = vector.broadcast %cst_28 : f32 to vector<8x128xf32>
    %38 = arith.addf %37, %36 : vector<8x128xf32>
    %39 = arith.divf %37, %38 : vector<8x128xf32>
    %40 = vector.extract_strided_slice %22 {offsets = [0, 256], sizes = [8, 128], strides = [1, 1]} : vector<8x384xf32> to vector<8x128xf32>
    %41 = vector.extract_strided_slice %23 {offsets = [0, 256], sizes = [8, 128], strides = [1, 1]} : vector<8x384xf32> to vector<8x128xf32>
    %42 = vector.broadcast %15 : vector<1x128xf32> to vector<8x128xf32>
    %43 = arith.addf %41, %42 : vector<8x128xf32>
    %44 = arith.mulf %31, %43 : vector<8x128xf32>
    %45 = arith.addf %40, %44 : vector<8x128xf32>
    %46 = math.tanh %45 : vector<8x128xf32>
    %cst_29 = arith.constant 1.000000e+00 : f32
    %47 = vector.broadcast %cst_29 : f32 to vector<8x128xf32>
    %48 = arith.subf %47, %39 : vector<8x128xf32>
    %49 = arith.mulf %48, %46 : vector<8x128xf32>
    %50 = arith.mulf %39, %18 : vector<8x128xf32>
    %51 = arith.addf %49, %50 : vector<8x128xf32>
    %c1_i32 = arith.constant 1 : i32
    %c8_i32_30 = arith.constant 8 : i32
    %52 = arith.muli %c1_i32, %c8_i32_30 : i32
    %53 = tpu.assume_multiple %52, 8 : i32
    %54 = arith.index_cast %53 : i32 to index
    %c0_31 = arith.constant 0 : index
    %55 = vector.load %arg14[%54, %c0_31] : memref<64x384xf32, #tpu.memory_space<vmem>>, vector<8x384xf32>
    %cst_32 = arith.constant dense<0.000000e+00> : vector<8x384xf32>
    %56 = tpu.matmul %51, %14, %cst_32 {dimension_numbers = #tpu.dot_dimension_numbers<[1], [0], [0], [1], [0, 0, 1, 1], [], []>} : vector<8x128xf32>, vector<128x384xf32>, vector<8x384xf32> -> vector<8x384xf32>
    %57 = vector.extract_strided_slice %55 {offsets = [0, 0], sizes = [8, 128], strides = [1, 1]} : vector<8x384xf32> to vector<8x128xf32>
    %58 = vector.extract_strided_slice %56 {offsets = [0, 0], sizes = [8, 128], strides = [1, 1]} : vector<8x384xf32> to vector<8x128xf32>
    %59 = arith.addf %57, %58 : vector<8x128xf32>
    %60 = arith.negf %59 : vector<8x128xf32>
    %61 = math.exp %60 : vector<8x128xf32>
    %cst_33 = arith.constant 1.000000e+00 : f32
    %62 = vector.broadcast %cst_33 : f32 to vector<8x128xf32>
    %63 = arith.addf %62, %61 : vector<8x128xf32>
    %64 = arith.divf %62, %63 : vector<8x128xf32>
    %65 = vector.extract_strided_slice %55 {offsets = [0, 128], sizes = [8, 128], strides = [1, 1]} : vector<8x384xf32> to vector<8x128xf32>
    %66 = vector.extract_strided_slice %56 {offsets = [0, 128], sizes = [8, 128], strides = [1, 1]} : vector<8x384xf32> to vector<8x128xf32>
    %67 = arith.addf %65, %66 : vector<8x128xf32>
    %68 = arith.negf %67 : vector<8x128xf32>
    %69 = math.exp %68 : vector<8x128xf32>
    %cst_34 = arith.constant 1.000000e+00 : f32
    %70 = vector.broadcast %cst_34 : f32 to vector<8x128xf32>
    %71 = arith.addf %70, %69 : vector<8x128xf32>
    %72 = arith.divf %70, %71 : vector<8x128xf32>
    %73 = vector.extract_strided_slice %55 {offsets = [0, 256], sizes = [8, 128], strides = [1, 1]} : vector<8x384xf32> to vector<8x128xf32>
    %74 = vector.extract_strided_slice %56 {offsets = [0, 256], sizes = [8, 128], strides = [1, 1]} : vector<8x384xf32> to vector<8x128xf32>
    %75 = vector.broadcast %15 : vector<1x128xf32> to vector<8x128xf32>
    %76 = arith.addf %74, %75 : vector<8x128xf32>
    %77 = arith.mulf %64, %76 : vector<8x128xf32>
    %78 = arith.addf %73, %77 : vector<8x128xf32>
    %79 = math.tanh %78 : vector<8x128xf32>
    %cst_35 = arith.constant 1.000000e+00 : f32
    %80 = vector.broadcast %cst_35 : f32 to vector<8x128xf32>
    %81 = arith.subf %80, %72 : vector<8x128xf32>
    %82 = arith.mulf %81, %79 : vector<8x128xf32>
    %83 = arith.mulf %72, %51 : vector<8x128xf32>
    %84 = arith.addf %82, %83 : vector<8x128xf32>
    %c2_i32 = arith.constant 2 : i32
    %c8_i32_36 = arith.constant 8 : i32
    %85 = arith.muli %c2_i32, %c8_i32_36 : i32
    %86 = tpu.assume_multiple %85, 8 : i32
    %87 = arith.index_cast %86 : i32 to index
    %c0_37 = arith.constant 0 : index
    %88 = vector.load %arg14[%87, %c0_37] : memref<64x384xf32, #tpu.memory_space<vmem>>, vector<8x384xf32>
    %cst_38 = arith.constant dense<0.000000e+00> : vector<8x384xf32>
    %89 = tpu.matmul %84, %14, %cst_38 {dimension_numbers = #tpu.dot_dimension_numbers<[1], [0], [0], [1], [0, 0, 1, 1], [], []>} : vector<8x128xf32>, vector<128x384xf32>, vector<8x384xf32> -> vector<8x384xf32>
    %90 = vector.extract_strided_slice %88 {offsets = [0, 0], sizes = [8, 128], strides = [1, 1]} : vector<8x384xf32> to vector<8x128xf32>
    %91 = vector.extract_strided_slice %89 {offsets = [0, 0], sizes = [8, 128], strides = [1, 1]} : vector<8x384xf32> to vector<8x128xf32>
    %92 = arith.addf %90, %91 : vector<8x128xf32>
    %93 = arith.negf %92 : vector<8x128xf32>
    %94 = math.exp %93 : vector<8x128xf32>
    %cst_39 = arith.constant 1.000000e+00 : f32
    %95 = vector.broadcast %cst_39 : f32 to vector<8x128xf32>
    %96 = arith.addf %95, %94 : vector<8x128xf32>
    %97 = arith.divf %95, %96 : vector<8x128xf32>
    %98 = vector.extract_strided_slice %88 {offsets = [0, 128], sizes = [8, 128], strides = [1, 1]} : vector<8x384xf32> to vector<8x128xf32>
    %99 = vector.extract_strided_slice %89 {offsets = [0, 128], sizes = [8, 128], strides = [1, 1]} : vector<8x384xf32> to vector<8x128xf32>
    %100 = arith.addf %98, %99 : vector<8x128xf32>
    %101 = arith.negf %100 : vector<8x128xf32>
    %102 = math.exp %101 : vector<8x128xf32>
    %cst_40 = arith.constant 1.000000e+00 : f32
    %103 = vector.broadcast %cst_40 : f32 to vector<8x128xf32>
    %104 = arith.addf %103, %102 : vector<8x128xf32>
    %105 = arith.divf %103, %104 : vector<8x128xf32>
    %106 = vector.extract_strided_slice %88 {offsets = [0, 256], sizes = [8, 128], strides = [1, 1]} : vector<8x384xf32> to vector<8x128xf32>
    %107 = vector.extract_strided_slice %89 {offsets = [0, 256], sizes = [8, 128], strides = [1, 1]} : vector<8x384xf32> to vector<8x128xf32>
    %108 = vector.broadcast %15 : vector<1x128xf32> to vector<8x128xf32>
    %109 = arith.addf %107, %108 : vector<8x128xf32>
    %110 = arith.mulf %97, %109 : vector<8x128xf32>
    %111 = arith.addf %106, %110 : vector<8x128xf32>
    %112 = math.tanh %111 : vector<8x128xf32>
    %cst_41 = arith.constant 1.000000e+00 : f32
    %113 = vector.broadcast %cst_41 : f32 to vector<8x128xf32>
    %114 = arith.subf %113, %105 : vector<8x128xf32>
    %115 = arith.mulf %114, %112 : vector<8x128xf32>
    %116 = arith.mulf %105, %84 : vector<8x128xf32>
    %117 = arith.addf %115, %116 : vector<8x128xf32>
    %c3_i32 = arith.constant 3 : i32
    %c8_i32_42 = arith.constant 8 : i32
    %118 = arith.muli %c3_i32, %c8_i32_42 : i32
    %119 = tpu.assume_multiple %118, 8 : i32
    %120 = arith.index_cast %119 : i32 to index
    %c0_43 = arith.constant 0 : index
    %121 = vector.load %arg14[%120, %c0_43] : memref<64x384xf32, #tpu.memory_space<vmem>>, vector<8x384xf32>
    %cst_44 = arith.constant dense<0.000000e+00> : vector<8x384xf32>
    %122 = tpu.matmul %117, %14, %cst_44 {dimension_numbers = #tpu.dot_dimension_numbers<[1], [0], [0], [1], [0, 0, 1, 1], [], []>} : vector<8x128xf32>, vector<128x384xf32>, vector<8x384xf32> -> vector<8x384xf32>
    %123 = vector.extract_strided_slice %121 {offsets = [0, 0], sizes = [8, 128], strides = [1, 1]} : vector<8x384xf32> to vector<8x128xf32>
    %124 = vector.extract_strided_slice %122 {offsets = [0, 0], sizes = [8, 128], strides = [1, 1]} : vector<8x384xf32> to vector<8x128xf32>
    %125 = arith.addf %123, %124 : vector<8x128xf32>
    %126 = arith.negf %125 : vector<8x128xf32>
    %127 = math.exp %126 : vector<8x128xf32>
    %cst_45 = arith.constant 1.000000e+00 : f32
    %128 = vector.broadcast %cst_45 : f32 to vector<8x128xf32>
    %129 = arith.addf %128, %127 : vector<8x128xf32>
    %130 = arith.divf %128, %129 : vector<8x128xf32>
    %131 = vector.extract_strided_slice %121 {offsets = [0, 128], sizes = [8, 128], strides = [1, 1]} : vector<8x384xf32> to vector<8x128xf32>
    %132 = vector.extract_strided_slice %122 {offsets = [0, 128], sizes = [8, 128], strides = [1, 1]} : vector<8x384xf32> to vector<8x128xf32>
    %133 = arith.addf %131, %132 : vector<8x128xf32>
    %134 = arith.negf %133 : vector<8x128xf32>
    %135 = math.exp %134 : vector<8x128xf32>
    %cst_46 = arith.constant 1.000000e+00 : f32
    %136 = vector.broadcast %cst_46 : f32 to vector<8x128xf32>
    %137 = arith.addf %136, %135 : vector<8x128xf32>
    %138 = arith.divf %136, %137 : vector<8x128xf32>
    %139 = vector.extract_strided_slice %121 {offsets = [0, 256], sizes = [8, 128], strides = [1, 1]} : vector<8x384xf32> to vector<8x128xf32>
    %140 = vector.extract_strided_slice %122 {offsets = [0, 256], sizes = [8, 128], strides = [1, 1]} : vector<8x384xf32> to vector<8x128xf32>
    %141 = vector.broadcast %15 : vector<1x128xf32> to vector<8x128xf32>
    %142 = arith.addf %140, %141 : vector<8x128xf32>
    %143 = arith.mulf %130, %142 : vector<8x128xf32>
    %144 = arith.addf %139, %143 : vector<8x128xf32>
    %145 = math.tanh %144 : vector<8x128xf32>
    %cst_47 = arith.constant 1.000000e+00 : f32
    %146 = vector.broadcast %cst_47 : f32 to vector<8x128xf32>
    %147 = arith.subf %146, %138 : vector<8x128xf32>
    %148 = arith.mulf %147, %145 : vector<8x128xf32>
    %149 = arith.mulf %138, %117 : vector<8x128xf32>
    %150 = arith.addf %148, %149 : vector<8x128xf32>
    %c4_i32 = arith.constant 4 : i32
    %c8_i32_48 = arith.constant 8 : i32
    %151 = arith.muli %c4_i32, %c8_i32_48 : i32
    %152 = tpu.assume_multiple %151, 8 : i32
    %153 = arith.index_cast %152 : i32 to index
    %c0_49 = arith.constant 0 : index
    %154 = vector.load %arg14[%153, %c0_49] : memref<64x384xf32, #tpu.memory_space<vmem>>, vector<8x384xf32>
    %cst_50 = arith.constant dense<0.000000e+00> : vector<8x384xf32>
    %155 = tpu.matmul %150, %14, %cst_50 {dimension_numbers = #tpu.dot_dimension_numbers<[1], [0], [0], [1], [0, 0, 1, 1], [], []>} : vector<8x128xf32>, vector<128x384xf32>, vector<8x384xf32> -> vector<8x384xf32>
    %156 = vector.extract_strided_slice %154 {offsets = [0, 0], sizes = [8, 128], strides = [1, 1]} : vector<8x384xf32> to vector<8x128xf32>
    %157 = vector.extract_strided_slice %155 {offsets = [0, 0], sizes = [8, 128], strides = [1, 1]} : vector<8x384xf32> to vector<8x128xf32>
    %158 = arith.addf %156, %157 : vector<8x128xf32>
    %159 = arith.negf %158 : vector<8x128xf32>
    %160 = math.exp %159 : vector<8x128xf32>
    %cst_51 = arith.constant 1.000000e+00 : f32
    %161 = vector.broadcast %cst_51 : f32 to vector<8x128xf32>
    %162 = arith.addf %161, %160 : vector<8x128xf32>
    %163 = arith.divf %161, %162 : vector<8x128xf32>
    %164 = vector.extract_strided_slice %154 {offsets = [0, 128], sizes = [8, 128], strides = [1, 1]} : vector<8x384xf32> to vector<8x128xf32>
    %165 = vector.extract_strided_slice %155 {offsets = [0, 128], sizes = [8, 128], strides = [1, 1]} : vector<8x384xf32> to vector<8x128xf32>
    %166 = arith.addf %164, %165 : vector<8x128xf32>
    %167 = arith.negf %166 : vector<8x128xf32>
    %168 = math.exp %167 : vector<8x128xf32>
    %cst_52 = arith.constant 1.000000e+00 : f32
    %169 = vector.broadcast %cst_52 : f32 to vector<8x128xf32>
    %170 = arith.addf %169, %168 : vector<8x128xf32>
    %171 = arith.divf %169, %170 : vector<8x128xf32>
    %172 = vector.extract_strided_slice %154 {offsets = [0, 256], sizes = [8, 128], strides = [1, 1]} : vector<8x384xf32> to vector<8x128xf32>
    %173 = vector.extract_strided_slice %155 {offsets = [0, 256], sizes = [8, 128], strides = [1, 1]} : vector<8x384xf32> to vector<8x128xf32>
    %174 = vector.broadcast %15 : vector<1x128xf32> to vector<8x128xf32>
    %175 = arith.addf %173, %174 : vector<8x128xf32>
    %176 = arith.mulf %163, %175 : vector<8x128xf32>
    %177 = arith.addf %172, %176 : vector<8x128xf32>
    %178 = math.tanh %177 : vector<8x128xf32>
    %cst_53 = arith.constant 1.000000e+00 : f32
    %179 = vector.broadcast %cst_53 : f32 to vector<8x128xf32>
    %180 = arith.subf %179, %171 : vector<8x128xf32>
    %181 = arith.mulf %180, %178 : vector<8x128xf32>
    %182 = arith.mulf %171, %150 : vector<8x128xf32>
    %183 = arith.addf %181, %182 : vector<8x128xf32>
    %c5_i32 = arith.constant 5 : i32
    %c8_i32_54 = arith.constant 8 : i32
    %184 = arith.muli %c5_i32, %c8_i32_54 : i32
    %185 = tpu.assume_multiple %184, 8 : i32
    %186 = arith.index_cast %185 : i32 to index
    %c0_55 = arith.constant 0 : index
    %187 = vector.load %arg14[%186, %c0_55] : memref<64x384xf32, #tpu.memory_space<vmem>>, vector<8x384xf32>
    %cst_56 = arith.constant dense<0.000000e+00> : vector<8x384xf32>
    %188 = tpu.matmul %183, %14, %cst_56 {dimension_numbers = #tpu.dot_dimension_numbers<[1], [0], [0], [1], [0, 0, 1, 1], [], []>} : vector<8x128xf32>, vector<128x384xf32>, vector<8x384xf32> -> vector<8x384xf32>
    %189 = vector.extract_strided_slice %187 {offsets = [0, 0], sizes = [8, 128], strides = [1, 1]} : vector<8x384xf32> to vector<8x128xf32>
    %190 = vector.extract_strided_slice %188 {offsets = [0, 0], sizes = [8, 128], strides = [1, 1]} : vector<8x384xf32> to vector<8x128xf32>
    %191 = arith.addf %189, %190 : vector<8x128xf32>
    %192 = arith.negf %191 : vector<8x128xf32>
    %193 = math.exp %192 : vector<8x128xf32>
    %cst_57 = arith.constant 1.000000e+00 : f32
    %194 = vector.broadcast %cst_57 : f32 to vector<8x128xf32>
    %195 = arith.addf %194, %193 : vector<8x128xf32>
    %196 = arith.divf %194, %195 : vector<8x128xf32>
    %197 = vector.extract_strided_slice %187 {offsets = [0, 128], sizes = [8, 128], strides = [1, 1]} : vector<8x384xf32> to vector<8x128xf32>
    %198 = vector.extract_strided_slice %188 {offsets = [0, 128], sizes = [8, 128], strides = [1, 1]} : vector<8x384xf32> to vector<8x128xf32>
    %199 = arith.addf %197, %198 : vector<8x128xf32>
    %200 = arith.negf %199 : vector<8x128xf32>
    %201 = math.exp %200 : vector<8x128xf32>
    %cst_58 = arith.constant 1.000000e+00 : f32
    %202 = vector.broadcast %cst_58 : f32 to vector<8x128xf32>
    %203 = arith.addf %202, %201 : vector<8x128xf32>
    %204 = arith.divf %202, %203 : vector<8x128xf32>
    %205 = vector.extract_strided_slice %187 {offsets = [0, 256], sizes = [8, 128], strides = [1, 1]} : vector<8x384xf32> to vector<8x128xf32>
    %206 = vector.extract_strided_slice %188 {offsets = [0, 256], sizes = [8, 128], strides = [1, 1]} : vector<8x384xf32> to vector<8x128xf32>
    %207 = vector.broadcast %15 : vector<1x128xf32> to vector<8x128xf32>
    %208 = arith.addf %206, %207 : vector<8x128xf32>
    %209 = arith.mulf %196, %208 : vector<8x128xf32>
    %210 = arith.addf %205, %209 : vector<8x128xf32>
    %211 = math.tanh %210 : vector<8x128xf32>
    %cst_59 = arith.constant 1.000000e+00 : f32
    %212 = vector.broadcast %cst_59 : f32 to vector<8x128xf32>
    %213 = arith.subf %212, %204 : vector<8x128xf32>
    %214 = arith.mulf %213, %211 : vector<8x128xf32>
    %215 = arith.mulf %204, %183 : vector<8x128xf32>
    %216 = arith.addf %214, %215 : vector<8x128xf32>
    %c6_i32 = arith.constant 6 : i32
    %c8_i32_60 = arith.constant 8 : i32
    %217 = arith.muli %c6_i32, %c8_i32_60 : i32
    %218 = tpu.assume_multiple %217, 8 : i32
    %219 = arith.index_cast %218 : i32 to index
    %c0_61 = arith.constant 0 : index
    %220 = vector.load %arg14[%219, %c0_61] : memref<64x384xf32, #tpu.memory_space<vmem>>, vector<8x384xf32>
    %cst_62 = arith.constant dense<0.000000e+00> : vector<8x384xf32>
    %221 = tpu.matmul %216, %14, %cst_62 {dimension_numbers = #tpu.dot_dimension_numbers<[1], [0], [0], [1], [0, 0, 1, 1], [], []>} : vector<8x128xf32>, vector<128x384xf32>, vector<8x384xf32> -> vector<8x384xf32>
    %222 = vector.extract_strided_slice %220 {offsets = [0, 0], sizes = [8, 128], strides = [1, 1]} : vector<8x384xf32> to vector<8x128xf32>
    %223 = vector.extract_strided_slice %221 {offsets = [0, 0], sizes = [8, 128], strides = [1, 1]} : vector<8x384xf32> to vector<8x128xf32>
    %224 = arith.addf %222, %223 : vector<8x128xf32>
    %225 = arith.negf %224 : vector<8x128xf32>
    %226 = math.exp %225 : vector<8x128xf32>
    %cst_63 = arith.constant 1.000000e+00 : f32
    %227 = vector.broadcast %cst_63 : f32 to vector<8x128xf32>
    %228 = arith.addf %227, %226 : vector<8x128xf32>
    %229 = arith.divf %227, %228 : vector<8x128xf32>
    %230 = vector.extract_strided_slice %220 {offsets = [0, 128], sizes = [8, 128], strides = [1, 1]} : vector<8x384xf32> to vector<8x128xf32>
    %231 = vector.extract_strided_slice %221 {offsets = [0, 128], sizes = [8, 128], strides = [1, 1]} : vector<8x384xf32> to vector<8x128xf32>
    %232 = arith.addf %230, %231 : vector<8x128xf32>
    %233 = arith.negf %232 : vector<8x128xf32>
    %234 = math.exp %233 : vector<8x128xf32>
    %cst_64 = arith.constant 1.000000e+00 : f32
    %235 = vector.broadcast %cst_64 : f32 to vector<8x128xf32>
    %236 = arith.addf %235, %234 : vector<8x128xf32>
    %237 = arith.divf %235, %236 : vector<8x128xf32>
    %238 = vector.extract_strided_slice %220 {offsets = [0, 256], sizes = [8, 128], strides = [1, 1]} : vector<8x384xf32> to vector<8x128xf32>
    %239 = vector.extract_strided_slice %221 {offsets = [0, 256], sizes = [8, 128], strides = [1, 1]} : vector<8x384xf32> to vector<8x128xf32>
    %240 = vector.broadcast %15 : vector<1x128xf32> to vector<8x128xf32>
    %241 = arith.addf %239, %240 : vector<8x128xf32>
    %242 = arith.mulf %229, %241 : vector<8x128xf32>
    %243 = arith.addf %238, %242 : vector<8x128xf32>
    %244 = math.tanh %243 : vector<8x128xf32>
    %cst_65 = arith.constant 1.000000e+00 : f32
    %245 = vector.broadcast %cst_65 : f32 to vector<8x128xf32>
    %246 = arith.subf %245, %237 : vector<8x128xf32>
    %247 = arith.mulf %246, %244 : vector<8x128xf32>
    %248 = arith.mulf %237, %216 : vector<8x128xf32>
    %249 = arith.addf %247, %248 : vector<8x128xf32>
    %c7_i32 = arith.constant 7 : i32
    %c8_i32_66 = arith.constant 8 : i32
    %250 = arith.muli %c7_i32, %c8_i32_66 : i32
    %251 = tpu.assume_multiple %250, 8 : i32
    %252 = arith.index_cast %251 : i32 to index
    %c0_67 = arith.constant 0 : index
    %253 = vector.load %arg14[%252, %c0_67] : memref<64x384xf32, #tpu.memory_space<vmem>>, vector<8x384xf32>
    %cst_68 = arith.constant dense<0.000000e+00> : vector<8x384xf32>
    %254 = tpu.matmul %249, %14, %cst_68 {dimension_numbers = #tpu.dot_dimension_numbers<[1], [0], [0], [1], [0, 0, 1, 1], [], []>} : vector<8x128xf32>, vector<128x384xf32>, vector<8x384xf32> -> vector<8x384xf32>
    %255 = vector.extract_strided_slice %253 {offsets = [0, 0], sizes = [8, 128], strides = [1, 1]} : vector<8x384xf32> to vector<8x128xf32>
    %256 = vector.extract_strided_slice %254 {offsets = [0, 0], sizes = [8, 128], strides = [1, 1]} : vector<8x384xf32> to vector<8x128xf32>
    %257 = arith.addf %255, %256 : vector<8x128xf32>
    %258 = arith.negf %257 : vector<8x128xf32>
    %259 = math.exp %258 : vector<8x128xf32>
    %cst_69 = arith.constant 1.000000e+00 : f32
    %260 = vector.broadcast %cst_69 : f32 to vector<8x128xf32>
    %261 = arith.addf %260, %259 : vector<8x128xf32>
    %262 = arith.divf %260, %261 : vector<8x128xf32>
    %263 = vector.extract_strided_slice %253 {offsets = [0, 128], sizes = [8, 128], strides = [1, 1]} : vector<8x384xf32> to vector<8x128xf32>
    %264 = vector.extract_strided_slice %254 {offsets = [0, 128], sizes = [8, 128], strides = [1, 1]} : vector<8x384xf32> to vector<8x128xf32>
    %265 = arith.addf %263, %264 : vector<8x128xf32>
    %266 = arith.negf %265 : vector<8x128xf32>
    %267 = math.exp %266 : vector<8x128xf32>
    %cst_70 = arith.constant 1.000000e+00 : f32
    %268 = vector.broadcast %cst_70 : f32 to vector<8x128xf32>
    %269 = arith.addf %268, %267 : vector<8x128xf32>
    %270 = arith.divf %268, %269 : vector<8x128xf32>
    %271 = vector.extract_strided_slice %253 {offsets = [0, 256], sizes = [8, 128], strides = [1, 1]} : vector<8x384xf32> to vector<8x128xf32>
    %272 = vector.extract_strided_slice %254 {offsets = [0, 256], sizes = [8, 128], strides = [1, 1]} : vector<8x384xf32> to vector<8x128xf32>
    %273 = vector.broadcast %15 : vector<1x128xf32> to vector<8x128xf32>
    %274 = arith.addf %272, %273 : vector<8x128xf32>
    %275 = arith.mulf %262, %274 : vector<8x128xf32>
    %276 = arith.addf %271, %275 : vector<8x128xf32>
    %277 = math.tanh %276 : vector<8x128xf32>
    %cst_71 = arith.constant 1.000000e+00 : f32
    %278 = vector.broadcast %cst_71 : f32 to vector<8x128xf32>
    %279 = arith.subf %278, %270 : vector<8x128xf32>
    %280 = arith.mulf %279, %277 : vector<8x128xf32>
    %281 = arith.mulf %270, %249 : vector<8x128xf32>
    %282 = arith.addf %280, %281 : vector<8x128xf32>
    %c8_i32_72 = arith.constant 8 : i32
    %c0_i32_73 = arith.constant 0 : i32
    %c8_i32_74 = arith.constant 8 : i32
    %283 = arith.muli %c0_i32_73, %c8_i32_74 : i32
    %284 = tpu.assume_multiple %283, 8 : i32
    %285 = arith.index_cast %284 : i32 to index
    %c0_75 = arith.constant 0 : index
    %286 = vector.load %arg15[%285, %c0_75] : memref<64x384xf32, #tpu.memory_space<vmem>>, vector<8x384xf32>
    %cst_76 = arith.constant dense<0.000000e+00> : vector<8x384xf32>
    %287 = tpu.matmul %282, %16, %cst_76 {dimension_numbers = #tpu.dot_dimension_numbers<[1], [0], [0], [1], [0, 0, 1, 1], [], []>} : vector<8x128xf32>, vector<128x384xf32>, vector<8x384xf32> -> vector<8x384xf32>
    %288 = vector.extract_strided_slice %286 {offsets = [0, 0], sizes = [8, 128], strides = [1, 1]} : vector<8x384xf32> to vector<8x128xf32>
    %289 = vector.extract_strided_slice %287 {offsets = [0, 0], sizes = [8, 128], strides = [1, 1]} : vector<8x384xf32> to vector<8x128xf32>
    %290 = arith.addf %288, %289 : vector<8x128xf32>
    %291 = arith.negf %290 : vector<8x128xf32>
    %292 = math.exp %291 : vector<8x128xf32>
    %cst_77 = arith.constant 1.000000e+00 : f32
    %293 = vector.broadcast %cst_77 : f32 to vector<8x128xf32>
    %294 = arith.addf %293, %292 : vector<8x128xf32>
    %295 = arith.divf %293, %294 : vector<8x128xf32>
    %296 = vector.extract_strided_slice %286 {offsets = [0, 128], sizes = [8, 128], strides = [1, 1]} : vector<8x384xf32> to vector<8x128xf32>
    %297 = vector.extract_strided_slice %287 {offsets = [0, 128], sizes = [8, 128], strides = [1, 1]} : vector<8x384xf32> to vector<8x128xf32>
    %298 = arith.addf %296, %297 : vector<8x128xf32>
    %299 = arith.negf %298 : vector<8x128xf32>
    %300 = math.exp %299 : vector<8x128xf32>
    %cst_78 = arith.constant 1.000000e+00 : f32
    %301 = vector.broadcast %cst_78 : f32 to vector<8x128xf32>
    %302 = arith.addf %301, %300 : vector<8x128xf32>
    %303 = arith.divf %301, %302 : vector<8x128xf32>
    %304 = vector.extract_strided_slice %286 {offsets = [0, 256], sizes = [8, 128], strides = [1, 1]} : vector<8x384xf32> to vector<8x128xf32>
    %305 = vector.extract_strided_slice %287 {offsets = [0, 256], sizes = [8, 128], strides = [1, 1]} : vector<8x384xf32> to vector<8x128xf32>
    %306 = vector.broadcast %17 : vector<1x128xf32> to vector<8x128xf32>
    %307 = arith.addf %305, %306 : vector<8x128xf32>
    %308 = arith.mulf %295, %307 : vector<8x128xf32>
    %309 = arith.addf %304, %308 : vector<8x128xf32>
    %310 = math.tanh %309 : vector<8x128xf32>
    %cst_79 = arith.constant 1.000000e+00 : f32
    %311 = vector.broadcast %cst_79 : f32 to vector<8x128xf32>
    %312 = arith.subf %311, %303 : vector<8x128xf32>
    %313 = arith.mulf %312, %310 : vector<8x128xf32>
    %314 = arith.mulf %303, %282 : vector<8x128xf32>
    %315 = arith.addf %313, %314 : vector<8x128xf32>
    %316 = arith.index_cast %284 : i32 to index
    %c0_80 = arith.constant 0 : index
    %317 = vector.load %arg16[%316, %c0_80] : memref<64x128xf32, #tpu.memory_space<vmem>>, vector<8x128xf32>
    tpu.vector_store %arg16[%316, %c0_80], %315 {strides = array<i32>} : memref<64x128xf32, #tpu.memory_space<vmem>>, vector<8x128xf32>,
    %c1_i32_81 = arith.constant 1 : i32
    %c8_i32_82 = arith.constant 8 : i32
    %318 = arith.muli %c1_i32_81, %c8_i32_82 : i32
    %319 = tpu.assume_multiple %318, 8 : i32
    %320 = arith.index_cast %319 : i32 to index
    %c0_83 = arith.constant 0 : index
    %321 = vector.load %arg15[%320, %c0_83] : memref<64x384xf32, #tpu.memory_space<vmem>>, vector<8x384xf32>
    %cst_84 = arith.constant dense<0.000000e+00> : vector<8x384xf32>
    %322 = tpu.matmul %315, %16, %cst_84 {dimension_numbers = #tpu.dot_dimension_numbers<[1], [0], [0], [1], [0, 0, 1, 1], [], []>} : vector<8x128xf32>, vector<128x384xf32>, vector<8x384xf32> -> vector<8x384xf32>
    %323 = vector.extract_strided_slice %321 {offsets = [0, 0], sizes = [8, 128], strides = [1, 1]} : vector<8x384xf32> to vector<8x128xf32>
    %324 = vector.extract_strided_slice %322 {offsets = [0, 0], sizes = [8, 128], strides = [1, 1]} : vector<8x384xf32> to vector<8x128xf32>
    %325 = arith.addf %323, %324 : vector<8x128xf32>
    %326 = arith.negf %325 : vector<8x128xf32>
    %327 = math.exp %326 : vector<8x128xf32>
    %cst_85 = arith.constant 1.000000e+00 : f32
    %328 = vector.broadcast %cst_85 : f32 to vector<8x128xf32>
    %329 = arith.addf %328, %327 : vector<8x128xf32>
    %330 = arith.divf %328, %329 : vector<8x128xf32>
    %331 = vector.extract_strided_slice %321 {offsets = [0, 128], sizes = [8, 128], strides = [1, 1]} : vector<8x384xf32> to vector<8x128xf32>
    %332 = vector.extract_strided_slice %322 {offsets = [0, 128], sizes = [8, 128], strides = [1, 1]} : vector<8x384xf32> to vector<8x128xf32>
    %333 = arith.addf %331, %332 : vector<8x128xf32>
    %334 = arith.negf %333 : vector<8x128xf32>
    %335 = math.exp %334 : vector<8x128xf32>
    %cst_86 = arith.constant 1.000000e+00 : f32
    %336 = vector.broadcast %cst_86 : f32 to vector<8x128xf32>
    %337 = arith.addf %336, %335 : vector<8x128xf32>
    %338 = arith.divf %336, %337 : vector<8x128xf32>
    %339 = vector.extract_strided_slice %321 {offsets = [0, 256], sizes = [8, 128], strides = [1, 1]} : vector<8x384xf32> to vector<8x128xf32>
    %340 = vector.extract_strided_slice %322 {offsets = [0, 256], sizes = [8, 128], strides = [1, 1]} : vector<8x384xf32> to vector<8x128xf32>
    %341 = vector.broadcast %17 : vector<1x128xf32> to vector<8x128xf32>
    %342 = arith.addf %340, %341 : vector<8x128xf32>
    %343 = arith.mulf %330, %342 : vector<8x128xf32>
    %344 = arith.addf %339, %343 : vector<8x128xf32>
    %345 = math.tanh %344 : vector<8x128xf32>
    %cst_87 = arith.constant 1.000000e+00 : f32
    %346 = vector.broadcast %cst_87 : f32 to vector<8x128xf32>
    %347 = arith.subf %346, %338 : vector<8x128xf32>
    %348 = arith.mulf %347, %345 : vector<8x128xf32>
    %349 = arith.mulf %338, %315 : vector<8x128xf32>
    %350 = arith.addf %348, %349 : vector<8x128xf32>
    %351 = arith.index_cast %319 : i32 to index
    %c0_88 = arith.constant 0 : index
    %352 = vector.load %arg16[%351, %c0_88] : memref<64x128xf32, #tpu.memory_space<vmem>>, vector<8x128xf32>
    tpu.vector_store %arg16[%351, %c0_88], %350 {strides = array<i32>} : memref<64x128xf32, #tpu.memory_space<vmem>>, vector<8x128xf32>,
    %c2_i32_89 = arith.constant 2 : i32
    %c8_i32_90 = arith.constant 8 : i32
    %353 = arith.muli %c2_i32_89, %c8_i32_90 : i32
    %354 = tpu.assume_multiple %353, 8 : i32
    %355 = arith.index_cast %354 : i32 to index
    %c0_91 = arith.constant 0 : index
    %356 = vector.load %arg15[%355, %c0_91] : memref<64x384xf32, #tpu.memory_space<vmem>>, vector<8x384xf32>
    %cst_92 = arith.constant dense<0.000000e+00> : vector<8x384xf32>
    %357 = tpu.matmul %350, %16, %cst_92 {dimension_numbers = #tpu.dot_dimension_numbers<[1], [0], [0], [1], [0, 0, 1, 1], [], []>} : vector<8x128xf32>, vector<128x384xf32>, vector<8x384xf32> -> vector<8x384xf32>
    %358 = vector.extract_strided_slice %356 {offsets = [0, 0], sizes = [8, 128], strides = [1, 1]} : vector<8x384xf32> to vector<8x128xf32>
    %359 = vector.extract_strided_slice %357 {offsets = [0, 0], sizes = [8, 128], strides = [1, 1]} : vector<8x384xf32> to vector<8x128xf32>
    %360 = arith.addf %358, %359 : vector<8x128xf32>
    %361 = arith.negf %360 : vector<8x128xf32>
    %362 = math.exp %361 : vector<8x128xf32>
    %cst_93 = arith.constant 1.000000e+00 : f32
    %363 = vector.broadcast %cst_93 : f32 to vector<8x128xf32>
    %364 = arith.addf %363, %362 : vector<8x128xf32>
    %365 = arith.divf %363, %364 : vector<8x128xf32>
    %366 = vector.extract_strided_slice %356 {offsets = [0, 128], sizes = [8, 128], strides = [1, 1]} : vector<8x384xf32> to vector<8x128xf32>
    %367 = vector.extract_strided_slice %357 {offsets = [0, 128], sizes = [8, 128], strides = [1, 1]} : vector<8x384xf32> to vector<8x128xf32>
    %368 = arith.addf %366, %367 : vector<8x128xf32>
    %369 = arith.negf %368 : vector<8x128xf32>
    %370 = math.exp %369 : vector<8x128xf32>
    %cst_94 = arith.constant 1.000000e+00 : f32
    %371 = vector.broadcast %cst_94 : f32 to vector<8x128xf32>
    %372 = arith.addf %371, %370 : vector<8x128xf32>
    %373 = arith.divf %371, %372 : vector<8x128xf32>
    %374 = vector.extract_strided_slice %356 {offsets = [0, 256], sizes = [8, 128], strides = [1, 1]} : vector<8x384xf32> to vector<8x128xf32>
    %375 = vector.extract_strided_slice %357 {offsets = [0, 256], sizes = [8, 128], strides = [1, 1]} : vector<8x384xf32> to vector<8x128xf32>
    %376 = vector.broadcast %17 : vector<1x128xf32> to vector<8x128xf32>
    %377 = arith.addf %375, %376 : vector<8x128xf32>
    %378 = arith.mulf %365, %377 : vector<8x128xf32>
    %379 = arith.addf %374, %378 : vector<8x128xf32>
    %380 = math.tanh %379 : vector<8x128xf32>
    %cst_95 = arith.constant 1.000000e+00 : f32
    %381 = vector.broadcast %cst_95 : f32 to vector<8x128xf32>
    %382 = arith.subf %381, %373 : vector<8x128xf32>
    %383 = arith.mulf %382, %380 : vector<8x128xf32>
    %384 = arith.mulf %373, %350 : vector<8x128xf32>
    %385 = arith.addf %383, %384 : vector<8x128xf32>
    %386 = arith.index_cast %354 : i32 to index
    %c0_96 = arith.constant 0 : index
    %387 = vector.load %arg16[%386, %c0_96] : memref<64x128xf32, #tpu.memory_space<vmem>>, vector<8x128xf32>
    tpu.vector_store %arg16[%386, %c0_96], %385 {strides = array<i32>} : memref<64x128xf32, #tpu.memory_space<vmem>>, vector<8x128xf32>,
    %c3_i32_97 = arith.constant 3 : i32
    %c8_i32_98 = arith.constant 8 : i32
    %388 = arith.muli %c3_i32_97, %c8_i32_98 : i32
    %389 = tpu.assume_multiple %388, 8 : i32
    %390 = arith.index_cast %389 : i32 to index
    %c0_99 = arith.constant 0 : index
    %391 = vector.load %arg15[%390, %c0_99] : memref<64x384xf32, #tpu.memory_space<vmem>>, vector<8x384xf32>
    %cst_100 = arith.constant dense<0.000000e+00> : vector<8x384xf32>
    %392 = tpu.matmul %385, %16, %cst_100 {dimension_numbers = #tpu.dot_dimension_numbers<[1], [0], [0], [1], [0, 0, 1, 1], [], []>} : vector<8x128xf32>, vector<128x384xf32>, vector<8x384xf32> -> vector<8x384xf32>
    %393 = vector.extract_strided_slice %391 {offsets = [0, 0], sizes = [8, 128], strides = [1, 1]} : vector<8x384xf32> to vector<8x128xf32>
    %394 = vector.extract_strided_slice %392 {offsets = [0, 0], sizes = [8, 128], strides = [1, 1]} : vector<8x384xf32> to vector<8x128xf32>
    %395 = arith.addf %393, %394 : vector<8x128xf32>
    %396 = arith.negf %395 : vector<8x128xf32>
    %397 = math.exp %396 : vector<8x128xf32>
    %cst_101 = arith.constant 1.000000e+00 : f32
    %398 = vector.broadcast %cst_101 : f32 to vector<8x128xf32>
    %399 = arith.addf %398, %397 : vector<8x128xf32>
    %400 = arith.divf %398, %399 : vector<8x128xf32>
    %401 = vector.extract_strided_slice %391 {offsets = [0, 128], sizes = [8, 128], strides = [1, 1]} : vector<8x384xf32> to vector<8x128xf32>
    %402 = vector.extract_strided_slice %392 {offsets = [0, 128], sizes = [8, 128], strides = [1, 1]} : vector<8x384xf32> to vector<8x128xf32>
    %403 = arith.addf %401, %402 : vector<8x128xf32>
    %404 = arith.negf %403 : vector<8x128xf32>
    %405 = math.exp %404 : vector<8x128xf32>
    %cst_102 = arith.constant 1.000000e+00 : f32
    %406 = vector.broadcast %cst_102 : f32 to vector<8x128xf32>
    %407 = arith.addf %406, %405 : vector<8x128xf32>
    %408 = arith.divf %406, %407 : vector<8x128xf32>
    %409 = vector.extract_strided_slice %391 {offsets = [0, 256], sizes = [8, 128], strides = [1, 1]} : vector<8x384xf32> to vector<8x128xf32>
    %410 = vector.extract_strided_slice %392 {offsets = [0, 256], sizes = [8, 128], strides = [1, 1]} : vector<8x384xf32> to vector<8x128xf32>
    %411 = vector.broadcast %17 : vector<1x128xf32> to vector<8x128xf32>
    %412 = arith.addf %410, %411 : vector<8x128xf32>
    %413 = arith.mulf %400, %412 : vector<8x128xf32>
    %414 = arith.addf %409, %413 : vector<8x128xf32>
    %415 = math.tanh %414 : vector<8x128xf32>
    %cst_103 = arith.constant 1.000000e+00 : f32
    %416 = vector.broadcast %cst_103 : f32 to vector<8x128xf32>
    %417 = arith.subf %416, %408 : vector<8x128xf32>
    %418 = arith.mulf %417, %415 : vector<8x128xf32>
    %419 = arith.mulf %408, %385 : vector<8x128xf32>
    %420 = arith.addf %418, %419 : vector<8x128xf32>
    %421 = arith.index_cast %389 : i32 to index
    %c0_104 = arith.constant 0 : index
    %422 = vector.load %arg16[%421, %c0_104] : memref<64x128xf32, #tpu.memory_space<vmem>>, vector<8x128xf32>
    tpu.vector_store %arg16[%421, %c0_104], %420 {strides = array<i32>} : memref<64x128xf32, #tpu.memory_space<vmem>>, vector<8x128xf32>,
    %c4_i32_105 = arith.constant 4 : i32
    %c8_i32_106 = arith.constant 8 : i32
    %423 = arith.muli %c4_i32_105, %c8_i32_106 : i32
    %424 = tpu.assume_multiple %423, 8 : i32
    %425 = arith.index_cast %424 : i32 to index
    %c0_107 = arith.constant 0 : index
    %426 = vector.load %arg15[%425, %c0_107] : memref<64x384xf32, #tpu.memory_space<vmem>>, vector<8x384xf32>
    %cst_108 = arith.constant dense<0.000000e+00> : vector<8x384xf32>
    %427 = tpu.matmul %420, %16, %cst_108 {dimension_numbers = #tpu.dot_dimension_numbers<[1], [0], [0], [1], [0, 0, 1, 1], [], []>} : vector<8x128xf32>, vector<128x384xf32>, vector<8x384xf32> -> vector<8x384xf32>
    %428 = vector.extract_strided_slice %426 {offsets = [0, 0], sizes = [8, 128], strides = [1, 1]} : vector<8x384xf32> to vector<8x128xf32>
    %429 = vector.extract_strided_slice %427 {offsets = [0, 0], sizes = [8, 128], strides = [1, 1]} : vector<8x384xf32> to vector<8x128xf32>
    %430 = arith.addf %428, %429 : vector<8x128xf32>
    %431 = arith.negf %430 : vector<8x128xf32>
    %432 = math.exp %431 : vector<8x128xf32>
    %cst_109 = arith.constant 1.000000e+00 : f32
    %433 = vector.broadcast %cst_109 : f32 to vector<8x128xf32>
    %434 = arith.addf %433, %432 : vector<8x128xf32>
    %435 = arith.divf %433, %434 : vector<8x128xf32>
    %436 = vector.extract_strided_slice %426 {offsets = [0, 128], sizes = [8, 128], strides = [1, 1]} : vector<8x384xf32> to vector<8x128xf32>
    %437 = vector.extract_strided_slice %427 {offsets = [0, 128], sizes = [8, 128], strides = [1, 1]} : vector<8x384xf32> to vector<8x128xf32>
    %438 = arith.addf %436, %437 : vector<8x128xf32>
    %439 = arith.negf %438 : vector<8x128xf32>
    %440 = math.exp %439 : vector<8x128xf32>
    %cst_110 = arith.constant 1.000000e+00 : f32
    %441 = vector.broadcast %cst_110 : f32 to vector<8x128xf32>
    %442 = arith.addf %441, %440 : vector<8x128xf32>
    %443 = arith.divf %441, %442 : vector<8x128xf32>
    %444 = vector.extract_strided_slice %426 {offsets = [0, 256], sizes = [8, 128], strides = [1, 1]} : vector<8x384xf32> to vector<8x128xf32>
    %445 = vector.extract_strided_slice %427 {offsets = [0, 256], sizes = [8, 128], strides = [1, 1]} : vector<8x384xf32> to vector<8x128xf32>
    %446 = vector.broadcast %17 : vector<1x128xf32> to vector<8x128xf32>
    %447 = arith.addf %445, %446 : vector<8x128xf32>
    %448 = arith.mulf %435, %447 : vector<8x128xf32>
    %449 = arith.addf %444, %448 : vector<8x128xf32>
    %450 = math.tanh %449 : vector<8x128xf32>
    %cst_111 = arith.constant 1.000000e+00 : f32
    %451 = vector.broadcast %cst_111 : f32 to vector<8x128xf32>
    %452 = arith.subf %451, %443 : vector<8x128xf32>
    %453 = arith.mulf %452, %450 : vector<8x128xf32>
    %454 = arith.mulf %443, %420 : vector<8x128xf32>
    %455 = arith.addf %453, %454 : vector<8x128xf32>
    %456 = arith.index_cast %424 : i32 to index
    %c0_112 = arith.constant 0 : index
    %457 = vector.load %arg16[%456, %c0_112] : memref<64x128xf32, #tpu.memory_space<vmem>>, vector<8x128xf32>
    tpu.vector_store %arg16[%456, %c0_112], %455 {strides = array<i32>} : memref<64x128xf32, #tpu.memory_space<vmem>>, vector<8x128xf32>,
    %c5_i32_113 = arith.constant 5 : i32
    %c8_i32_114 = arith.constant 8 : i32
    %458 = arith.muli %c5_i32_113, %c8_i32_114 : i32
    %459 = tpu.assume_multiple %458, 8 : i32
    %460 = arith.index_cast %459 : i32 to index
    %c0_115 = arith.constant 0 : index
    %461 = vector.load %arg15[%460, %c0_115] : memref<64x384xf32, #tpu.memory_space<vmem>>, vector<8x384xf32>
    %cst_116 = arith.constant dense<0.000000e+00> : vector<8x384xf32>
    %462 = tpu.matmul %455, %16, %cst_116 {dimension_numbers = #tpu.dot_dimension_numbers<[1], [0], [0], [1], [0, 0, 1, 1], [], []>} : vector<8x128xf32>, vector<128x384xf32>, vector<8x384xf32> -> vector<8x384xf32>
    %463 = vector.extract_strided_slice %461 {offsets = [0, 0], sizes = [8, 128], strides = [1, 1]} : vector<8x384xf32> to vector<8x128xf32>
    %464 = vector.extract_strided_slice %462 {offsets = [0, 0], sizes = [8, 128], strides = [1, 1]} : vector<8x384xf32> to vector<8x128xf32>
    %465 = arith.addf %463, %464 : vector<8x128xf32>
    %466 = arith.negf %465 : vector<8x128xf32>
    %467 = math.exp %466 : vector<8x128xf32>
    %cst_117 = arith.constant 1.000000e+00 : f32
    %468 = vector.broadcast %cst_117 : f32 to vector<8x128xf32>
    %469 = arith.addf %468, %467 : vector<8x128xf32>
    %470 = arith.divf %468, %469 : vector<8x128xf32>
    %471 = vector.extract_strided_slice %461 {offsets = [0, 128], sizes = [8, 128], strides = [1, 1]} : vector<8x384xf32> to vector<8x128xf32>
    %472 = vector.extract_strided_slice %462 {offsets = [0, 128], sizes = [8, 128], strides = [1, 1]} : vector<8x384xf32> to vector<8x128xf32>
    %473 = arith.addf %471, %472 : vector<8x128xf32>
    %474 = arith.negf %473 : vector<8x128xf32>
    %475 = math.exp %474 : vector<8x128xf32>
    %cst_118 = arith.constant 1.000000e+00 : f32
    %476 = vector.broadcast %cst_118 : f32 to vector<8x128xf32>
    %477 = arith.addf %476, %475 : vector<8x128xf32>
    %478 = arith.divf %476, %477 : vector<8x128xf32>
    %479 = vector.extract_strided_slice %461 {offsets = [0, 256], sizes = [8, 128], strides = [1, 1]} : vector<8x384xf32> to vector<8x128xf32>
    %480 = vector.extract_strided_slice %462 {offsets = [0, 256], sizes = [8, 128], strides = [1, 1]} : vector<8x384xf32> to vector<8x128xf32>
    %481 = vector.broadcast %17 : vector<1x128xf32> to vector<8x128xf32>
    %482 = arith.addf %480, %481 : vector<8x128xf32>
    %483 = arith.mulf %470, %482 : vector<8x128xf32>
    %484 = arith.addf %479, %483 : vector<8x128xf32>
    %485 = math.tanh %484 : vector<8x128xf32>
    %cst_119 = arith.constant 1.000000e+00 : f32
    %486 = vector.broadcast %cst_119 : f32 to vector<8x128xf32>
    %487 = arith.subf %486, %478 : vector<8x128xf32>
    %488 = arith.mulf %487, %485 : vector<8x128xf32>
    %489 = arith.mulf %478, %455 : vector<8x128xf32>
    %490 = arith.addf %488, %489 : vector<8x128xf32>
    %491 = arith.index_cast %459 : i32 to index
    %c0_120 = arith.constant 0 : index
    %492 = vector.load %arg16[%491, %c0_120] : memref<64x128xf32, #tpu.memory_space<vmem>>, vector<8x128xf32>
    tpu.vector_store %arg16[%491, %c0_120], %490 {strides = array<i32>} : memref<64x128xf32, #tpu.memory_space<vmem>>, vector<8x128xf32>,
    %c6_i32_121 = arith.constant 6 : i32
    %c8_i32_122 = arith.constant 8 : i32
    %493 = arith.muli %c6_i32_121, %c8_i32_122 : i32
    %494 = tpu.assume_multiple %493, 8 : i32
    %495 = arith.index_cast %494 : i32 to index
    %c0_123 = arith.constant 0 : index
    %496 = vector.load %arg15[%495, %c0_123] : memref<64x384xf32, #tpu.memory_space<vmem>>, vector<8x384xf32>
    %cst_124 = arith.constant dense<0.000000e+00> : vector<8x384xf32>
    %497 = tpu.matmul %490, %16, %cst_124 {dimension_numbers = #tpu.dot_dimension_numbers<[1], [0], [0], [1], [0, 0, 1, 1], [], []>} : vector<8x128xf32>, vector<128x384xf32>, vector<8x384xf32> -> vector<8x384xf32>
    %498 = vector.extract_strided_slice %496 {offsets = [0, 0], sizes = [8, 128], strides = [1, 1]} : vector<8x384xf32> to vector<8x128xf32>
    %499 = vector.extract_strided_slice %497 {offsets = [0, 0], sizes = [8, 128], strides = [1, 1]} : vector<8x384xf32> to vector<8x128xf32>
    %500 = arith.addf %498, %499 : vector<8x128xf32>
    %501 = arith.negf %500 : vector<8x128xf32>
    %502 = math.exp %501 : vector<8x128xf32>
    %cst_125 = arith.constant 1.000000e+00 : f32
    %503 = vector.broadcast %cst_125 : f32 to vector<8x128xf32>
    %504 = arith.addf %503, %502 : vector<8x128xf32>
    %505 = arith.divf %503, %504 : vector<8x128xf32>
    %506 = vector.extract_strided_slice %496 {offsets = [0, 128], sizes = [8, 128], strides = [1, 1]} : vector<8x384xf32> to vector<8x128xf32>
    %507 = vector.extract_strided_slice %497 {offsets = [0, 128], sizes = [8, 128], strides = [1, 1]} : vector<8x384xf32> to vector<8x128xf32>
    %508 = arith.addf %506, %507 : vector<8x128xf32>
    %509 = arith.negf %508 : vector<8x128xf32>
    %510 = math.exp %509 : vector<8x128xf32>
    %cst_126 = arith.constant 1.000000e+00 : f32
    %511 = vector.broadcast %cst_126 : f32 to vector<8x128xf32>
    %512 = arith.addf %511, %510 : vector<8x128xf32>
    %513 = arith.divf %511, %512 : vector<8x128xf32>
    %514 = vector.extract_strided_slice %496 {offsets = [0, 256], sizes = [8, 128], strides = [1, 1]} : vector<8x384xf32> to vector<8x128xf32>
    %515 = vector.extract_strided_slice %497 {offsets = [0, 256], sizes = [8, 128], strides = [1, 1]} : vector<8x384xf32> to vector<8x128xf32>
    %516 = vector.broadcast %17 : vector<1x128xf32> to vector<8x128xf32>
    %517 = arith.addf %515, %516 : vector<8x128xf32>
    %518 = arith.mulf %505, %517 : vector<8x128xf32>
    %519 = arith.addf %514, %518 : vector<8x128xf32>
    %520 = math.tanh %519 : vector<8x128xf32>
    %cst_127 = arith.constant 1.000000e+00 : f32
    %521 = vector.broadcast %cst_127 : f32 to vector<8x128xf32>
    %522 = arith.subf %521, %513 : vector<8x128xf32>
    %523 = arith.mulf %522, %520 : vector<8x128xf32>
    %524 = arith.mulf %513, %490 : vector<8x128xf32>
    %525 = arith.addf %523, %524 : vector<8x128xf32>
    %526 = arith.index_cast %494 : i32 to index
    %c0_128 = arith.constant 0 : index
    %527 = vector.load %arg16[%526, %c0_128] : memref<64x128xf32, #tpu.memory_space<vmem>>, vector<8x128xf32>
    tpu.vector_store %arg16[%526, %c0_128], %525 {strides = array<i32>} : memref<64x128xf32, #tpu.memory_space<vmem>>, vector<8x128xf32>,
    %c7_i32_129 = arith.constant 7 : i32
    %c8_i32_130 = arith.constant 8 : i32
    %528 = arith.muli %c7_i32_129, %c8_i32_130 : i32
    %529 = tpu.assume_multiple %528, 8 : i32
    %530 = arith.index_cast %529 : i32 to index
    %c0_131 = arith.constant 0 : index
    %531 = vector.load %arg15[%530, %c0_131] : memref<64x384xf32, #tpu.memory_space<vmem>>, vector<8x384xf32>
    %cst_132 = arith.constant dense<0.000000e+00> : vector<8x384xf32>
    %532 = tpu.matmul %525, %16, %cst_132 {dimension_numbers = #tpu.dot_dimension_numbers<[1], [0], [0], [1], [0, 0, 1, 1], [], []>} : vector<8x128xf32>, vector<128x384xf32>, vector<8x384xf32> -> vector<8x384xf32>
    %533 = vector.extract_strided_slice %531 {offsets = [0, 0], sizes = [8, 128], strides = [1, 1]} : vector<8x384xf32> to vector<8x128xf32>
    %534 = vector.extract_strided_slice %532 {offsets = [0, 0], sizes = [8, 128], strides = [1, 1]} : vector<8x384xf32> to vector<8x128xf32>
    %535 = arith.addf %533, %534 : vector<8x128xf32>
    %536 = arith.negf %535 : vector<8x128xf32>
    %537 = math.exp %536 : vector<8x128xf32>
    %cst_133 = arith.constant 1.000000e+00 : f32
    %538 = vector.broadcast %cst_133 : f32 to vector<8x128xf32>
    %539 = arith.addf %538, %537 : vector<8x128xf32>
    %540 = arith.divf %538, %539 : vector<8x128xf32>
    %541 = vector.extract_strided_slice %531 {offsets = [0, 128], sizes = [8, 128], strides = [1, 1]} : vector<8x384xf32> to vector<8x128xf32>
    %542 = vector.extract_strided_slice %532 {offsets = [0, 128], sizes = [8, 128], strides = [1, 1]} : vector<8x384xf32> to vector<8x128xf32>
    %543 = arith.addf %541, %542 : vector<8x128xf32>
    %544 = arith.negf %543 : vector<8x128xf32>
    %545 = math.exp %544 : vector<8x128xf32>
    %cst_134 = arith.constant 1.000000e+00 : f32
    %546 = vector.broadcast %cst_134 : f32 to vector<8x128xf32>
    %547 = arith.addf %546, %545 : vector<8x128xf32>
    %548 = arith.divf %546, %547 : vector<8x128xf32>
    %549 = vector.extract_strided_slice %531 {offsets = [0, 256], sizes = [8, 128], strides = [1, 1]} : vector<8x384xf32> to vector<8x128xf32>
    %550 = vector.extract_strided_slice %532 {offsets = [0, 256], sizes = [8, 128], strides = [1, 1]} : vector<8x384xf32> to vector<8x128xf32>
    %551 = vector.broadcast %17 : vector<1x128xf32> to vector<8x128xf32>
    %552 = arith.addf %550, %551 : vector<8x128xf32>
    %553 = arith.mulf %540, %552 : vector<8x128xf32>
    %554 = arith.addf %549, %553 : vector<8x128xf32>
    %555 = math.tanh %554 : vector<8x128xf32>
    %cst_135 = arith.constant 1.000000e+00 : f32
    %556 = vector.broadcast %cst_135 : f32 to vector<8x128xf32>
    %557 = arith.subf %556, %548 : vector<8x128xf32>
    %558 = arith.mulf %557, %555 : vector<8x128xf32>
    %559 = arith.mulf %548, %525 : vector<8x128xf32>
    %560 = arith.addf %558, %559 : vector<8x128xf32>
    %561 = arith.index_cast %529 : i32 to index
    %c0_136 = arith.constant 0 : index
    %562 = vector.load %arg16[%561, %c0_136] : memref<64x128xf32, #tpu.memory_space<vmem>>, vector<8x128xf32>
    tpu.vector_store %arg16[%561, %c0_136], %560 {strides = array<i32>} : memref<64x128xf32, #tpu.memory_space<vmem>>, vector<8x128xf32>,
    %c8_i32_137 = arith.constant 8 : i32
    %c0_138 = arith.constant 0 : index
    %c0_139 = arith.constant 0 : index
    %563 = vector.load %arg16[%c0_138, %c0_139] : memref<64x128xf32, #tpu.memory_space<vmem>>, vector<64x128xf32>
    %c0_140 = arith.constant 0 : index
    %c0_141 = arith.constant 0 : index
    %564 = vector.load %arg11[%c0_140, %c0_141] : memref<128x256xf32, #tpu.memory_space<vmem>>, vector<128x256xf32>
    %cst_142 = arith.constant dense<0.000000e+00> : vector<64x256xf32>
    %565 = tpu.matmul %563, %564, %cst_142 {dimension_numbers = #tpu.dot_dimension_numbers<[1], [0], [0], [1], [0, 0, 1, 1], [], []>} : vector<64x128xf32>, vector<128x256xf32>, vector<64x256xf32> -> vector<64x256xf32>
    %c0_143 = arith.constant 0 : index
    %c0_144 = arith.constant 0 : index
    %566 = vector.load %arg12[%c0_143, %c0_144] : memref<1x256xf32, #tpu.memory_space<vmem>>, vector<1x256xf32>
    %567 = vector.broadcast %566 : vector<1x256xf32> to vector<64x256xf32>
    %568 = arith.addf %565, %567 : vector<64x256xf32>
    %cst_145 = arith.constant dense<0xFF800000> : vector<64xf32>
    %569 = vector.multi_reduction <maximumf>, %568, %cst_145 [1] : vector<64x256xf32> to vector<64xf32>
    %570 = vector.shape_cast %569 : vector<64xf32> to vector<64x1xf32>
    %571 = vector.broadcast %570 : vector<64x1xf32> to vector<64x256xf32>
    %572 = arith.subf %568, %571 : vector<64x256xf32>
    %573 = math.exp %572 : vector<64x256xf32>
    %cst_146 = arith.constant dense<0.000000e+00> : vector<64xf32>
    %574 = vector.multi_reduction <add>, %573, %cst_146 [1] : vector<64x256xf32> to vector<64xf32>
    %575 = vector.shape_cast %574 : vector<64xf32> to vector<64x1xf32>
    %576 = math.log %575 : vector<64x1xf32>
    %577 = arith.addf %576, %570 : vector<64x1xf32>
    %578 = tpu.iota {dimensions = array<i32: 1>} : vector<64x256xi32>
    %c0_147 = arith.constant 0 : index
    %c0_148 = arith.constant 0 : index
    %579 = vector.load %arg2[%c0_147, %c0_148] : memref<64x1xi32, #tpu.memory_space<vmem>>, vector<64x1xi32>
    %580 = vector.broadcast %579 : vector<64x1xi32> to vector<64x256xi32>
    %581 = arith.cmpi eq, %578, %580 : vector<64x256xi32>
    %cst_149 = arith.constant 0.000000e+00 : f32
    %582 = vector.broadcast %cst_149 : f32 to vector<64x256xf32>
    %583 = arith.select %581, %568, %582 : vector<64x256xi1>, vector<64x256xf32>
    %584 = vector.shape_cast %583 : vector<64x256xf32> to vector<1x64x256xf32>
    %cst_150 = arith.constant dense<0.000000e+00> : vector<1xf32>
    %585 = vector.multi_reduction <add>, %584, %cst_150 [1, 2] : vector<1x64x256xf32> to vector<1xf32>
    %586 = vector.shape_cast %585 : vector<1xf32> to vector<1x1x1xf32>
    %587 = vector.extract %586[0, 0, 0] : f32 from vector<1x1x1xf32>
    %588 = vector.broadcast %587 : f32 to vector<1x1xf32>
    %589 = vector.shape_cast %577 : vector<64x1xf32> to vector<1x64x1xf32>
    %cst_151 = arith.constant dense<0.000000e+00> : vector<1xf32>
    %590 = vector.multi_reduction <add>, %589, %cst_151 [1, 2] : vector<1x64x1xf32> to vector<1xf32>
    %591 = vector.shape_cast %590 : vector<1xf32> to vector<1x1x1xf32>
    %592 = vector.extract %591[0, 0, 0] : f32 from vector<1x1x1xf32>
    %593 = vector.broadcast %592 : f32 to vector<1x1xf32>
    %594 = arith.subf %593, %588 : vector<1x1xf32>
    %c0_152 = arith.constant 0 : index
    %c0_153 = arith.constant 0 : index
    %595 = vector.load %arg13[%c0_152, %c0_153] : memref<1x1xf32, #tpu.memory_space<vmem>>, vector<1x1xf32>
    tpu.vector_store %arg13[%c0_152, %c0_153], %594 {strides = array<i32>} : memref<1x1xf32, #tpu.memory_space<vmem>>, vector<1x1xf32>,
    return
  }
}

</mosaic_0001>

<bundles_post_ra>
// kernel: seq2seq_gru_forward.1
= control target key start
LH: loop header
LB: loop body
LE: loop exit
PB: predicated region body
PF: predicated region fallthrough
CT: control target
= control target key end

     0   :  { %18 = vsyncpa [#allocation6], 0  ;;  %s8159_s0 = inlined_call_operand.vmem [shape: f32[64,128], index: 0, kind: input, shape index: {}]   ;;  %s8160_s1 = inlined_call_operand.vmem [shape: f32[64,128], index: 1, kind: input, shape index: {}]   ;;  %s8161_s2 = inlined_call_operand.vmem [shape: s32[64,1], index: 2, kind: input, shape index: {}]   ;;  %s8162_s3 = inlined_call_operand.vmem [shape: f32[128,384], index: 3, kind: input, shape index: {}]   ;;  %s8163_s4 = inlined_call_operand.vmem [shape: f32[128,384], index: 4, kind: input, shape index: {}]   ;;  %s8164_s5 = inlined_call_operand.vmem [shape: f32[1,384], index: 5, kind: input, shape index: {}]   ;;  %s8165_s6 = inlined_call_operand.vmem [shape: f32[1,128], index: 6, kind: input, shape index: {}]   ;;  %s8166_s7 = inlined_call_operand.vmem [shape: f32[128,384], index: 7, kind: input, shape index: {}]   ;;  %s8167_s8 = inlined_call_operand.hbm [shape: f32[128,384], index: 8, kind: input, shape index: {}]   ;;  %s8168_s9 = inlined_call_operand.vmem [shape: f32[1,384], index: 9, kind: input, shape index: {}]   ;;  %s8169_s10 = inlined_call_operand.vmem [shape: f32[1,128], index: 10, kind: input, shape index: {}]   ;;  %s8170_s11 = inlined_call_operand.vmem [shape: f32[128,256], index: 11, kind: input, shape index: {}]   ;;  %s8171_s12 = inlined_call_operand.vmem [shape: f32[1,256], index: 12, kind: input, shape index: {}]   ;;  %s8172_s13 = inlined_call_operand.hbm [shape: f32[1,1], index: 13, kind: output, shape index: {}]  }
   0x1   :  { %19 = vsyncpa [#allocation7], 0  ;;  %s6339_s25 = smov [#allocation5]   ;;  %s6291_s29 = scalar_lea.hbm %s8167_s8, 6144 }
   0x2   :  { %s41_s26 = sshll.u32 %s6339_s25, 4  ;;  %p6292_p0 = scmp.ne.s32.totalorder %s8167_s8, %s6291_s29  ;;  %s42_s26 = int_to_ptr.vmem [resolvable:$true] %s41_s26 }
   0x3   :  { %p6295_p1 = scmp.lt.u32.totalorder %s6291_s29, %s8167_s8 }
   0x5   :  { %p6297_p2 = pnand %p6295_p1, %p6292_p0 }
   0x7   :  { %6300 = shalt.err (!%p6297_p2)
}
   0x8   :  { %s6301_s17 = scalar_lea.vmem %s42_s26, 6144  ;;  %p6306_p4 = scmp.lt.s32.totalorder %s42_s26, %s42_s26 }
   0x9   :  { %p6302_p3 = scmp.ne.s32.totalorder %s42_s26, %s6301_s17  ;;  %p6307_p5 = scmp.lt.s32.totalorder %s6301_s17, %s6301_s17 }
   0xb   :  { %p6308_p6 = por %p6307_p5, %p6306_p4 }
   0xd   :  { %p6309_p7 = pnand %p6308_p6, %p6302_p3 }
   0xf   :  { %6312 = shalt.err (!%p6309_p7)
}
  0x10   :  { %s6340_s18 = smov 384   ;;  %s6341_s19 = smov 24  }
  0x11   :  { %47 = dma.hbm_to_vmem [thread:$0]  %s8167_s8, 6144, %s42_s26, [#allocation6], %s6340_s18, %s6340_s18, %s6341_s19  }
  0x12   :  { %6335 = dma.done.wait [#allocation6], 6144  }
  0x13   :  { %6336 = vsyncadd [#allocation6], 4294961152  ;;  %v8174_v0 = vmov 0.0   ;;  %v68_v1 = vld [vmem:[%s8162_s3 + $0x8] sm:$0xff]  ;;  %v71_v2 = vld [vmem:[%s8162_s3 + $0x20] sm:$0xff]  ;;  %vm6344_vm0 = vmmov 0  }
  0x14   :  { %196 = vmatprep.mubr.f32.mxu1 %v8174_v0  ;;  %511 = vmatprep.mubr.f32.mxu0 %v8174_v0  ;;  %v383_v3 = vld [vmem:[%s8166_s7 + $0x8] sm:$0xff]  ;;  %v4947_v4 = vpack.c.bf16 %v71_v2, %v68_v1  ;;  %v386_v5 = vld [vmem:[%s8166_s7 + $0x20] sm:$0xff]  ;;  %v70_v7 = vld [vmem:[%s8162_s3 + $0x18] sm:$0xff]  ;;  %vm3887_vm3 = vcmask 7168  }
  0x15   :  { %v67_v6 = vld [vmem:[%s8162_s3] sm:$0xff]  ;;  %v5011_v8 = vpack.c.bf16 %v386_v5, %v383_v3  ;;  %v385_v11 = vld [vmem:[%s8166_s7 + $0x18] sm:$0xff]  ;;  %v77_v14 = vld [vmem:[%s8162_s3 + $0x50] sm:$0xff] }
  0x16   :  { %v4949_v9 = vpack.c.bf16 %v70_v7, %v67_v6  ;;  %v382_v10 = vld [vmem:[%s8166_s7] sm:$0xff]  ;;  %v74_v12 = vld [vmem:[%s8162_s3 + $0x38] sm:$0xff]  ;;  %4948 = vmatprep.subr.bf16.mxu1 %v4947_v4  ;;  %v392_v16 = vld [vmem:[%s8166_s7 + $0x50] sm:$0xff] }
  0x17   :  { %v5013_v13 = vpack.c.bf16 %v385_v11, %v382_v10  ;;  %v389_v15 = vld [vmem:[%s8166_s7 + $0x38] sm:$0xff]  ;;  %5012 = vmatprep.subr.bf16.mxu0 %v5011_v8  ;;  %v4951_v17 = vpack.c.bf16 %v77_v14, %v74_v12  ;;  %v73_v19 = vld [vmem:[%s8162_s3 + $0x30] sm:$0xff]  ;;  %v76_v20 = vld [vmem:[%s8162_s3 + $0x48] sm:$0xff] }
  0x18   :  { %4950 = vmatpush1.bf16.msra.mxu1 %v4949_v9  ;;  %v5015_v18 = vpack.c.bf16 %v392_v16, %v389_v15  ;;  %v388_v21 = vld [vmem:[%s8166_s7 + $0x30] sm:$0xff]  ;;  %v4953_v22 = vpack.c.bf16 %v76_v20, %v73_v19  ;;  %v391_v23 = vld [vmem:[%s8166_s7 + $0x48] sm:$0xff]  ;;  %v83_v25 = vld [vmem:[%s8162_s3 + $0x80] sm:$0xff] }
  0x19   :  { %5014 = vmatpush1.bf16.msra.mxu0 %v5013_v13  ;;  %v80_v24 = vld [vmem:[%s8162_s3 + $0x68] sm:$0xff]  ;;  %4952 = vmatprep.subr.bf16.mxu1 %v4951_v17  ;;  %v5017_v26 = vpack.c.bf16 %v391_v23, %v388_v21  ;;  %v398_v29 = vld [vmem:[%s8166_s7 + $0x80] sm:$0xff]  ;;  %v82_v32 = vld [vmem:[%s8162_s3 + $0x78] sm:$0xff] }
  0x1a   :  { %5016 = vmatprep.subr.bf16.mxu0 %v5015_v18  ;;  %v4955_v27 = vpack.c.bf16 %v83_v25, %v80_v24  ;;  %v395_v28 = vld [vmem:[%s8166_s7 + $0x68] sm:$0xff]  ;;  %v79_v30 = vld [vmem:[%s8162_s3 + $0x60] sm:$0xff]  ;;  %v397_v34 = vld [vmem:[%s8166_s7 + $0x78] sm:$0xff] }
  0x1b   :  { %v5019_v31 = vpack.c.bf16 %v398_v29, %v395_v28  ;;  %v394_v33 = vld [vmem:[%s8166_s7 + $0x60] sm:$0xff]  ;;  %v4957_v35 = vpack.c.bf16 %v82_v32, %v79_v30  ;;  %v86_v36 = vld [vmem:[%s8162_s3 + $0x98] sm:$0xff]  ;;  %v89_v37 = vld [vmem:[%s8162_s3 + $0xb0] sm:$0xff] }
  0x1c   :  { %4954 = vmatpush1.bf16.msra.mxu1 %v4953_v22  ;;  %v401_v38 = vld [vmem:[%s8166_s7 + $0x98] sm:$0xff]  ;;  %v5021_v39 = vpack.c.bf16 %v397_v34, %v394_v33  ;;  %v4959_v40 = vpack.c.bf16 %v89_v37, %v86_v36  ;;  %v404_v41 = vld [vmem:[%s8166_s7 + $0xb0] sm:$0xff]  ;;  %v88_v43 = vld [vmem:[%s8162_s3 + $0xa8] sm:$0xff] }
  0x1d   :  { %5018 = vmatpush1.bf16.msra.mxu0 %v5017_v26  ;;  %4956 = vmatprep.subr.bf16.mxu1 %v4955_v27  ;;  %v85_v42 = vld [vmem:[%s8162_s3 + $0x90] sm:$0xff]  ;;  %v5023_v44 = vpack.c.bf16 %v404_v41, %v401_v38  ;;  %v403_v46 = vld [vmem:[%s8166_s7 + $0xa8] sm:$0xff]  ;;  %v95_v48 = vld [vmem:[%s8162_s3 + $0xe0] sm:$0xff] }
  0x1e   :  { %5020 = vmatprep.subr.bf16.mxu0 %v5019_v31  ;;  %v400_v45 = vld [vmem:[%s8166_s7 + $0x90] sm:$0xff]  ;;  %v92_v47 = vld [vmem:[%s8162_s3 + $0xc8] sm:$0xff]  ;;  %v410_v50 = vld [vmem:[%s8166_s7 + $0xe0] sm:$0xff]  ;;  %v4961_v51 = vpack.c.bf16 %v88_v43, %v85_v42 }
  0x1f   :  { %v407_v49 = vld [vmem:[%s8166_s7 + $0xc8] sm:$0xff]  ;;  %v5025_v52 = vpack.c.bf16 %v403_v46, %v400_v45  ;;  %v4963_v53 = vpack.c.bf16 %v95_v48, %v92_v47  ;;  %v91_v54 = vld [vmem:[%s8162_s3 + $0xc0] sm:$0xff]  ;;  %v94_v55 = vld [vmem:[%s8162_s3 + $0xd8] sm:$0xff] }
  0x20   :  { %4958 = vmatpush1.bf16.msra.mxu1 %v4957_v35  ;;  %v406_v56 = vld [vmem:[%s8166_s7 + $0xc0] sm:$0xff]  ;;  %v5027_v57 = vpack.c.bf16 %v410_v50, %v407_v49  ;;  %v409_v58 = vld [vmem:[%s8166_s7 + $0xd8] sm:$0xff]  ;;  %v101_v60 = vld [vmem:[%s8162_s3 + $0x110] sm:$0xff]  ;;  %v4965_v63 = vpack.c.bf16 %v94_v55, %v91_v54 }
  0x21   :  { %5022 = vmatpush1.bf16.msra.mxu0 %v5021_v39  ;;  %4960 = vmatprep.subr.bf16.mxu1 %v4959_v40  ;;  %v98_v59 = vld [vmem:[%s8162_s3 + $0xf8] sm:$0xff]  ;;  %v416_v62 = vld [vmem:[%s8166_s7 + $0x110] sm:$0xff]  ;;  %v5029_v1 = vpack.c.bf16 %v409_v58, %v406_v56  ;;  %v100_v4 = vld [vmem:[%s8162_s3 + $0x108] sm:$0xff] }
  0x22   :  { %5024 = vmatprep.subr.bf16.mxu0 %v5023_v44  ;;  %v413_v61 = vld [vmem:[%s8166_s7 + $0xf8] sm:$0xff]  ;;  %v4967_v2 = vpack.c.bf16 %v101_v60, %v98_v59  ;;  %v97_v3 = vld [vmem:[%s8162_s3 + $0xf0] sm:$0xff]  ;;  %v415_v7 = vld [vmem:[%s8166_s7 + $0x108] sm:$0xff] }
  0x23   :  { %v412_v5 = vld [vmem:[%s8166_s7 + $0xf0] sm:$0xff]  ;;  %v5031_v6 = vpack.c.bf16 %v416_v62, %v413_v61  ;;  %v104_v8 = vld [vmem:[%s8162_s3 + $0x128] sm:$0xff]  ;;  %v107_v9 = vld [vmem:[%s8162_s3 + $0x140] sm:$0xff]  ;;  %v4969_v12 = vpack.c.bf16 %v100_v4, %v97_v3 }
  0x24   :  { %4962 = vmatpush1.bf16.msra.mxu1 %v4961_v51  ;;  %v419_v10 = vld [vmem:[%s8166_s7 + $0x128] sm:$0xff]  ;;  %v422_v11 = vld [vmem:[%s8166_s7 + $0x140] sm:$0xff]  ;;  %v5033_v13 = vpack.c.bf16 %v415_v7, %v412_v5  ;;  %v4971_v14 = vpack.c.bf16 %v107_v9, %v104_v8  ;;  %v106_v16 = vld [vmem:[%s8162_s3 + $0x138] sm:$0xff] }
  0x25   :  { %5026 = vmatpush1.bf16.msra.mxu0 %v5025_v52  ;;  %4964 = vmatprep.subr.bf16.mxu1 %v4963_v53  ;;  %v103_v15 = vld [vmem:[%s8162_s3 + $0x120] sm:$0xff]  ;;  %v5035_v18 = vpack.c.bf16 %v422_v11, %v419_v10  ;;  %v421_v19 = vld [vmem:[%s8166_s7 + $0x138] sm:$0xff]  ;;  %v113_v21 = vld [vmem:[%s8162_s3 + $0x170] sm:$0xff] }
  0x26   :  { %5028 = vmatprep.subr.bf16.mxu0 %v5027_v57  ;;  %v418_v17 = vld [vmem:[%s8166_s7 + $0x120] sm:$0xff]  ;;  %v110_v20 = vld [vmem:[%s8162_s3 + $0x158] sm:$0xff]  ;;  %v428_v23 = vld [vmem:[%s8166_s7 + $0x170] sm:$0xff]  ;;  %v4973_v24 = vpack.c.bf16 %v106_v16, %v103_v15 }
  0x27   :  { %v425_v22 = vld [vmem:[%s8166_s7 + $0x158] sm:$0xff]  ;;  %v5037_v25 = vpack.c.bf16 %v421_v19, %v418_v17  ;;  %v4975_v26 = vpack.c.bf16 %v113_v21, %v110_v20  ;;  %v109_v27 = vld [vmem:[%s8162_s3 + $0x150] sm:$0xff]  ;;  %v112_v28 = vld [vmem:[%s8162_s3 + $0x168] sm:$0xff] }
  0x28   :  { %4966 = vmatpush1.bf16.msra.mxu1 %v4965_v63  ;;  %v424_v29 = vld [vmem:[%s8166_s7 + $0x150] sm:$0xff]  ;;  %v5039_v30 = vpack.c.bf16 %v428_v23, %v425_v22  ;;  %v427_v31 = vld [vmem:[%s8166_s7 + $0x168] sm:$0xff]  ;;  %v693_v35 = vld [vmem:[%s8163_s4 + $0x20] sm:$0xff]  ;;  %v4977_v36 = vpack.c.bf16 %v112_v28, %v109_v27 }
  0x29   :  { %5030 = vmatpush1.bf16.msra.mxu0 %v5029_v1  ;;  %4968 = vmatprep.subr.bf16.mxu1 %v4967_v2  ;;  %v69_v32 = vld [vmem:[%s8162_s3 + $0x10] sm:$0xff]  ;;  %v72_v33 = vld [vmem:[%s8162_s3 + $0x28] sm:$0xff]  ;;  %v5041_v37 = vpack.c.bf16 %v427_v31, %v424_v29  ;;  %v689_v40 = vld [vmem:[%s8163_s4] sm:$0xff] }
  0x2a   :  { %5032 = vmatprep.subr.bf16.mxu0 %v5031_v6  ;;  %v690_v34 = vld [vmem:[%s8163_s4 + $0x8] sm:$0xff]  ;;  %v4979_v38 = vpack.c.bf16 %v72_v33, %v69_v32  ;;  %v692_v41 = vld [vmem:[%s8163_s4 + $0x18] sm:$0xff]  ;;  %v75_v42 = vld [vmem:[%s8162_s3 + $0x40] sm:$0xff] }
  0x2b   :  { %v6635_v39 = vpack.c.bf16 %v693_v35, %v690_v34  ;;  %v78_v43 = vld [vmem:[%s8162_s3 + $0x58] sm:$0xff]  ;;  %v6652_v44 = vld [vmem:[%s8159_s0] sm:$0xff]  ;;  %v699_v46 = vld [vmem:[%s8163_s4 + $0x50] sm:$0xff]  ;;  %v6665_v48 = vpack.c.bf16 %v692_v41, %v689_v40 }
  0x2c   :  { %4970 = vmatpush1.bf16.msra.mxu1 %v4969_v12  ;;  %v696_v45 = vld [vmem:[%s8163_s4 + $0x38] sm:$0xff]  ;;  %v6663_v47 = vld [vmem:[%s8160_s1] sm:$0xff]  ;;  %v4983_v49 = vpack.c.bf16 %v78_v43, %v75_v42  ;;  %v695_v50 = vld [vmem:[%s8163_s4 + $0x30] sm:$0xff] }
  0x2d   :  { %5034 = vmatpush1.bf16.msra.mxu0 %v5033_v13  ;;  %4972 = vmatprep.subr.bf16.mxu1 %v4971_v14  ;;  %v698_v51 = vld [vmem:[%s8163_s4 + $0x48] sm:$0xff]  ;;  %v6675_v52 = vpack.c.bf16 %v699_v46, %v696_v45  ;;  %v81_v53 = vld [vmem:[%s8162_s3 + $0x70] sm:$0xff]  ;;  %v705_v57 = vld [vmem:[%s8163_s4 + $0x80] sm:$0xff] }
  0x2e   :  { %5036 = vmatprep.subr.bf16.mxu0 %v5035_v18  ;;  %v84_v54 = vld [vmem:[%s8162_s3 + $0x88] sm:$0xff]  ;;  %v6702_v59 = vpack.c.bf16 %v698_v51, %v695_v50  ;;  %v701_v61 = vld [vmem:[%s8163_s4 + $0x60] sm:$0xff]  ;;  %v704_v62 = vld [vmem:[%s8163_s4 + $0x78] sm:$0xff] }
  0x2f   :  { %v6687_v55 = vld [vmem:[%s8159_s0 + $0x8] sm:$0xff]  ;;  %v4987_v60 = vpack.c.bf16 %v84_v54, %v81_v53  ;;  %v87_v1 = vld [vmem:[%s8162_s3 + $0xa0] sm:$0xff]  ;;  %v90_v2 = vld [vmem:[%s8162_s3 + $0xb8] sm:$0xff]  ;;  %v6740_v7 = vpack.c.bf16 %v704_v62, %v701_v61 }
  0x30   :  { %4974 = vmatpush1.bf16.msra.mxu1 %v4973_v24  ;;  %v702_v56 = vld [vmem:[%s8163_s4 + $0x68] sm:$0xff]  ;;  %v6725_v3 = vld [vmem:[%s8159_s0 + $0x10] sm:$0xff]  ;;  %v708_v4 = vld [vmem:[%s8163_s4 + $0x98] sm:$0xff]  ;;  %v4991_v8 = vpack.c.bf16 %v90_v2, %v87_v1 }
  0x31   :  { %5038 = vmatpush1.bf16.msra.mxu0 %v5037_v25  ;;  %4976 = vmatprep.subr.bf16.mxu1 %v4975_v26  ;;  %v6700_v58 = vld [vmem:[%s8160_s1 + $0x8] sm:$0xff]  ;;  %v6713_v63 = vpack.c.bf16 %v705_v57, %v702_v56  ;;  %v711_v5 = vld [vmem:[%s8163_s4 + $0xb0] sm:$0xff]  ;;  %v6763_v14 = vld [vmem:[%s8159_s0 + $0x18] sm:$0xff] }
  0x32   :  { %5040 = vmatprep.subr.bf16.mxu0 %v5039_v30  ;;  %v6738_v6 = vld [vmem:[%s8160_s1 + $0x10] sm:$0xff]  ;;  %v710_v10 = vld [vmem:[%s8163_s4 + $0xa8] sm:$0xff]  ;;  %v6751_v11 = vpack.c.bf16 %v711_v5, %v708_v4  ;;  %v717_v16 = vld [vmem:[%s8163_s4 + $0xe0] sm:$0xff] }
  0x33   :  { %v707_v9 = vld [vmem:[%s8163_s4 + $0x90] sm:$0xff]  ;;  %v96_v13 = vld [vmem:[%s8162_s3 + $0xe8] sm:$0xff]  ;;  %v6776_v17 = vld [vmem:[%s8160_s1 + $0x18] sm:$0xff] }
  0x34   :  { %4978 = vmatpush1.bf16.msra.mxu1 %v4977_v36  ;;  %v93_v12 = vld [vmem:[%s8162_s3 + $0xd0] sm:$0xff]  ;;  %v714_v15 = vld [vmem:[%s8163_s4 + $0xc8] sm:$0xff]  ;;  %v6778_v18 = vpack.c.bf16 %v710_v10, %v707_v9  ;;  %v713_v20 = vld [vmem:[%s8163_s4 + $0xc0] sm:$0xff] }
  0x35   :  { %5042 = vmatpush1.bf16.msra.mxu0 %v5041_v37  ;;  %4980 = vmatprep.subr.bf16.mxu1 %v4979_v38  ;;  %v4995_v19 = vpack.c.bf16 %v96_v13, %v93_v12  ;;  %v716_v21 = vld [vmem:[%s8163_s4 + $0xd8] sm:$0xff]  ;;  %v6789_v22 = vpack.c.bf16 %v717_v16, %v714_v15  ;;  %v99_v23 = vld [vmem:[%s8162_s3 + $0x100] sm:$0xff]  ;;  %v723_v27 = vld [vmem:[%s8163_s4 + $0x110] sm:$0xff] }
  0x36   :  { %5076 = vmatprep.subr.bf16.mxu0 %v6635_v39  ;;  %v102_v24 = vld [vmem:[%s8162_s3 + $0x118] sm:$0xff]  ;;  %v6801_v25 = vld [vmem:[%s8159_s0 + $0x20] sm:$0xff]  ;;  %v6816_v29 = vpack.c.bf16 %v716_v21, %v713_v20  ;;  %v719_v31 = vld [vmem:[%s8163_s4 + $0xf0] sm:$0xff] }
  0x37   :  { %197 = vmatmul.mubr.f32.vlgmr.msra.gmra.mrb[0].mxu1 %v6652_v44  ;;  %v720_v26 = vld [vmem:[%s8163_s4 + $0xf8] sm:$0xff]  ;;  %v6814_v28 = vld [vmem:[%s8160_s1 + $0x20] sm:$0xff]  ;;  %v4999_v30 = vpack.c.bf16 %v102_v24, %v99_v23  ;;  %v722_v32 = vld [vmem:[%s8163_s4 + $0x108] sm:$0xff] }
  0x38   :  { %512 = vmatmul.mubr.f32.vlgmr.msra.gmra.mrb[0].mxu0 %v6663_v47  ;;  %4982 = vmatpush3.bf16.msra.mxu1 %v4979_v38  ;;  %v6827_v33 = vpack.c.bf16 %v723_v27, %v720_v26  ;;  %v105_v34 = vld [vmem:[%s8162_s3 + $0x130] sm:$0xff]  ;;  %v108_v35 = vld [vmem:[%s8162_s3 + $0x148] sm:$0xff]  ;;  %v729_v38 = vld [vmem:[%s8163_s4 + $0x140] sm:$0xff]  ;;  %v6854_v41 = vpack.c.bf16 %v722_v32, %v719_v31 }
  0x39   :  { %5078 = vmatpush1.bf16.msra.mxu0 %v6665_v48  ;;  %202 = vmatprep.mubr.f32.mxu1 %v8174_v0  ;;  %v6839_v36 = vld [vmem:[%s8159_s0 + $0x28] sm:$0xff]  ;;  %v5003_v42 = vpack.c.bf16 %v108_v35, %v105_v34  ;;  %v725_v43 = vld [vmem:[%s8163_s4 + $0x120] sm:$0xff]  ;;  %v728_v45 = vld [vmem:[%s8163_s4 + $0x138] sm:$0xff] }
  0x3a   :  { %517 = vmatprep.mubr.f32.mxu0 %v8174_v0  ;;  %4984 = vmatprep.subr.bf16.mxu1 %v4983_v49  ;;  %v726_v37 = vld [vmem:[%s8163_s4 + $0x128] sm:$0xff]  ;;  %v114_v50 = vld [vmem:[%s8162_s3 + $0x178] sm:$0xff]  ;;  %v65_v51 = vld [vmem:[%s8159_s0 + $0x30] sm:$0xff]  ;;  %v6890_v57 = vpack.c.bf16 %v728_v45, %v725_v43 }
  0x3b   :  { %203 = vmatmul.mubr.f32.gmra.mrb[2].mxu1 %v6687_v55  ;;  %5080 = vmatprep.subr.bf16.mxu0 %v6675_v52  ;;  %v6852_v40 = vld [vmem:[%s8160_s1 + $0x28] sm:$0xff]  ;;  %v6865_v46 = vpack.c.bf16 %v729_v38, %v726_v37  ;;  %v732_v53 = vld [vmem:[%s8163_s4 + $0x158] sm:$0xff]  ;;  %v735_v54 = vld [vmem:[%s8163_s4 + $0x170] sm:$0xff]  ;;  %v8176_v38 = vmov 0.0|0.0  }
  0x3c   :  { %518 = vmatmul.mubr.f32.gmra.mrb[2].mxu0 %v6700_v58  ;;  %4986 = vmatpush3.bf16.msra.mxu1 %v4983_v49  ;;  %v111_v49 = vld [vmem:[%s8162_s3 + $0x160] sm:$0xff]  ;;  %v6888_v56 = vld [vmem:[%s8160_s1 + $0x30] sm:$0xff]  ;;  %v734_v62 = vld [vmem:[%s8163_s4 + $0x168] sm:$0xff]  ;;  %v6900_v1 = vpack.c.bf16 %v735_v54, %v732_v53 }
  0x3d   :  { %5082 = vmatpush1.bf16.msra.mxu0 %v6702_v59  ;;  %208 = vmatprep.mubr.f32.mxu1 %v8174_v0  ;;  %v731_v61 = vld [vmem:[%s8163_s4 + $0x150] sm:$0xff]  ;;  %v387_v4 = vld [vmem:[%s8166_s7 + $0x28] sm:$0xff]  ;;  %v66_v5 = vld [vmem:[%s8159_s0 + $0x38] sm:$0xff]  ;;  %s6346_s0 = smov [#allocation8]  }
  0x3e   :  { %523 = vmatprep.mubr.f32.mxu0 %v8174_v0  ;;  %4988 = vmatprep.subr.bf16.mxu1 %v4987_v60  ;;  %v384_v2 = vld [vmem:[%s8166_s7 + $0x10] sm:$0xff]  ;;  %v6919_v9 = vpack.c.bf16 %v734_v62, %v731_v61  ;;  %v390_v12 = vld [vmem:[%s8166_s7 + $0x40] sm:$0xff]  ;;  %v393_v13 = vld [vmem:[%s8166_s7 + $0x58] sm:$0xff] }
  0x3f   :  { %209 = vmatmul.mubr.f32.gmra.mrb[4].mxu1 %v6725_v3  ;;  %5084 = vmatprep.subr.bf16.mxu0 %v6713_v63  ;;  %v5043_v10 = vpack.c.bf16 %v387_v4, %v384_v2  ;;  %v5047_v15 = vpack.c.bf16 %v393_v13, %v390_v12  ;;  %v396_v16 = vld [vmem:[%s8166_s7 + $0x70] sm:$0xff]  ;;  %v402_v20 = vld [vmem:[%s8166_s7 + $0xa0] sm:$0xff]  ;;  %v405_v21 = vld [vmem:[%s8166_s7 + $0xb8] sm:$0xff] }
  0x40   :  { %524 = vmatmul.mubr.f32.gmra.mrb[4].mxu0 %v6738_v6  ;;  %4990 = vmatpush3.bf16.msra.mxu1 %v4987_v60  ;;  %v5007_v60 = vpack.c.bf16 %v114_v50, %v111_v49  ;;  %v411_v23 = vld [vmem:[%s8166_s7 + $0xe8] sm:$0xff]  ;;  %v414_v24 = vld [vmem:[%s8166_s7 + $0x100] sm:$0xff]  ;;  %v420_v27 = vld [vmem:[%s8166_s7 + $0x130] sm:$0xff] }
  0x41   :  { %5086 = vmatpush1.bf16.msra.mxu0 %v6740_v7  ;;  %214 = vmatprep.mubr.f32.mxu1 %v8174_v0  ;;  %v429_v32 = vld [vmem:[%s8166_s7 + $0x178] sm:$0xff]  ;;  %v691_v35 = vld [vmem:[%s8163_s4 + $0x10] sm:$0xff]  ;;  %v706_v50 = vld [vmem:[%s8163_s4 + $0x88] sm:$0xff] }
  0x42   :  { %529 = vmatprep.mubr.f32.mxu0 %v8174_v0  ;;  %4992 = vmatprep.subr.bf16.mxu1 %v4991_v8  ;;  %v700_v43 = vld [vmem:[%s8163_s4 + $0x58] sm:$0xff]  ;;  %v703_v49 = vld [vmem:[%s8163_s4 + $0x70] sm:$0xff]  ;;  %v718_v53 = vld [vmem:[%s8163_s4 + $0xe8] sm:$0xff] }
  0x43   :  { %215 = vmatmul.mubr.f32.gmra.mrb[6].mxu1 %v6763_v14  ;;  %5088 = vmatprep.subr.bf16.mxu0 %v6751_v11  ;;  %v721_v54 = vld [vmem:[%s8163_s4 + $0x100] sm:$0xff]  ;;  %v727_v61 = vld [vmem:[%s8163_s4 + $0x130] sm:$0xff]  ;;  %v730_v62 = vld [vmem:[%s8163_s4 + $0x148] sm:$0xff] }
  0x44   :  { %530 = vmatmul.mubr.f32.gmra.mrb[6].mxu0 %v6776_v17  ;;  %4994 = vmatpush3.bf16.msra.mxu1 %v4991_v8  ;;  %v6917_v8 = vld [vmem:[%s8160_s1 + $0x38] sm:$0xff]  ;;  %v7069_v2 = vpack.c.bf16 %v730_v62, %v727_v61  ;;  %v733_v4 = vld [vmem:[%s8163_s4 + $0x160] sm:$0xff] }
  0x45   :  { %5090 = vmatpush1.bf16.msra.mxu0 %v6778_v18  ;;  %220 = vmatprep.mubr.f32.mxu1 %v8174_v0 }
  0x46   :  { %535 = vmatprep.mubr.f32.mxu0 %v8174_v0  ;;  %4996 = vmatprep.subr.bf16.mxu1 %v4995_v19 }
  0x47   :  { %221 = vmatmul.mubr.f32.gmra.mrb[8].mxu1 %v6801_v25  ;;  %5092 = vmatprep.subr.bf16.mxu0 %v6789_v22 }
  0x48   :  { %536 = vmatmul.mubr.f32.gmra.mrb[8].mxu0 %v6814_v28  ;;  %4998 = vmatpush3.bf16.msra.mxu1 %v4995_v19  ;;  %v399_v19 = vld [vmem:[%s8166_s7 + $0x88] sm:$0xff] }
  0x49   :  { %5094 = vmatpush1.bf16.msra.mxu0 %v6816_v29  ;;  %226 = vmatprep.mubr.f32.mxu1 %v8174_v0 }
  0x4a   :  { %541 = vmatprep.mubr.f32.mxu0 %v8174_v0  ;;  %5000 = vmatprep.subr.bf16.mxu1 %v4999_v30 }
  0x4b   :  { %227 = vmatmul.mubr.f32.gmra.mrb[10].mxu1 %v6839_v36  ;;  %5096 = vmatprep.subr.bf16.mxu0 %v6827_v33 }
  0x4c   :  { %542 = vmatmul.mubr.f32.gmra.mrb[10].mxu0 %v6852_v40  ;;  %5002 = vmatpush3.bf16.msra.mxu1 %v4999_v30  ;;  %v423_v30 = vld [vmem:[%s8166_s7 + $0x148] sm:$0xff] }
  0x4d   :  { %5098 = vmatpush1.bf16.msra.mxu0 %v6854_v41  ;;  %232 = vmatprep.mubr.f32.mxu1 %v8174_v0  ;;  %v5067_v31 = vpack.c.bf16 %v423_v30, %v420_v27 }
  0x4e   :  { %547 = vmatprep.mubr.f32.mxu0 %v8174_v0  ;;  %5004 = vmatprep.subr.bf16.mxu1 %v5003_v42 }
  0x4f   :  { %233 = vmatmul.mubr.f32.gmra.mrb[12].mxu1 %v65_v51  ;;  %5100 = vmatprep.subr.bf16.mxu0 %v6865_v46 }
  0x50   :  { %548 = vmatmul.mubr.f32.gmra.mrb[12].mxu0 %v6888_v56  ;;  %5006 = vmatpush3.bf16.msra.mxu1 %v5003_v42  ;;  %v697_v42 = vld [vmem:[%s8163_s4 + $0x40] sm:$0xff] }
  0x51   :  { %5102 = vmatpush1.bf16.msra.mxu0 %v6890_v57  ;;  %238 = vmatprep.mubr.f32.mxu1 %v8174_v0  ;;  %v7011_v45 = vpack.c.bf16 %v700_v43, %v697_v42 }
  0x52   :  { %553 = vmatprep.mubr.f32.mxu0 %v8174_v0  ;;  %5008 = vmatprep.subr.bf16.mxu1 %v5007_v60 }
  0x53   :  { %239 = vmatmul.mubr.f32.gmra.mrb[14].mxu1 %v66_v5  ;;  %5104 = vmatprep.subr.bf16.mxu0 %v6900_v1 }
  0x54   :  { %554 = vmatmul.mubr.f32.gmra.mrb[14].mxu0 %v6917_v8  ;;  %5010 = vmatpush3.bf16.msra.mxu1 %v5007_v60 }
  0x55   :  { %5106 = vmatpush1.bf16.msra.mxu0 %v6919_v9  ;;  %4331 = vmatprep.mubr.f32.mxu1 %v6652_v44  ;;  %v5051_v44 = vpack.c.bf16 %v399_v19, %v396_v16 }
  0x56   :  { %857 = vmatprep.mubr.f32.mxu0 %v8174_v0  ;;  %5044 = vmatprep.subr.bf16.mxu1 %v5043_v10 }
  0x57   :  { %4332 = vmatmul.mubr.f32.vlgmr.msra.gmra.mrb[16].mxu1 %v6687_v55  ;;  %5132 = vmatprep.subr.bf16.mxu0 %v6635_v39  ;;  %v5055_v55 = vpack.c.bf16 %v405_v21, %v402_v20 }
  0x58   :  { %858 = vmatmul.mubr.f32.vlgmr.msra.gmra.mrb[16].mxu0 %v8174_v0  ;;  %5046 = vmatpush3.bf16.msra.mxu1 %v5043_v10  ;;  %v8173_v10 = vlaneseq }
  0x59   :  { %5048 = vmatprep.subr.bf16.mxu1 %v5047_v15  ;;  %4334 = vmatprep.mubr.f32.mxu1 %v6725_v3  ;;  %v408_v3 = vld [vmem:[%s8166_s7 + $0xd0] sm:$0xff] }
  0x5a   :  { %5134 = vmatpush1.bf16.msra.mxu0 %v6665_v48  ;;  %1032 = vmatprep.mubr.f32.mxu0 %v8174_v0  ;;  %v118_v12 = vshrl.u32 %v8173_v10, 7 }
  0x5b   :  { %4335 = vmatmul.mubr.f32.gmra.mrb[18].mxu1 %v6763_v14  ;;  %5136 = vmatprep.subr.bf16.mxu0 %v6675_v52  ;;  %v5059_v14 = vpack.c.bf16 %v411_v23, %v408_v3 }
  0x5c   :  { %5050 = vmatpush3.bf16.msra.mxu1 %v5047_v15  ;;  %4337 = vmatprep.mubr.f32.mxu1 %v6801_v25  ;;  %v417_v25 = vld [vmem:[%s8166_s7 + $0x118] sm:$0xff]  ;;  %v7104_v13 = vsub.s32 0, %v118_v12  ;;  %v115_v15 = vld [vmem:[%s8164_s5] sm:$0x7]  ;;  %v7109_v19 = vsub.s32 1, %v118_v12 }
  0x5d   :  { %5052 = vmatprep.subr.bf16.mxu1 %v5051_v44  ;;  %v5063_v26 = vpack.c.bf16 %v417_v25, %v414_v24 }
  0x5e   :  { %5138 = vmatpush1.bf16.msra.mxu0 %v6702_v59  ;;  %8182 = vst [vmem:[#allocation11_spill] sm:$0xff] %v7104_v13  ;;  %8183 = vst [vmem:[#allocation12_spill] sm:$0xff] %v7109_v19  ;;  %v120_v20 = vrot.slane %v115_v15, %v7104_v13  ;;  %v124_v21 = vrot.slane %v115_v15, %v7109_v19 }
  0x5f   :  { %4338 = vmatmul.mubr.f32.gmra.mrb[20].mxu1 %v6839_v36  ;;  %5140 = vmatprep.subr.bf16.mxu0 %v6713_v63  ;;  %v694_v36 = vld [vmem:[%s8163_s4 + $0x28] sm:$0xff] }
  0x60   :  { %5054 = vmatpush3.bf16.msra.mxu1 %v5051_v44  ;;  %4340 = vmatprep.mubr.f32.mxu1 %v65_v51  ;;  %v6998_v37 = vpack.c.bf16 %v694_v36, %v691_v35  ;;  %v712_v51 = vld [vmem:[%s8163_s4 + $0xb8] sm:$0xff] }
  0x61   :  { %5056 = vmatprep.subr.bf16.mxu1 %v5055_v55 }
  0x62   :  { %5142 = vmatpush1.bf16.msra.mxu0 %v6740_v7 }
  0x63   :  { %4341 = vmatmul.mubr.f32.gmra.mrb[22].mxu1 %v66_v5  ;;  %5144 = vmatprep.subr.bf16.mxu0 %v6751_v11  ;;  %v736_v5 = vld [vmem:[%s8163_s4 + $0x178] sm:$0xff] }
  0x64   :  { %5058 = vmatpush3.bf16.msra.mxu1 %v5055_v55  ;;  %4375 = vmatprep.mubr.f32.mxu1 %v6663_v47  ;;  %v426_v47 = vld [vmem:[%s8166_s7 + $0x160] sm:$0xff] }
  0x65   :  { %5060 = vmatprep.subr.bf16.mxu1 %v5059_v14  ;;  %v5071_v34 = vpack.c.bf16 %v429_v32, %v426_v47 }
  0x66   :  { %5146 = vmatpush1.bf16.msra.mxu0 %v6778_v18 }
  0x67   :  { %5148 = vmatprep.subr.bf16.mxu0 %v6789_v22 }
  0x68   :  { %5062 = vmatpush3.bf16.msra.mxu1 %v5059_v14 }
  0x69   :  { %5064 = vmatprep.subr.bf16.mxu1 %v5063_v26 }
  0x6a   :  { %5150 = vmatpush1.bf16.msra.mxu0 %v6816_v29 }
  0x6b   :  { %5152 = vmatprep.subr.bf16.mxu0 %v6827_v33 }
  0x6c   :  { %5066 = vmatpush3.bf16.msra.mxu1 %v5063_v26 }
  0x6d   :  { %5068 = vmatprep.subr.bf16.mxu1 %v5067_v31 }
  0x6e   :  { %5154 = vmatpush1.bf16.msra.mxu0 %v6854_v41 }
  0x6f   :  { %5156 = vmatprep.subr.bf16.mxu0 %v6865_v46 }
  0x70   :  { %5070 = vmatpush3.bf16.msra.mxu1 %v5067_v31 }
  0x71   :  { %5072 = vmatprep.subr.bf16.mxu1 %v5071_v34 }
  0x72   :  { %5158 = vmatpush1.bf16.msra.mxu0 %v6890_v57 }
  0x73   :  { %5160 = vmatprep.subr.bf16.mxu0 %v6900_v1 }
  0x74   :  { %5074 = vmatpush3.bf16.msra.mxu1 %v5071_v34 }
  0x75   :  { %5107 = vmatprep.subr.bf16.mxu1 %v8176_v38 }
  0x76   :  { %5162 = vmatpush1.bf16.msra.mxu0 %v6919_v9 }
  0x77   :  { %4376 = vmatmul.mubr.f32.vlgmr.msra.gmra.mrb[24].mxu1 %v6700_v58  ;;  %5188 = vmatprep.subr.bf16.mxu0 %v6635_v39  ;;  %v7023_v58 = vpack.c.bf16 %v706_v50, %v703_v49 }
  0x78   :  { %5109 = vmatpush3.bf16.msra.mxu1 %v6998_v37  ;;  %4378 = vmatprep.mubr.f32.mxu1 %v6738_v6  ;;  %v709_v6 = vld [vmem:[%s8163_s4 + $0xa0] sm:$0xff] }
  0x79   :  { %5110 = vmatprep.subr.bf16.mxu1 %v8176_v38 }
  0x7b   :  { %4379 = vmatmul.mubr.f32.gmra.mrb[26].mxu1 %v6776_v17  ;;  %v7035_v17 = vpack.c.bf16 %v712_v51, %v709_v6 }
  0x7c   :  { %5112 = vmatpush3.bf16.msra.mxu1 %v7011_v45  ;;  %4381 = vmatprep.mubr.f32.mxu1 %v6814_v28  ;;  %v715_v28 = vld [vmem:[%s8163_s4 + $0xd0] sm:$0xff] }
  0x7d   :  { %5113 = vmatprep.subr.bf16.mxu1 %v8176_v38 }
  0x7f   :  { %4382 = vmatmul.mubr.f32.gmra.mrb[28].mxu1 %v6852_v40  ;;  %v7047_v40 = vpack.c.bf16 %v718_v53, %v715_v28 }
  0x80   :  { %5115 = vmatpush3.bf16.msra.mxu1 %v7023_v58  ;;  %4384 = vmatprep.mubr.f32.mxu1 %v6888_v56  ;;  %v724_v56 = vld [vmem:[%s8163_s4 + $0x118] sm:$0xff] }
  0x81   :  { %5116 = vmatprep.subr.bf16.mxu1 %v8176_v38  ;;  %v7059_v60 = vpack.c.bf16 %v724_v56, %v721_v54  ;;  %v127_v54 = vsub.s32 2, %v118_v12 }
  0x83   :  { %4385 = vmatmul.mubr.f32.gmra.mrb[30].mxu1 %v6917_v8  ;;  %v7079_v8 = vpack.c.bf16 %v736_v5, %v733_v4  ;;  %v128_v5 = vrot.slane %v115_v15, %v127_v54 }
  0x84   :  { %5118 = vmatpush3.bf16.msra.mxu1 %v7035_v17  ;;  %4419 = vmatprep.mubr.msk.f32.mxu1 %vm6344_vm0, %v8174_v0 }
  0x85   :  { %5119 = vmatprep.subr.bf16.mxu1 %v8176_v38 }
  0x88   :  { %5121 = vmatpush3.bf16.msra.mxu1 %v7047_v40 }
  0x89   :  { %5122 = vmatprep.subr.bf16.mxu1 %v8176_v38 }
  0x8c   :  { %5124 = vmatpush3.bf16.msra.mxu1 %v7059_v60 }
  0x8d   :  { %5125 = vmatprep.subr.bf16.mxu1 %v8176_v38 }
  0x90   :  { %5127 = vmatpush3.bf16.msra.mxu1 %v7069_v2 }
  0x91   :  { %5128 = vmatprep.subr.bf16.mxu1 %v8176_v38 }
  0x94   :  { %5130 = vmatpush3.bf16.msra.mxu1 %v7079_v8 }
  0x95   :  { %5163 = vmatprep.subr.bf16.mxu1 %v8176_v38 }
  0x97   :  { %4420 = vmatmul.mubr.f32.vlgmr.msra.gmra.mrb[32].mxu1 %v8174_v0 }
  0x98   :  { %5165 = vmatpush3.bf16.msra.mxu1 %v6998_v37  ;;  %4454 = vmatprep.mubr.msk.f32.mxu1 %vm6344_vm0, %v8174_v0 }
  0x99   :  { %5166 = vmatprep.subr.bf16.mxu1 %v8176_v38 }
  0x9c   :  { %5168 = vmatpush3.bf16.msra.mxu1 %v7011_v45 }
  0x9d   :  { %5169 = vmatprep.subr.bf16.mxu1 %v8176_v38 }
  0xa0   :  { %5171 = vmatpush3.bf16.msra.mxu1 %v7023_v58 }
  0xa1   :  { %5172 = vmatprep.subr.bf16.mxu1 %v8176_v38 }
  0xa4   :  { %5174 = vmatpush3.bf16.msra.mxu1 %v7035_v17 }
  0xa5   :  { %5175 = vmatprep.subr.bf16.mxu1 %v8176_v38 }
  0xa8   :  { %5177 = vmatpush3.bf16.msra.mxu1 %v7047_v40 }
  0xa9   :  { %5178 = vmatprep.subr.bf16.mxu1 %v8176_v38 }
  0xac   :  { %5180 = vmatpush3.bf16.msra.mxu1 %v7059_v60 }
  0xad   :  { %5181 = vmatprep.subr.bf16.mxu1 %v8176_v38 }
  0xb0   :  { %5183 = vmatpush3.bf16.msra.mxu1 %v7069_v2 }
  0xb1   :  { %5184 = vmatprep.subr.bf16.mxu1 %v8176_v38 }
  0xb4   :  { %5186 = vmatpush3.bf16.msra.mxu1 %v7079_v8 }
  0xb5   :  { %5219 = vmatprep.subr.bf16.mxu1 %v8176_v38 }
 0x10a   :  { %v198_v16 = vpop.f32.mrb[0].mxu1 }
 0x10b   :  { %v200_v44 = vpop.f32.mrb[1].mxu1 }
 0x10e   :  { %v204_v55 = vpop.f32.mrb[2].mxu1 }
 0x10f   :  { %v7113_v3 = vadd.f32 %v204_v55, %v120_v20  ;;  %v206_v23 = vpop.f32.mrb[3].mxu1 }
 0x110   :  { %v7115_v14 = vadd.f32 %v206_v23, %v124_v21  ;;  %v199_v23 = vadd.f32 %v198_v16, %v120_v20 }
 0x112   :  { %v210_v24 = vpop.f32.mrb[4].mxu1 }
 0x113   :  { %v7117_v25 = vadd.f32 %v210_v24, %v120_v20  ;;  %v212_v26 = vpop.f32.mrb[5].mxu1 }
 0x114   :  { %v7119_v27 = vadd.f32 %v212_v26, %v124_v21  ;;  %v201_v26 = vadd.f32 %v200_v44, %v124_v21 }
 0x116   :  { %v216_v30 = vpop.f32.mrb[6].mxu1 }
 0x117   :  { %v7121_v31 = vadd.f32 %v216_v30, %v120_v20  ;;  %v218_v47 = vpop.f32.mrb[7].mxu1 }
 0x118   :  { %v7123_v32 = vadd.f32 %v218_v47, %v124_v21 }
 0x11a   :  { %v222_v34 = vpop.f32.mrb[8].mxu1 }
 0x11b   :  { %v7125_v35 = vadd.f32 %v222_v34, %v120_v20  ;;  %v224_v36 = vpop.f32.mrb[9].mxu1 }
 0x11c   :  { %v7127_v42 = vadd.f32 %v224_v36, %v124_v21 }
 0x11e   :  { %v228_v43 = vpop.f32.mrb[10].mxu1 }
 0x11f   :  { %v7129_v49 = vadd.f32 %v228_v43, %v120_v20  ;;  %v230_v50 = vpop.f32.mrb[11].mxu1 }
 0x120   :  { %v7131_v6 = vadd.f32 %v230_v50, %v124_v21 }
 0x122   :  { %v234_v51 = vpop.f32.mrb[12].mxu1 }
 0x123   :  { %v7133_v28 = vadd.f32 %v234_v51, %v120_v20  ;;  %v236_v53 = vpop.f32.mrb[13].mxu1 }
 0x124   :  { %v7135_v56 = vadd.f32 %v236_v53, %v124_v21 }
 0x126   :  { %v240_v61 = vpop.f32.mrb[14].mxu1 }
 0x127   :  { %v7137_v62 = vadd.f32 %v240_v61, %v120_v20  ;;  %v242_v4 = vpop.f32.mrb[15].mxu1 }
 0x128   :  { %v7139_v55 = vadd.f32 %v242_v4, %v124_v21 }
 0x12a   :  { %v4333_v24 = vpop.f32.mrb[16].mxu1 }
 0x12b   :  { %v7141_v30 = vadd.f32 %v4333_v24, %v128_v5  ;;  %v859_v47 = vpop.f32.mrb[16].mxu0  ;;  %v311_v34 = vpop.f32.mrb[17].mxu1 }
 0x12c   :  { %v934_v36 = vadd.f32 %v859_v47, %v199_v23  ;;  %v861_v43 = vpop.f32.mrb[17].mxu0  ;;  %v430_v23 = vld [vmem:[%s8168_s9] sm:$0x7] }
 0x12d   :  { %v941_v50 = vadd.f32 %v861_v43, %v201_v26  ;;  %v443_v26 = vrot.slane %v430_v23, %v127_v54 }
 0x12e   :  { %v4336_v12 = vpop.f32.mrb[18].mxu1 }
 0x12f   :  { %v7143_v51 = vadd.f32 %v4336_v12, %v128_v5  ;;  %v321_v53 = vpop.f32.mrb[19].mxu1 }
 0x130   :  { %v7145_v61 = vadd.f32 %v321_v53, %v128_v5  ;;  %v3945_v53 = vmul.f32 -1.442695, %v934_v36 }
 0x132   :  { %v4339_v10 = vpop.f32.mrb[20].mxu1  ;;  %6081 = vpow2.f32 %v3945_v53  ;;  %v7177_v53 = vld [vmem:[%s8165_s6] ss:$0 sm:$0xff] }
 0x133   :  { %v7147_v15 = vadd.f32 %v4339_v10, %v128_v5  ;;  %v331_v4 = vpop.f32.mrb[21].mxu1 }
 0x134   :  { %v7149_v16 = vadd.f32 %v331_v4, %v128_v5 }
 0x136   :  { %v4342_v44 = vpop.f32.mrb[22].mxu1 }
 0x137   :  { %v7151_v20 = vadd.f32 %v4342_v44, %v128_v5  ;;  %v341_v21 = vpop.f32.mrb[23].mxu1 }
 0x138   :  { %v7153_v24 = vadd.f32 %v341_v21, %v128_v5 }
 0x139   :  { %8184 = vst [vmem:[#allocation13_spill] sm:$0xff] %v7151_v20 }
 0x13c   :  { %v6082_v36 = vpop.eup %6081 }
 0x14a   :  { %v4377_v47 = vpop.f32.mrb[24].mxu1 }
 0x14b   :  { %v7158_v43 = vadd.f32 %v4377_v47, %v443_v26  ;;  %v626_v12 = vpop.f32.mrb[25].mxu1 }
 0x14c   :  { %v7160_v10 = vadd.f32 %v626_v12, %v443_v26  ;;  %v3946_v12 = vmul.f32 -1.442695, %v941_v50 }
 0x14d   :  { %8185 = vst [vmem:[#allocation14_spill] sm:$0xff] %v7158_v43 }
 0x14e   :  { %v4380_v4 = vpop.f32.mrb[26].mxu1  ;;  %6083 = vpow2.f32 %v3946_v12 }
 0x14f   :  { %v7162_v0 = vadd.f32 %v4380_v4, %v443_v26  ;;  %v636_v44 = vpop.f32.mrb[27].mxu1  ;;  %v938_v4 = vadd.f32 1.0, %v6082_v36 }
 0x150   :  { %v7164_v38 = vadd.f32 %v636_v44, %v443_v26 }
 0x151   :  { %8186 = vst [vmem:[#allocation15_spill] sm:$0xff] %v7162_v0  ;;  %6085 = vrcp.f32 %v938_v4 }
 0x152   :  { %8187 = vst [vmem:[#allocation16_spill] sm:$0xff] %v7164_v38  ;;  %v4383_v21 = vpop.f32.mrb[28].mxu1 }
 0x153   :  { %v7166_v19 = vadd.f32 %v4383_v21, %v443_v26  ;;  %v646_v13 = vpop.f32.mrb[29].mxu1 }
 0x154   :  { %v7168_v20 = vadd.f32 %v646_v13, %v443_v26 }
 0x155   :  { %8188 = vst [vmem:[#allocation17_spill] sm:$0xff] %v7166_v19 }
 0x156   :  { %8189 = vst [vmem:[#allocation18_spill] sm:$0xff] %v7168_v20  ;;  %v4386_v54 = vpop.f32.mrb[30].mxu1  ;;  %v312_v20 = vadd.f32 %v311_v34, %v128_v5  ;;  %v8193_v5 = vmov 0.0  }
 0x157   :  { %v7170_v23 = vadd.f32 %v4386_v54, %v443_v26  ;;  %v656_v47 = vpop.f32.mrb[31].mxu1 }
 0x158   :  { %v7172_v43 = vadd.f32 %v656_v47, %v443_v26  ;;  %v6084_v44 = vpop.eup %6083 }
 0x159   :  { %8190 = vst [vmem:[#allocation19_spill] sm:$0xff] %v7170_v23  ;;  %v945_v21 = vadd.f32 1.0, %v6084_v44  ;;  %v8192_v44 = vmov 0.0|0.0  }
 0x15a   :  { %8191 = vst [vmem:[#allocation20_spill] sm:$0xff] %v7172_v43 }
 0x15b   :  { %v6086_v23 = vpop.eup %6085  ;;  %6087 = vrcp.f32 %v945_v21 }
 0x165   :  { %v6088_v47 = vpop.eup %6087 }
 0x166   :  { %v958_v12 = vsub.f32 1.0, %v6088_v47  ;;  %v960_v43 = vmul.f32 0.0, %v6088_v47 }
 0x16a   :  { %v930_v13 = vpop.f32.mrb[32].mxu1 }
 0x16b   :  { %v954_v19 = vadd.f32 %v7177_v53, %v930_v13  ;;  %v4421_v54 = vpop.f32.mrb[33].mxu1 }
 0x16d   :  { %v955_v50 = vmul.f32 %v6086_v23, %v954_v19 }
 0x16f   :  { %v956_v26 = vadd.f32 %v955_v50, %v312_v20 }
 0x171   :  { %6089 = vtanh.f32 %v956_v26 }
 0x17b   :  { %v6090_v36 = vpop.eup %6089 }
 0x17c   :  { %v959_v4 = vmul.f32 %v6090_v36, %v958_v12 }
 0x17e   :  { %v961_v0 = vadd.f32 %v960_v43, %v959_v4 }
 0x180   :  { %1033 = vmatmul.mubr.f32.vlgmr.msra.gmra.mrb[18].mxu0 %v961_v0  ;;  %4455 = vmatmul.mubr.f32.vlgmr.msra.gmra.mrb[34].mxu1 %v961_v0 }
 0x181   :  { %5190 = vmatpush1.bf16.msra.mxu0 %v6665_v48  ;;  %5221 = vmatpush3.bf16.msra.mxu1 %v6998_v37 }
 0x182   :  { %5192 = vmatprep.subr.bf16.mxu0 %v6675_v52  ;;  %5222 = vmatprep.subr.bf16.mxu1 %v8192_v44 }
 0x183   :  { %1201 = vmatprep.mubr.f32.mxu0 %v8193_v5  ;;  %4489 = vmatprep.mubr.msk.f32.mxu1 %vm6344_vm0, %v8193_v5 }
 0x185   :  { %5194 = vmatpush1.bf16.msra.mxu0 %v6702_v59  ;;  %5224 = vmatpush3.bf16.msra.mxu1 %v7011_v45 }
 0x186   :  { %5196 = vmatprep.subr.bf16.mxu0 %v6713_v63  ;;  %5225 = vmatprep.subr.bf16.mxu1 %v8192_v44 }
 0x189   :  { %5198 = vmatpush1.bf16.msra.mxu0 %v6740_v7  ;;  %5227 = vmatpush3.bf16.msra.mxu1 %v7023_v58 }
 0x18a   :  { %5200 = vmatprep.subr.bf16.mxu0 %v6751_v11  ;;  %5228 = vmatprep.subr.bf16.mxu1 %v8192_v44 }
 0x18d   :  { %5202 = vmatpush1.bf16.msra.mxu0 %v6778_v18  ;;  %5230 = vmatpush3.bf16.msra.mxu1 %v7035_v17 }
 0x18e   :  { %5204 = vmatprep.subr.bf16.mxu0 %v6789_v22  ;;  %5231 = vmatprep.subr.bf16.mxu1 %v8192_v44 }
 0x191   :  { %5206 = vmatpush1.bf16.msra.mxu0 %v6816_v29  ;;  %5233 = vmatpush3.bf16.msra.mxu1 %v7047_v40 }
 0x192   :  { %5208 = vmatprep.subr.bf16.mxu0 %v6827_v33  ;;  %5234 = vmatprep.subr.bf16.mxu1 %v8192_v44 }
 0x195   :  { %5210 = vmatpush1.bf16.msra.mxu0 %v6854_v41  ;;  %5236 = vmatpush3.bf16.msra.mxu1 %v7059_v60 }
 0x196   :  { %5212 = vmatprep.subr.bf16.mxu0 %v6865_v46  ;;  %5237 = vmatprep.subr.bf16.mxu1 %v8192_v44 }
 0x199   :  { %5214 = vmatpush1.bf16.msra.mxu0 %v6890_v57  ;;  %5239 = vmatpush3.bf16.msra.mxu1 %v7069_v2 }
 0x19a   :  { %5216 = vmatprep.subr.bf16.mxu0 %v6900_v1  ;;  %5240 = vmatprep.subr.bf16.mxu1 %v8192_v44 }
 0x19d   :  { %5218 = vmatpush1.bf16.msra.mxu0 %v6919_v9  ;;  %5242 = vmatpush3.bf16.msra.mxu1 %v7079_v8 }
 0x19e   :  { %5244 = vmatprep.subr.bf16.mxu0 %v6635_v39  ;;  %5275 = vmatprep.subr.bf16.mxu1 %v8192_v44 }
 0x253   :  { %v1034_v19 = vpop.f32.mrb[18].mxu0  ;;  %v1105_v34 = vpop.f32.mrb[34].mxu1 }
 0x254   :  { %v1109_v20 = vadd.f32 %v1034_v19, %v7113_v3  ;;  %v1036_v43 = vpop.f32.mrb[19].mxu0  ;;  %v4456_v23 = vpop.f32.mrb[35].mxu1  ;;  %v1123_v36 = vadd.f32 %v7177_v53, %v1105_v34 }
 0x255   :  { %v1116_v21 = vadd.f32 %v1036_v43, %v7115_v14 }
 0x256   :  { %v3948_v13 = vmul.f32 -1.442695, %v1109_v20 }
 0x257   :  { %v3949_v54 = vmul.f32 -1.442695, %v1116_v21 }
 0x258   :  { %6091 = vpow2.f32 %v3948_v13 }
 0x259   :  { %6093 = vpow2.f32 %v3949_v54 }
 0x262   :  { %v6092_v50 = vpop.eup %6091 }
 0x263   :  { %v1113_v26 = vadd.f32 1.0, %v6092_v50  ;;  %v6094_v47 = vpop.eup %6093 }
 0x264   :  { %v1120_v12 = vadd.f32 1.0, %v6094_v47 }
 0x265   :  { %6095 = vrcp.f32 %v1113_v26 }
 0x266   :  { %6097 = vrcp.f32 %v1120_v12 }
 0x26f   :  { %v6096_v4 = vpop.eup %6095 }
 0x270   :  { %v1124_v38 = vmul.f32 %v6096_v4, %v1123_v36  ;;  %v6098_v19 = vpop.eup %6097 }
 0x271   :  { %v1127_v23 = vsub.f32 1.0, %v6098_v19  ;;  %v1129_v43 = vmul.f32 %v6098_v19, %v961_v0 }
 0x272   :  { %v1125_v3 = vadd.f32 %v1124_v38, %v7141_v30 }
 0x274   :  { %6099 = vtanh.f32 %v1125_v3 }
 0x27e   :  { %v6100_v14 = vpop.eup %6099 }
 0x27f   :  { %v1128_v20 = vmul.f32 %v6100_v14, %v1127_v23 }
 0x281   :  { %v1130_v21 = vadd.f32 %v1129_v43, %v1128_v20 }
 0x283   :  { %1202 = vmatmul.mubr.f32.vlgmr.msra.gmra.mrb[20].mxu0 %v1130_v21  ;;  %4490 = vmatmul.mubr.f32.vlgmr.msra.gmra.mrb[36].mxu1 %v1130_v21 }
 0x284   :  { %5246 = vmatpush1.bf16.msra.mxu0 %v6665_v48  ;;  %5277 = vmatpush3.bf16.msra.mxu1 %v6998_v37 }
 0x285   :  { %5248 = vmatprep.subr.bf16.mxu0 %v6675_v52  ;;  %5278 = vmatprep.subr.bf16.mxu1 %v8192_v44 }
 0x286   :  { %1370 = vmatprep.mubr.f32.mxu0 %v8193_v5  ;;  %4524 = vmatprep.mubr.msk.f32.mxu1 %vm6344_vm0, %v8193_v5 }
 0x288   :  { %5250 = vmatpush1.bf16.msra.mxu0 %v6702_v59  ;;  %5280 = vmatpush3.bf16.msra.mxu1 %v7011_v45 }
 0x289   :  { %5252 = vmatprep.subr.bf16.mxu0 %v6713_v63  ;;  %5281 = vmatprep.subr.bf16.mxu1 %v8192_v44 }
 0x28c   :  { %5254 = vmatpush1.bf16.msra.mxu0 %v6740_v7  ;;  %5283 = vmatpush3.bf16.msra.mxu1 %v7023_v58 }
 0x28d   :  { %5256 = vmatprep.subr.bf16.mxu0 %v6751_v11  ;;  %5284 = vmatprep.subr.bf16.mxu1 %v8192_v44 }
 0x290   :  { %5258 = vmatpush1.bf16.msra.mxu0 %v6778_v18  ;;  %5286 = vmatpush3.bf16.msra.mxu1 %v7035_v17 }
 0x291   :  { %5260 = vmatprep.subr.bf16.mxu0 %v6789_v22  ;;  %5287 = vmatprep.subr.bf16.mxu1 %v8192_v44 }
 0x294   :  { %5262 = vmatpush1.bf16.msra.mxu0 %v6816_v29  ;;  %5289 = vmatpush3.bf16.msra.mxu1 %v7047_v40 }
 0x295   :  { %5264 = vmatprep.subr.bf16.mxu0 %v6827_v33  ;;  %5290 = vmatprep.subr.bf16.mxu1 %v8192_v44 }
 0x298   :  { %5266 = vmatpush1.bf16.msra.mxu0 %v6854_v41  ;;  %5292 = vmatpush3.bf16.msra.mxu1 %v7059_v60 }
 0x299   :  { %5268 = vmatprep.subr.bf16.mxu0 %v6865_v46  ;;  %5293 = vmatprep.subr.bf16.mxu1 %v8192_v44 }
 0x29c   :  { %5270 = vmatpush1.bf16.msra.mxu0 %v6890_v57  ;;  %5295 = vmatpush3.bf16.msra.mxu1 %v7069_v2 }
 0x29d   :  { %5272 = vmatprep.subr.bf16.mxu0 %v6900_v1  ;;  %5296 = vmatprep.subr.bf16.mxu1 %v8192_v44 }
 0x2a0   :  { %5274 = vmatpush1.bf16.msra.mxu0 %v6919_v9  ;;  %5298 = vmatpush3.bf16.msra.mxu1 %v7079_v8 }
 0x2a1   :  { %5300 = vmatprep.subr.bf16.mxu0 %v6635_v39  ;;  %5331 = vmatprep.subr.bf16.mxu1 %v8192_v44 }
 0x356   :  { %v1203_v0 = vpop.f32.mrb[20].mxu0  ;;  %v1274_v38 = vpop.f32.mrb[36].mxu1 }
 0x357   :  { %v1278_v30 = vadd.f32 %v1203_v0, %v7117_v25  ;;  %v1205_v34 = vpop.f32.mrb[21].mxu0  ;;  %v4491_v13 = vpop.f32.mrb[37].mxu1  ;;  %v1292_v3 = vadd.f32 %v7177_v53, %v1274_v38 }
 0x358   :  { %v1285_v54 = vadd.f32 %v1205_v34, %v7119_v27 }
 0x359   :  { %v3950_v50 = vmul.f32 -1.442695, %v1278_v30 }
 0x35a   :  { %v3951_v26 = vmul.f32 -1.442695, %v1285_v54 }
 0x35b   :  { %6101 = vpow2.f32 %v3950_v50 }
 0x35c   :  { %6103 = vpow2.f32 %v3951_v26 }
 0x365   :  { %v6102_v47 = vpop.eup %6101 }
 0x366   :  { %v1282_v12 = vadd.f32 1.0, %v6102_v47  ;;  %v6104_v36 = vpop.eup %6103 }
 0x367   :  { %v1289_v4 = vadd.f32 1.0, %v6104_v36 }
 0x368   :  { %6105 = vrcp.f32 %v1282_v12 }
 0x369   :  { %6107 = vrcp.f32 %v1289_v4 }
 0x372   :  { %v6106_v19 = vpop.eup %6105 }
 0x373   :  { %v1293_v23 = vmul.f32 %v6106_v19, %v1292_v3  ;;  %v6108_v14 = vpop.eup %6107 }
 0x374   :  { %v1296_v20 = vsub.f32 1.0, %v6108_v14  ;;  %v1298_v0 = vmul.f32 %v6108_v14, %v1130_v21 }
 0x375   :  { %v1294_v25 = vadd.f32 %v1293_v23, %v7145_v61 }
 0x377   :  { %6109 = vtanh.f32 %v1294_v25 }
 0x381   :  { %v6110_v27 = vpop.eup %6109 }
 0x382   :  { %v1297_v43 = vmul.f32 %v6110_v27, %v1296_v20 }
 0x384   :  { %v1299_v30 = vadd.f32 %v1298_v0, %v1297_v43 }
 0x386   :  { %1371 = vmatmul.mubr.f32.vlgmr.msra.gmra.mrb[22].mxu0 %v1299_v30  ;;  %4525 = vmatmul.mubr.f32.vlgmr.msra.gmra.mrb[38].mxu1 %v1299_v30 }
 0x387   :  { %5302 = vmatpush1.bf16.msra.mxu0 %v6665_v48  ;;  %5333 = vmatpush3.bf16.msra.mxu1 %v6998_v37 }
 0x388   :  { %5304 = vmatprep.subr.bf16.mxu0 %v6675_v52  ;;  %5334 = vmatprep.subr.bf16.mxu1 %v8192_v44 }
 0x389   :  { %1539 = vmatprep.mubr.f32.mxu0 %v8193_v5  ;;  %4559 = vmatprep.mubr.msk.f32.mxu1 %vm6344_vm0, %v8193_v5 }
 0x38b   :  { %5306 = vmatpush1.bf16.msra.mxu0 %v6702_v59  ;;  %5336 = vmatpush3.bf16.msra.mxu1 %v7011_v45 }
 0x38c   :  { %5308 = vmatprep.subr.bf16.mxu0 %v6713_v63  ;;  %5337 = vmatprep.subr.bf16.mxu1 %v8192_v44 }
 0x38f   :  { %5310 = vmatpush1.bf16.msra.mxu0 %v6740_v7  ;;  %5339 = vmatpush3.bf16.msra.mxu1 %v7023_v58 }
 0x390   :  { %5312 = vmatprep.subr.bf16.mxu0 %v6751_v11  ;;  %5340 = vmatprep.subr.bf16.mxu1 %v8192_v44 }
 0x393   :  { %5314 = vmatpush1.bf16.msra.mxu0 %v6778_v18  ;;  %5342 = vmatpush3.bf16.msra.mxu1 %v7035_v17 }
 0x394   :  { %5316 = vmatprep.subr.bf16.mxu0 %v6789_v22  ;;  %5343 = vmatprep.subr.bf16.mxu1 %v8192_v44 }
 0x397   :  { %5318 = vmatpush1.bf16.msra.mxu0 %v6816_v29  ;;  %5345 = vmatpush3.bf16.msra.mxu1 %v7047_v40 }
 0x398   :  { %5320 = vmatprep.subr.bf16.mxu0 %v6827_v33  ;;  %5346 = vmatprep.subr.bf16.mxu1 %v8192_v44 }
 0x39b   :  { %5322 = vmatpush1.bf16.msra.mxu0 %v6854_v41  ;;  %5348 = vmatpush3.bf16.msra.mxu1 %v7059_v60 }
 0x39c   :  { %5324 = vmatprep.subr.bf16.mxu0 %v6865_v46  ;;  %5349 = vmatprep.subr.bf16.mxu1 %v8192_v44 }
 0x39f   :  { %5326 = vmatpush1.bf16.msra.mxu0 %v6890_v57  ;;  %5351 = vmatpush3.bf16.msra.mxu1 %v7069_v2 }
 0x3a0   :  { %5328 = vmatprep.subr.bf16.mxu0 %v6900_v1  ;;  %5352 = vmatprep.subr.bf16.mxu1 %v8192_v44 }
 0x3a3   :  { %5330 = vmatpush1.bf16.msra.mxu0 %v6919_v9  ;;  %5354 = vmatpush3.bf16.msra.mxu1 %v7079_v8 }
 0x3a4   :  { %5356 = vmatprep.subr.bf16.mxu0 %v6635_v39  ;;  %5387 = vmatprep.subr.bf16.mxu1 %v8192_v44 }
 0x459   :  { %v1372_v61 = vpop.f32.mrb[22].mxu0  ;;  %v1443_v21 = vpop.f32.mrb[38].mxu1 }
 0x45a   :  { %v1447_v38 = vadd.f32 %v1372_v61, %v7121_v31  ;;  %v1374_v34 = vpop.f32.mrb[23].mxu0  ;;  %v4526_v13 = vpop.f32.mrb[39].mxu1  ;;  %v1461_v3 = vadd.f32 %v7177_v53, %v1443_v21 }
 0x45b   :  { %v1454_v54 = vadd.f32 %v1374_v34, %v7123_v32 }
 0x45c   :  { %v3952_v50 = vmul.f32 -1.442695, %v1447_v38 }
 0x45d   :  { %v3953_v26 = vmul.f32 -1.442695, %v1454_v54 }
 0x45e   :  { %6111 = vpow2.f32 %v3952_v50 }
 0x45f   :  { %6113 = vpow2.f32 %v3953_v26 }
 0x468   :  { %v6112_v47 = vpop.eup %6111 }
 0x469   :  { %v1451_v12 = vadd.f32 1.0, %v6112_v47  ;;  %v6114_v36 = vpop.eup %6113 }
 0x46a   :  { %v1458_v4 = vadd.f32 1.0, %v6114_v36 }
 0x46b   :  { %6115 = vrcp.f32 %v1451_v12 }
 0x46c   :  { %6117 = vrcp.f32 %v1458_v4 }
 0x475   :  { %v6116_v19 = vpop.eup %6115 }
 0x476   :  { %v1462_v23 = vmul.f32 %v6116_v19, %v1461_v3  ;;  %v6118_v25 = vpop.eup %6117 }
 0x477   :  { %v1465_v14 = vsub.f32 1.0, %v6118_v25  ;;  %v1467_v27 = vmul.f32 %v6118_v25, %v1299_v30 }
 0x478   :  { %v1463_v31 = vadd.f32 %v1462_v23, %v7143_v51 }
 0x47a   :  { %6119 = vtanh.f32 %v1463_v31 }
 0x484   :  { %v6120_v32 = vpop.eup %6119 }
 0x485   :  { %v1466_v20 = vmul.f32 %v6120_v32, %v1465_v14 }
 0x487   :  { %v1468_v43 = vadd.f32 %v1467_v27, %v1466_v20 }
 0x489   :  { %1540 = vmatmul.mubr.f32.vlgmr.msra.gmra.mrb[24].mxu0 %v1468_v43  ;;  %4560 = vmatmul.mubr.f32.vlgmr.msra.gmra.mrb[40].mxu1 %v1468_v43 }
 0x48a   :  { %5358 = vmatpush1.bf16.msra.mxu0 %v6665_v48  ;;  %5389 = vmatpush3.bf16.msra.mxu1 %v6998_v37 }
 0x48b   :  { %5360 = vmatprep.subr.bf16.mxu0 %v6675_v52  ;;  %5390 = vmatprep.subr.bf16.mxu1 %v8192_v44 }
 0x48c   :  { %1708 = vmatprep.mubr.f32.mxu0 %v8193_v5  ;;  %4594 = vmatprep.mubr.msk.f32.mxu1 %vm6344_vm0, %v8193_v5 }
 0x48e   :  { %5362 = vmatpush1.bf16.msra.mxu0 %v6702_v59  ;;  %5392 = vmatpush3.bf16.msra.mxu1 %v7011_v45 }
 0x48f   :  { %5364 = vmatprep.subr.bf16.mxu0 %v6713_v63  ;;  %5393 = vmatprep.subr.bf16.mxu1 %v8192_v44 }
 0x492   :  { %5366 = vmatpush1.bf16.msra.mxu0 %v6740_v7  ;;  %5395 = vmatpush3.bf16.msra.mxu1 %v7023_v58 }
 0x493   :  { %5368 = vmatprep.subr.bf16.mxu0 %v6751_v11  ;;  %5396 = vmatprep.subr.bf16.mxu1 %v8192_v44 }
 0x496   :  { %5370 = vmatpush1.bf16.msra.mxu0 %v6778_v18  ;;  %5398 = vmatpush3.bf16.msra.mxu1 %v7035_v17 }
 0x497   :  { %5372 = vmatprep.subr.bf16.mxu0 %v6789_v22  ;;  %5399 = vmatprep.subr.bf16.mxu1 %v8192_v44 }
 0x49a   :  { %5374 = vmatpush1.bf16.msra.mxu0 %v6816_v29  ;;  %5401 = vmatpush3.bf16.msra.mxu1 %v7047_v40 }
 0x49b   :  { %5376 = vmatprep.subr.bf16.mxu0 %v6827_v33  ;;  %5402 = vmatprep.subr.bf16.mxu1 %v8192_v44 }
 0x49e   :  { %5378 = vmatpush1.bf16.msra.mxu0 %v6854_v41  ;;  %5404 = vmatpush3.bf16.msra.mxu1 %v7059_v60 }
 0x49f   :  { %5380 = vmatprep.subr.bf16.mxu0 %v6865_v46  ;;  %5405 = vmatprep.subr.bf16.mxu1 %v8192_v44 }
 0x4a2   :  { %5382 = vmatpush1.bf16.msra.mxu0 %v6890_v57  ;;  %5407 = vmatpush3.bf16.msra.mxu1 %v7069_v2 }
 0x4a3   :  { %5384 = vmatprep.subr.bf16.mxu0 %v6900_v1  ;;  %5408 = vmatprep.subr.bf16.mxu1 %v8192_v44 }
 0x4a6   :  { %5386 = vmatpush1.bf16.msra.mxu0 %v6919_v9  ;;  %5410 = vmatpush3.bf16.msra.mxu1 %v7079_v8 }
 0x4a7   :  { %5412 = vmatprep.subr.bf16.mxu0 %v6635_v39  ;;  %5443 = vmatprep.subr.bf16.mxu1 %v8192_v44 }
 0x55c   :  { %v1541_v51 = vpop.f32.mrb[24].mxu0  ;;  %v1612_v0 = vpop.f32.mrb[40].mxu1 }
 0x55d   :  { %v1616_v30 = vadd.f32 %v1541_v51, %v7125_v35  ;;  %v1543_v61 = vpop.f32.mrb[25].mxu0  ;;  %v4561_v21 = vpop.f32.mrb[41].mxu1  ;;  %v1630_v12 = vadd.f32 %v7177_v53, %v1612_v0 }
 0x55e   :  { %v1623_v38 = vadd.f32 %v1543_v61, %v7127_v42 }
 0x55f   :  { %v3954_v34 = vmul.f32 -1.442695, %v1616_v30 }
 0x560   :  { %v3955_v13 = vmul.f32 -1.442695, %v1623_v38 }
 0x561   :  { %6121 = vpow2.f32 %v3954_v34 }
 0x562   :  { %6123 = vpow2.f32 %v3955_v13 }
 0x56b   :  { %v6122_v54 = vpop.eup %6121 }
 0x56c   :  { %v1620_v50 = vadd.f32 1.0, %v6122_v54  ;;  %v6124_v26 = vpop.eup %6123 }
 0x56d   :  { %v1627_v47 = vadd.f32 1.0, %v6124_v26 }
 0x56e   :  { %6125 = vrcp.f32 %v1620_v50 }
 0x56f   :  { %6127 = vrcp.f32 %v1627_v47 }
 0x578   :  { %v6126_v36 = vpop.eup %6125 }
 0x579   :  { %v1631_v4 = vmul.f32 %v6126_v36, %v1630_v12  ;;  %v6128_v3 = vpop.eup %6127 }
 0x57a   :  { %v1634_v19 = vsub.f32 1.0, %v6128_v3  ;;  %v1636_v31 = vmul.f32 %v6128_v3, %v1468_v43  ;;  %v745_v3 = vld [vmem:[#allocation5 + $0x38] sm:$0xff] }
 0x57b   :  { %v1632_v35 = vadd.f32 %v1631_v4, %v7149_v16  ;;  %v743_v4 = vld [vmem:[#allocation5 + $0x28] sm:$0xff] }
 0x57d   :  { %6129 = vtanh.f32 %v1632_v35 }
 0x587   :  { %v6130_v42 = vpop.eup %6129 }
 0x588   :  { %v1635_v23 = vmul.f32 %v6130_v42, %v1634_v19  ;;  %v748_v19 = vld [vmem:[#allocation5 + $0x50] sm:$0xff] }
 0x589   :  { %v7429_v42 = vpack.c.bf16 %v748_v19, %v745_v3 }
 0x58a   :  { %v1637_v25 = vadd.f32 %v1636_v31, %v1635_v23  ;;  %v744_v23 = vld [vmem:[#allocation5 + $0x30] sm:$0xff]  ;;  %v747_v31 = vld [vmem:[#allocation5 + $0x48] sm:$0xff] }
 0x58c   :  { %1709 = vmatmul.mubr.f32.vlgmr.msra.gmra.mrb[26].mxu0 %v1637_v25  ;;  %4595 = vmatmul.mubr.f32.vlgmr.msra.gmra.mrb[42].mxu1 %v1637_v25 }
 0x58d   :  { %5414 = vmatpush1.bf16.msra.mxu0 %v6665_v48  ;;  %5445 = vmatpush3.bf16.msra.mxu1 %v6998_v37 }
 0x58e   :  { %5416 = vmatprep.subr.bf16.mxu0 %v6675_v52  ;;  %5446 = vmatprep.subr.bf16.mxu1 %v8192_v44 }
 0x58f   :  { %1877 = vmatprep.mubr.f32.mxu0 %v8193_v5  ;;  %4629 = vmatprep.mubr.msk.f32.mxu1 %vm6344_vm0, %v8193_v5 }
 0x591   :  { %5418 = vmatpush1.bf16.msra.mxu0 %v6702_v59  ;;  %5448 = vmatpush3.bf16.msra.mxu1 %v7011_v45 }
 0x592   :  { %5420 = vmatprep.subr.bf16.mxu0 %v6713_v63  ;;  %5449 = vmatprep.subr.bf16.mxu1 %v8192_v44 }
 0x595   :  { %5422 = vmatpush1.bf16.msra.mxu0 %v6740_v7  ;;  %5451 = vmatpush3.bf16.msra.mxu1 %v7023_v58 }
 0x596   :  { %5424 = vmatprep.subr.bf16.mxu0 %v6751_v11  ;;  %5452 = vmatprep.subr.bf16.mxu1 %v8192_v44 }
 0x599   :  { %5426 = vmatpush1.bf16.msra.mxu0 %v6778_v18  ;;  %5454 = vmatpush3.bf16.msra.mxu1 %v7035_v17 }
 0x59a   :  { %5428 = vmatprep.subr.bf16.mxu0 %v6789_v22  ;;  %5455 = vmatprep.subr.bf16.mxu1 %v8192_v44 }
 0x59d   :  { %5430 = vmatpush1.bf16.msra.mxu0 %v6816_v29  ;;  %5457 = vmatpush3.bf16.msra.mxu1 %v7047_v40 }
 0x59e   :  { %5432 = vmatprep.subr.bf16.mxu0 %v6827_v33  ;;  %5458 = vmatprep.subr.bf16.mxu1 %v8192_v44 }
 0x5a1   :  { %5434 = vmatpush1.bf16.msra.mxu0 %v6854_v41  ;;  %5460 = vmatpush3.bf16.msra.mxu1 %v7059_v60 }
 0x5a2   :  { %5436 = vmatprep.subr.bf16.mxu0 %v6865_v46  ;;  %5461 = vmatprep.subr.bf16.mxu1 %v8192_v44 }
 0x5a5   :  { %5438 = vmatpush1.bf16.msra.mxu0 %v6890_v57  ;;  %5463 = vmatpush3.bf16.msra.mxu1 %v7069_v2 }
 0x5a6   :  { %5440 = vmatprep.subr.bf16.mxu0 %v6900_v1  ;;  %5464 = vmatprep.subr.bf16.mxu1 %v8192_v44 }
 0x5a9   :  { %5442 = vmatpush1.bf16.msra.mxu0 %v6919_v9  ;;  %5466 = vmatpush3.bf16.msra.mxu1 %v7079_v8 }
 0x5aa   :  { %5468 = vmatprep.subr.bf16.mxu0 %v6635_v39  ;;  %5499 = vmatprep.subr.bf16.mxu1 %v8192_v44 }
 0x65f   :  { %v1710_v16 = vpop.f32.mrb[26].mxu0  ;;  %v1781_v14 = vpop.f32.mrb[42].mxu1 }
 0x660   :  { %v1785_v32 = vadd.f32 %v1710_v16, %v7129_v49  ;;  %v1712_v20 = vpop.f32.mrb[27].mxu0  ;;  %v4596_v27 = vpop.f32.mrb[43].mxu1  ;;  %v1799_v39 = vadd.f32 %v7177_v53, %v1781_v14  ;;  %v7432_v16 = vpack.c.bf16 %v747_v31, %v744_v23  ;;  %v749_v14 = vld [vmem:[#allocation5 + $0x58] sm:$0xff]  ;;  %v780_v23 = vld [vmem:[#allocation5 + $0x150] sm:$0xff]  ;;  %v783_v31 = vld [vmem:[#allocation5 + $0x168] sm:$0xff] }
 0x661   :  { %v1792_v43 = vadd.f32 %v1712_v20, %v7131_v6  ;;  %v751_v20 = vld [vmem:[#allocation5 + $0x68] sm:$0xff]  ;;  %v754_v27 = vld [vmem:[#allocation5 + $0x80] sm:$0xff] }
 0x662   :  { %v3956_v51 = vmul.f32 -1.442695, %v1785_v32 }
 0x663   :  { %v3957_v0 = vmul.f32 -1.442695, %v1792_v43  ;;  %v7439_v43 = vpack.c.bf16 %v754_v27, %v751_v20  ;;  %v7490_v20 = vpack.c.bf16 %v783_v31, %v780_v23 }
 0x664   :  { %6131 = vpow2.f32 %v3956_v51  ;;  %v750_v51 = vld [vmem:[#allocation5 + $0x60] sm:$0xff] }
 0x665   :  { %6133 = vpow2.f32 %v3957_v0  ;;  %v753_v0 = vld [vmem:[#allocation5 + $0x78] sm:$0xff] }
 0x66e   :  { %v6132_v30 = vpop.eup %6131 }
 0x66f   :  { %v1789_v61 = vadd.f32 1.0, %v6132_v30  ;;  %v6134_v21 = vpop.eup %6133  ;;  %v752_v30 = vld [vmem:[#allocation5 + $0x70] sm:$0xff] }
 0x670   :  { %v1796_v38 = vadd.f32 1.0, %v6134_v21  ;;  %v755_v21 = vld [vmem:[#allocation5 + $0x88] sm:$0xff] }
 0x671   :  { %6135 = vrcp.f32 %v1789_v61  ;;  %v7442_v61 = vpack.c.bf16 %v753_v0, %v750_v51 }
 0x672   :  { %6137 = vrcp.f32 %v1796_v38  ;;  %v7445_v38 = vpack.c.bf16 %v755_v21, %v752_v30 }
 0x67b   :  { %v6136_v34 = vpop.eup %6135 }
 0x67c   :  { %v1800_v13 = vmul.f32 %v6136_v34, %v1799_v39  ;;  %v6138_v54 = vpop.eup %6137  ;;  %v757_v39 = vld [vmem:[#allocation5 + $0x98] sm:$0xff]  ;;  %v760_v34 = vld [vmem:[#allocation5 + $0xb0] sm:$0xff] }
 0x67d   :  { %v1803_v50 = vsub.f32 1.0, %v6138_v54  ;;  %v1805_v47 = vmul.f32 %v6138_v54, %v1637_v25  ;;  %v746_v25 = vld [vmem:[#allocation5 + $0x40] sm:$0xff]  ;;  %v759_v54 = vld [vmem:[#allocation5 + $0xa8] sm:$0xff] }
 0x67e   :  { %v1801_v49 = vadd.f32 %v1800_v13, %v7147_v15  ;;  %v738_v15 = vld [vmem:[#allocation5] sm:$0xff]  ;;  %v7435_v32 = vpack.c.bf16 %v749_v14, %v746_v25  ;;  %v7449_v13 = vpack.c.bf16 %v760_v34, %v757_v39  ;;  %v785_v14 = vld [vmem:[#allocation5 + $0x178] sm:$0xff] }
 0x67f   :  { %v782_v25 = vld [vmem:[#allocation5 + $0x160] sm:$0xff] }
 0x680   :  { %6139 = vtanh.f32 %v1801_v49  ;;  %v756_v49 = vld [vmem:[#allocation5 + $0x90] sm:$0xff]  ;;  %v7494_v27 = vpack.c.bf16 %v785_v14, %v782_v25 }
 0x68a   :  { %v6140_v6 = vpop.eup %6139 }
 0x68b   :  { %v1804_v26 = vmul.f32 %v6140_v6, %v1803_v50  ;;  %v758_v50 = vld [vmem:[#allocation5 + $0xa0] sm:$0xff]  ;;  %v7452_v6 = vpack.c.bf16 %v759_v54, %v756_v49 }
 0x68d   :  { %v1806_v12 = vadd.f32 %v1805_v47, %v1804_v26  ;;  %v761_v26 = vld [vmem:[#allocation5 + $0xb8] sm:$0xff] }
 0x68e   :  { %v7455_v47 = vpack.c.bf16 %v761_v26, %v758_v50 }
 0x68f   :  { %1878 = vmatmul.mubr.f32.vlgmr.msra.gmra.mrb[28].mxu0 %v1806_v12  ;;  %4630 = vmatmul.mubr.f32.vlgmr.msra.gmra.mrb[44].mxu1 %v1806_v12 }
 0x690   :  { %5470 = vmatpush1.bf16.msra.mxu0 %v6665_v48  ;;  %5501 = vmatpush3.bf16.msra.mxu1 %v6998_v37 }
 0x691   :  { %5472 = vmatprep.subr.bf16.mxu0 %v6675_v52  ;;  %5502 = vmatprep.subr.bf16.mxu1 %v8192_v44 }
 0x692   :  { %2046 = vmatprep.mubr.f32.mxu0 %v8193_v5  ;;  %4664 = vmatprep.mubr.msk.f32.mxu1 %vm6344_vm0, %v8193_v5 }
 0x694   :  { %5474 = vmatpush1.bf16.msra.mxu0 %v6702_v59  ;;  %5504 = vmatpush3.bf16.msra.mxu1 %v7011_v45 }
 0x695   :  { %5476 = vmatprep.subr.bf16.mxu0 %v6713_v63  ;;  %5505 = vmatprep.subr.bf16.mxu1 %v8192_v44 }
 0x698   :  { %5478 = vmatpush1.bf16.msra.mxu0 %v6740_v7  ;;  %5507 = vmatpush3.bf16.msra.mxu1 %v7023_v58 }
 0x699   :  { %5480 = vmatprep.subr.bf16.mxu0 %v6751_v11  ;;  %5508 = vmatprep.subr.bf16.mxu1 %v8192_v44 }
 0x69c   :  { %5482 = vmatpush1.bf16.msra.mxu0 %v6778_v18  ;;  %5510 = vmatpush3.bf16.msra.mxu1 %v7035_v17 }
 0x69d   :  { %5484 = vmatprep.subr.bf16.mxu0 %v6789_v22  ;;  %5511 = vmatprep.subr.bf16.mxu1 %v8192_v44 }
 0x6a0   :  { %5486 = vmatpush1.bf16.msra.mxu0 %v6816_v29  ;;  %5513 = vmatpush3.bf16.msra.mxu1 %v7047_v40 }
 0x6a1   :  { %5488 = vmatprep.subr.bf16.mxu0 %v6827_v33  ;;  %5514 = vmatprep.subr.bf16.mxu1 %v8192_v44 }
 0x6a4   :  { %5490 = vmatpush1.bf16.msra.mxu0 %v6854_v41  ;;  %5516 = vmatpush3.bf16.msra.mxu1 %v7059_v60 }
 0x6a5   :  { %5492 = vmatprep.subr.bf16.mxu0 %v6865_v46  ;;  %5517 = vmatprep.subr.bf16.mxu1 %v8192_v44 }
 0x6a8   :  { %5494 = vmatpush1.bf16.msra.mxu0 %v6890_v57  ;;  %5519 = vmatpush3.bf16.msra.mxu1 %v7069_v2 }
 0x6a9   :  { %5496 = vmatprep.subr.bf16.mxu0 %v6900_v1  ;;  %5520 = vmatprep.subr.bf16.mxu1 %v8192_v44 }
 0x6ac   :  { %5498 = vmatpush1.bf16.msra.mxu0 %v6919_v9  ;;  %5522 = vmatpush3.bf16.msra.mxu1 %v7079_v8  ;;  %v739_v8 = vld [vmem:[#allocation5 + $0x8] sm:$0xff] }
 0x6ad   :  { %5555 = vmatprep.subr.bf16.mxu1 %v8192_v44 }
 0x762   :  { %v1879_v48 = vpop.f32.mrb[28].mxu0  ;;  %v1950_v52 = vpop.f32.mrb[44].mxu1 }
 0x763   :  { %v1954_v59 = vadd.f32 %v1879_v48, %v7133_v28  ;;  %v1881_v63 = vpop.f32.mrb[29].mxu0  ;;  %v4631_v7 = vpop.f32.mrb[45].mxu1  ;;  %v1968_v57 = vadd.f32 %v7177_v53, %v1950_v52  ;;  %v742_v28 = vld [vmem:[#allocation5 + $0x20] sm:$0xff]  ;;  %v740_v53 = vld [vmem:[#allocation5 + $0x10] sm:$0xff] }
 0x764   :  { %v1961_v11 = vadd.f32 %v1881_v63, %v7135_v56  ;;  %v7420_v56 = vpack.c.bf16 %v742_v28, %v739_v8  ;;  %v7425_v35 = vpack.c.bf16 %v743_v4, %v740_v53  ;;  %v766_v48 = vld [vmem:[#allocation5 + $0xe0] sm:$0xff]  ;;  %v765_v63 = vld [vmem:[#allocation5 + $0xd8] sm:$0xff]  ;;  %v764_v7 = vld [vmem:[#allocation5 + $0xd0] sm:$0xff] }
 0x765   :  { %v3958_v18 = vmul.f32 -1.442695, %v1954_v59  ;;  %v762_v59 = vld [vmem:[#allocation5 + $0xc0] sm:$0xff]  ;;  %v777_v8 = vld [vmem:[#allocation5 + $0x138] sm:$0xff]  ;;  %v776_v28 = vld [vmem:[#allocation5 + $0x130] sm:$0xff] }
 0x766   :  { %v3959_v22 = vmul.f32 -1.442695, %v1961_v11  ;;  %5524 = vmatprep.subr.bf16.mxu0 %v7420_v56  ;;  %v7462_v11 = vpack.c.bf16 %v765_v63, %v762_v59  ;;  %v784_v53 = vld [vmem:[#allocation5 + $0x170] sm:$0xff]  ;;  %v6289_v59 = vld [vmem:[%s8165_s6] ss:$0 sm:$0xff] }
 0x767   :  { %6141 = vpow2.f32 %v3958_v18  ;;  %v767_v18 = vld [vmem:[#allocation5 + $0xe8] sm:$0xff] }
 0x768   :  { %6143 = vpow2.f32 %v3959_v22  ;;  %v7465_v22 = vpack.c.bf16 %v767_v18, %v764_v7  ;;  %v8194_v18 = vld [vmem:[#allocation13_spill] sm:$0xff] }
 0x771   :  { %v6142_v29 = vpop.eup %6141 }
 0x772   :  { %v1958_v33 = vadd.f32 1.0, %v6142_v29  ;;  %v6144_v41 = vpop.eup %6143  ;;  %v769_v29 = vld [vmem:[#allocation5 + $0xf8] sm:$0xff] }
 0x773   :  { %v1965_v46 = vadd.f32 1.0, %v6144_v41  ;;  %v768_v41 = vld [vmem:[#allocation5 + $0xf0] sm:$0xff] }
 0x774   :  { %6145 = vrcp.f32 %v1958_v33  ;;  %v772_v33 = vld [vmem:[#allocation5 + $0x110] sm:$0xff] }
 0x775   :  { %6147 = vrcp.f32 %v1965_v46  ;;  %v7468_v46 = vpack.c.bf16 %v772_v33, %v769_v29 }
 0x77e   :  { %v6146_v1 = vpop.eup %6145 }
 0x77f   :  { %v1969_v9 = vmul.f32 %v6146_v1, %v1968_v57  ;;  %v6148_v45 = vpop.eup %6147  ;;  %v771_v57 = vld [vmem:[#allocation5 + $0x108] sm:$0xff]  ;;  %v770_v1 = vld [vmem:[#allocation5 + $0x100] sm:$0xff] }
 0x780   :  { %v1972_v58 = vsub.f32 1.0, %v6148_v45  ;;  %v1974_v60 = vmul.f32 %v6148_v45, %v1806_v12  ;;  %v763_v12 = vld [vmem:[#allocation5 + $0xc8] sm:$0xff] }
 0x781   :  { %v1970_v37 = vadd.f32 %v1969_v9, %v7153_v24  ;;  %v741_v24 = vld [vmem:[#allocation5 + $0x18] sm:$0xff]  ;;  %v7459_v52 = vpack.c.bf16 %v766_v48, %v763_v12 }
 0x782   :  { %v7422_v36 = vpack.c.bf16 %v741_v24, %v738_v15  ;;  %v773_v9 = vld [vmem:[#allocation5 + $0x118] sm:$0xff]  ;;  %v779_v15 = vld [vmem:[#allocation5 + $0x148] sm:$0xff] }
 0x783   :  { %6149 = vtanh.f32 %v1970_v37  ;;  %v7471_v37 = vpack.c.bf16 %v771_v57, %v768_v41  ;;  %v7473_v45 = vpack.c.bf16 %v773_v9, %v770_v1  ;;  %v781_v24 = vld [vmem:[#allocation5 + $0x158] sm:$0xff]  ;;  %v7484_v3 = vpack.c.bf16 %v779_v15, %v776_v28  ;;  %v8196_v28 = vld [vmem:[#allocation12_spill] sm:$0xff] }
 0x784   :  { %v7486_v19 = vpack.c.bf16 %v784_v53, %v781_v24 }
 0x78d   :  { %v6150_v17 = vpop.eup %6149 }
 0x78e   :  { %v1973_v40 = vmul.f32 %v6150_v17, %v1972_v58  ;;  %v775_v58 = vld [vmem:[#allocation5 + $0x128] sm:$0xff]  ;;  %v778_v17 = vld [vmem:[#allocation5 + $0x140] sm:$0xff] }
 0x790   :  { %v7413_v2 = vadd.f32 %v1974_v60, %v1973_v40  ;;  %v774_v40 = vld [vmem:[#allocation5 + $0x120] sm:$0xff]  ;;  %v7477_v60 = vpack.c.bf16 %v778_v17, %v775_v58 }
 0x791   :  { %v7480_v4 = vpack.c.bf16 %v777_v8, %v774_v40  ;;  %v8195_v58 = vld [vmem:[#allocation11_spill] sm:$0xff] }
 0x792   :  { %2047 = vmatmul.mubr.f32.vlgmr.msra.gmra.mrb[30].mxu0 %v7413_v2  ;;  %4665 = vmatmul.mubr.f32.vlgmr.msra.gmra.mrb[46].mxu1 %v7413_v2 }
 0x793   :  { %2214 = vmatprep.mubr.f32.mxu0 %v8193_v5  ;;  %4699 = vmatprep.mubr.msk.f32.mxu1 %vm6344_vm0, %v8193_v5 }
 0x794   :  { %5526 = vmatpush1.bf16.msra.mxu0 %v7422_v36  ;;  %5557 = vmatpush3.bf16.msra.mxu1 %v7425_v35 }
 0x795   :  { %5558 = vmatprep.subr.bf16.mxu1 %v8192_v44  ;;  %5528 = vmatprep.subr.bf16.mxu0 %v7429_v42 }
 0x798   :  { %5530 = vmatpush1.bf16.msra.mxu0 %v7432_v16  ;;  %5560 = vmatpush3.bf16.msra.mxu1 %v7435_v32 }
 0x799   :  { %5561 = vmatprep.subr.bf16.mxu1 %v8192_v44  ;;  %5532 = vmatprep.subr.bf16.mxu0 %v7439_v43 }
 0x79c   :  { %5534 = vmatpush1.bf16.msra.mxu0 %v7442_v61  ;;  %5563 = vmatpush3.bf16.msra.mxu1 %v7445_v38 }
 0x79d   :  { %5564 = vmatprep.subr.bf16.mxu1 %v8192_v44  ;;  %5536 = vmatprep.subr.bf16.mxu0 %v7449_v13 }
 0x7a0   :  { %5538 = vmatpush1.bf16.msra.mxu0 %v7452_v6  ;;  %5566 = vmatpush3.bf16.msra.mxu1 %v7455_v47 }
 0x7a1   :  { %5567 = vmatprep.subr.bf16.mxu1 %v8192_v44  ;;  %5540 = vmatprep.subr.bf16.mxu0 %v7459_v52 }
 0x7a4   :  { %5542 = vmatpush1.bf16.msra.mxu0 %v7462_v11  ;;  %5569 = vmatpush3.bf16.msra.mxu1 %v7465_v22 }
 0x7a5   :  { %5544 = vmatprep.subr.bf16.mxu0 %v7468_v46  ;;  %5570 = vmatprep.subr.bf16.mxu1 %v8192_v44 }
 0x7a8   :  { %5546 = vmatpush1.bf16.msra.mxu0 %v7471_v37  ;;  %5572 = vmatpush3.bf16.msra.mxu1 %v7473_v45 }
 0x7a9   :  { %5548 = vmatprep.subr.bf16.mxu0 %v7477_v60  ;;  %5573 = vmatprep.subr.bf16.mxu1 %v8192_v44 }
 0x7ac   :  { %5550 = vmatpush1.bf16.msra.mxu0 %v7480_v4  ;;  %5575 = vmatpush3.bf16.msra.mxu1 %v7484_v3 }
 0x7ad   :  { %5552 = vmatprep.subr.bf16.mxu0 %v7486_v19  ;;  %5576 = vmatprep.subr.bf16.mxu1 %v8192_v44 }
 0x7b0   :  { %5554 = vmatpush1.bf16.msra.mxu0 %v7490_v20  ;;  %5578 = vmatpush3.bf16.msra.mxu1 %v7494_v27 }
 0x7b1   :  { %5580 = vmatprep.subr.bf16.mxu0 %v7420_v56  ;;  %5611 = vmatprep.subr.bf16.mxu1 %v8192_v44 }
 0x865   :  { %v2048_v51 = vpop.f32.mrb[30].mxu0  ;;  %v2119_v0 = vpop.f32.mrb[46].mxu1 }
 0x866   :  { %v2123_v30 = vadd.f32 %v2048_v51, %v7137_v62  ;;  %v2050_v21 = vpop.f32.mrb[31].mxu0  ;;  %v4666_v39 = vpop.f32.mrb[47].mxu1  ;;  %v2137_v63 = vadd.f32 %v6289_v59, %v2119_v0 }
 0x867   :  { %v2130_v34 = vadd.f32 %v2050_v21, %v7139_v55  ;;  %v7561_v21 = vld [vmem:[%s8169_s10] ss:$0 sm:$0xff]  ;;  %s3922_s10 = sshll.u32 %s6346_s0, 4  ;;  %s3923_s10 = int_to_ptr.vmem [resolvable:$true] %s3922_s10 }
 0x868   :  { %v3960_v49 = vmul.f32 -1.442695, %v2123_v30  ;;  %s6313_s1 = scalar_lea.vmem %s3923_s10, 16  ;;  %s6317_s14 = scalar_lea.vmem %s3923_s10, 32 }
 0x869   :  { %v3961_v54 = vmul.f32 -1.442695, %v2130_v34  ;;  %p6314_p8 = scmp.ne.s32.totalorder %s3923_s10, %s6313_s1  ;;  %p6318_p9 = scmp.lt.s32.totalorder %s3923_s10, %s3923_s10 }
 0x86a   :  { %6151 = vpow2.f32 %v3960_v49  ;;  %p6319_p10 = scmp.lt.s32.totalorder %s6317_s14, %s6313_s1 }
 0x86b   :  { %6153 = vpow2.f32 %v3961_v54 }
 0x86c   :  { %p6320_p11 = por %p6319_p10, %p6318_p9 }
 0x86e   :  { %p6321_p12 = pnand %p6320_p11, %p6314_p8 }
 0x874   :  { %v6152_v50 = vpop.eup %6151 }
 0x875   :  { %v2127_v26 = vadd.f32 1.0, %v6152_v50  ;;  %v6154_v12 = vpop.eup %6153 }
 0x876   :  { %v2134_v48 = vadd.f32 1.0, %v6154_v12 }
 0x877   :  { %6155 = vrcp.f32 %v2127_v26 }
 0x878   :  { %6157 = vrcp.f32 %v2134_v48 }
 0x881   :  { %v6156_v7 = vpop.eup %6155 }
 0x882   :  { %v2138_v62 = vmul.f32 %v6156_v7, %v2137_v63  ;;  %v6158_v55 = vpop.eup %6157 }
 0x883   :  { %v2141_v33 = vsub.f32 1.0, %v6158_v55  ;;  %v2143_v1 = vmul.f32 %v6158_v55, %v7413_v2  ;;  %v6290_v2 = vld [vmem:[%s8168_s9] sm:$0x7] }
 0x884   :  { %v2139_v29 = vadd.f32 %v2138_v62, %v8194_v18  ;;  %v7551_v17 = vrot.slane %v6290_v2, %v8195_v58  ;;  %v7554_v15 = vrot.slane %v6290_v2, %v8196_v28 }
 0x886   :  { %6159 = vtanh.f32 %v2139_v29 }
 0x890   :  { %v6160_v41 = vpop.eup %6159 }
 0x891   :  { %v2142_v57 = vmul.f32 %v6160_v41, %v2141_v33 }
 0x893   :  { %v7508_v9 = vadd.f32 %v2143_v1, %v2142_v57 }
 0x895   :  { %2215 = vmatmul.mubr.f32.vlgmr.msra.gmra.mrb[0].mxu0 %v7508_v9  ;;  %4700 = vmatmul.mubr.f32.vlgmr.msra.gmra.mrb[48].mxu1 %v7508_v9 }
 0x896   :  { %5582 = vmatpush1.bf16.msra.mxu0 %v7422_v36  ;;  %5613 = vmatpush3.bf16.msra.mxu1 %v7425_v35 }
 0x897   :  { %5584 = vmatprep.subr.bf16.mxu0 %v7429_v42  ;;  %5614 = vmatprep.subr.bf16.mxu1 %v8192_v44 }
 0x898   :  { %2389 = vmatprep.mubr.f32.mxu0 %v8193_v5  ;;  %4734 = vmatprep.mubr.msk.f32.mxu1 %vm6344_vm0, %v8193_v5 }
 0x89a   :  { %5586 = vmatpush1.bf16.msra.mxu0 %v7432_v16  ;;  %5616 = vmatpush3.bf16.msra.mxu1 %v7435_v32 }
 0x89b   :  { %5588 = vmatprep.subr.bf16.mxu0 %v7439_v43  ;;  %5617 = vmatprep.subr.bf16.mxu1 %v8192_v44 }
 0x89e   :  { %5590 = vmatpush1.bf16.msra.mxu0 %v7442_v61  ;;  %5619 = vmatpush3.bf16.msra.mxu1 %v7445_v38 }
 0x89f   :  { %5592 = vmatprep.subr.bf16.mxu0 %v7449_v13  ;;  %5620 = vmatprep.subr.bf16.mxu1 %v8192_v44 }
 0x8a2   :  { %5594 = vmatpush1.bf16.msra.mxu0 %v7452_v6  ;;  %5622 = vmatpush3.bf16.msra.mxu1 %v7455_v47 }
 0x8a3   :  { %5596 = vmatprep.subr.bf16.mxu0 %v7459_v52  ;;  %5623 = vmatprep.subr.bf16.mxu1 %v8192_v44 }
 0x8a6   :  { %5598 = vmatpush1.bf16.msra.mxu0 %v7462_v11  ;;  %5625 = vmatpush3.bf16.msra.mxu1 %v7465_v22 }
 0x8a7   :  { %5600 = vmatprep.subr.bf16.mxu0 %v7468_v46  ;;  %5626 = vmatprep.subr.bf16.mxu1 %v8192_v44 }
 0x8aa   :  { %5602 = vmatpush1.bf16.msra.mxu0 %v7471_v37  ;;  %5628 = vmatpush3.bf16.msra.mxu1 %v7473_v45 }
 0x8ab   :  { %5604 = vmatprep.subr.bf16.mxu0 %v7477_v60  ;;  %5629 = vmatprep.subr.bf16.mxu1 %v8192_v44 }
 0x8ae   :  { %5606 = vmatpush1.bf16.msra.mxu0 %v7480_v4  ;;  %5631 = vmatpush3.bf16.msra.mxu1 %v7484_v3 }
 0x8af   :  { %5608 = vmatprep.subr.bf16.mxu0 %v7486_v19  ;;  %5632 = vmatprep.subr.bf16.mxu1 %v8192_v44 }
 0x8b2   :  { %5610 = vmatpush1.bf16.msra.mxu0 %v7490_v20  ;;  %5634 = vmatpush3.bf16.msra.mxu1 %v7494_v27 }
 0x8b3   :  { %5636 = vmatprep.subr.bf16.mxu0 %v7420_v56  ;;  %5667 = vmatprep.subr.bf16.mxu1 %v8192_v44 }
 0x968   :  { %v2216_v40 = vpop.f32.mrb[0].mxu0  ;;  %v2287_v8 = vpop.f32.mrb[48].mxu1 }
 0x969   :  { %v6035_v24 = vadd.f32 %v2216_v40, %v7551_v17  ;;  %v2218_v53 = vpop.f32.mrb[1].mxu0  ;;  %v4701_v23 = vpop.f32.mrb[49].mxu1  ;;  %v2311_v34 = vadd.f32 %v7561_v21, %v2287_v8 }
 0x96a   :  { %v6036_v25 = vadd.f32 %v2218_v53, %v7554_v15  ;;  %v8197_v23 = vld [vmem:[#allocation14_spill] sm:$0xff] }
 0x96b   :  { %v3962_v31 = vmul.f32 -1.442695, %v6035_v24 }
 0x96c   :  { %v3963_v14 = vmul.f32 -1.442695, %v6036_v25 }
 0x96d   :  { %6161 = vpow2.f32 %v3962_v31 }
 0x96e   :  { %6163 = vpow2.f32 %v3963_v14 }
 0x977   :  { %v6162_v51 = vpop.eup %6161 }
 0x978   :  { %v2295_v0 = vadd.f32 1.0, %v6162_v51  ;;  %v6164_v30 = vpop.eup %6163 }
 0x979   :  { %v2302_v39 = vadd.f32 1.0, %v6164_v30 }
 0x97a   :  { %6165 = vrcp.f32 %v2295_v0 }
 0x97b   :  { %6167 = vrcp.f32 %v2302_v39 }
 0x984   :  { %v6166_v49 = vpop.eup %6165 }
 0x985   :  { %v2312_v54 = vmul.f32 %v6166_v49, %v2311_v34  ;;  %v6168_v26 = vpop.eup %6167 }
 0x986   :  { %v2315_v12 = vsub.f32 1.0, %v6168_v26  ;;  %v2317_v63 = vmul.f32 %v6168_v26, %v7508_v9 }
 0x987   :  { %v2313_v50 = vadd.f32 %v2312_v54, %v7160_v10 }
 0x989   :  { %6169 = vtanh.f32 %v2313_v50 }
 0x993   :  { %v6170_v48 = vpop.eup %6169 }
 0x994   :  { %v2316_v59 = vmul.f32 %v6170_v48, %v2315_v12 }
 0x996   :  { %v7566_v7 = vadd.f32 %v2317_v63, %v2316_v59 }
 0x998   :  { %2390 = vmatmul.mubr.f32.vlgmr.msra.gmra.mrb[2].mxu0 %v7566_v7  ;;  %4735 = vmatmul.mubr.f32.vlgmr.msra.gmra.mrb[50].mxu1 %v7566_v7 }
 0x999   :  { %5638 = vmatpush1.bf16.msra.mxu0 %v7422_v36  ;;  %5669 = vmatpush3.bf16.msra.mxu1 %v7425_v35 }
 0x99a   :  { %5640 = vmatprep.subr.bf16.mxu0 %v7429_v42  ;;  %5670 = vmatprep.subr.bf16.mxu1 %v8192_v44 }
 0x99b   :  { %2559 = vmatprep.mubr.f32.mxu0 %v8193_v5  ;;  %4769 = vmatprep.mubr.msk.f32.mxu1 %vm6344_vm0, %v8193_v5 }
 0x99d   :  { %5642 = vmatpush1.bf16.msra.mxu0 %v7432_v16  ;;  %5672 = vmatpush3.bf16.msra.mxu1 %v7435_v32 }
 0x99e   :  { %5644 = vmatprep.subr.bf16.mxu0 %v7439_v43  ;;  %5673 = vmatprep.subr.bf16.mxu1 %v8192_v44 }
 0x9a1   :  { %5646 = vmatpush1.bf16.msra.mxu0 %v7442_v61  ;;  %5675 = vmatpush3.bf16.msra.mxu1 %v7445_v38 }
 0x9a2   :  { %5648 = vmatprep.subr.bf16.mxu0 %v7449_v13  ;;  %5676 = vmatprep.subr.bf16.mxu1 %v8192_v44 }
 0x9a5   :  { %5650 = vmatpush1.bf16.msra.mxu0 %v7452_v6  ;;  %5678 = vmatpush3.bf16.msra.mxu1 %v7455_v47 }
 0x9a6   :  { %5652 = vmatprep.subr.bf16.mxu0 %v7459_v52  ;;  %5679 = vmatprep.subr.bf16.mxu1 %v8192_v44 }
 0x9a9   :  { %5654 = vmatpush1.bf16.msra.mxu0 %v7462_v11  ;;  %5681 = vmatpush3.bf16.msra.mxu1 %v7465_v22 }
 0x9aa   :  { %5656 = vmatprep.subr.bf16.mxu0 %v7468_v46  ;;  %5682 = vmatprep.subr.bf16.mxu1 %v8192_v44 }
 0x9ad   :  { %5658 = vmatpush1.bf16.msra.mxu0 %v7471_v37  ;;  %5684 = vmatpush3.bf16.msra.mxu1 %v7473_v45 }
 0x9ae   :  { %5660 = vmatprep.subr.bf16.mxu0 %v7477_v60  ;;  %5685 = vmatprep.subr.bf16.mxu1 %v8192_v44 }
 0x9b1   :  { %5662 = vmatpush1.bf16.msra.mxu0 %v7480_v4  ;;  %5687 = vmatpush3.bf16.msra.mxu1 %v7484_v3 }
 0x9b2   :  { %5664 = vmatprep.subr.bf16.mxu0 %v7486_v19  ;;  %5688 = vmatprep.subr.bf16.mxu1 %v8192_v44 }
 0x9b5   :  { %5666 = vmatpush1.bf16.msra.mxu0 %v7490_v20  ;;  %5690 = vmatpush3.bf16.msra.mxu1 %v7494_v27 }
 0x9b6   :  { %5692 = vmatprep.subr.bf16.mxu0 %v7420_v56  ;;  %5723 = vmatprep.subr.bf16.mxu1 %v8192_v44 }
 0xa6b   :  { %v2391_v10 = vpop.f32.mrb[2].mxu0  ;;  %v2462_v62 = vpop.f32.mrb[50].mxu1 }
 0xa6c   :  { %v6037_v18 = vadd.f32 %v2391_v10, %v7551_v17  ;;  %v2393_v29 = vpop.f32.mrb[3].mxu0  ;;  %v4736_v55 = vpop.f32.mrb[51].mxu1  ;;  %v2480_v8 = vadd.f32 %v7561_v21, %v2462_v62 }
 0xa6d   :  { %v6038_v41 = vadd.f32 %v2393_v29, %v7554_v15 }
 0xa6e   :  { %v3965_v33 = vmul.f32 -1.442695, %v6037_v18 }
 0xa6f   :  { %v3966_v57 = vmul.f32 -1.442695, %v6038_v41  ;;  %v8198_v41 = vld [vmem:[#allocation16_spill] sm:$0xff] }
 0xa70   :  { %6171 = vpow2.f32 %v3965_v33 }
 0xa71   :  { %6173 = vpow2.f32 %v3966_v57 }
 0xa7a   :  { %v6172_v1 = vpop.eup %6171 }
 0xa7b   :  { %v2470_v9 = vadd.f32 1.0, %v6172_v1  ;;  %v6174_v2 = vpop.eup %6173 }
 0xa7c   :  { %v2477_v40 = vadd.f32 1.0, %v6174_v2 }
 0xa7d   :  { %6175 = vrcp.f32 %v2470_v9 }
 0xa7e   :  { %6177 = vrcp.f32 %v2477_v40 }
 0xa87   :  { %v6176_v24 = vpop.eup %6175 }
 0xa88   :  { %v2481_v53 = vmul.f32 %v6176_v24, %v2480_v8  ;;  %v6178_v25 = vpop.eup %6177 }
 0xa89   :  { %v2484_v14 = vsub.f32 1.0, %v6178_v25  ;;  %v2486_v30 = vmul.f32 %v6178_v25, %v7566_v7 }
 0xa8a   :  { %v2482_v31 = vadd.f32 %v2481_v53, %v8197_v23 }
 0xa8c   :  { %6179 = vtanh.f32 %v2482_v31 }
 0xa96   :  { %v6180_v51 = vpop.eup %6179 }
 0xa97   :  { %v2485_v0 = vmul.f32 %v6180_v51, %v2484_v14 }
 0xa99   :  { %v7610_v39 = vadd.f32 %v2486_v30, %v2485_v0 }
 0xa9b   :  { %2560 = vmatmul.mubr.f32.vlgmr.msra.gmra.mrb[4].mxu0 %v7610_v39  ;;  %4770 = vmatmul.mubr.f32.vlgmr.msra.gmra.mrb[52].mxu1 %v7610_v39 }
 0xa9c   :  { %5694 = vmatpush1.bf16.msra.mxu0 %v7422_v36  ;;  %5725 = vmatpush3.bf16.msra.mxu1 %v7425_v35 }
 0xa9d   :  { %5696 = vmatprep.subr.bf16.mxu0 %v7429_v42  ;;  %5726 = vmatprep.subr.bf16.mxu1 %v8192_v44 }
 0xa9e   :  { %2729 = vmatprep.mubr.f32.mxu0 %v8193_v5  ;;  %4804 = vmatprep.mubr.msk.f32.mxu1 %vm6344_vm0, %v8193_v5 }
 0xaa0   :  { %5698 = vmatpush1.bf16.msra.mxu0 %v7432_v16  ;;  %5728 = vmatpush3.bf16.msra.mxu1 %v7435_v32 }
 0xaa1   :  { %5700 = vmatprep.subr.bf16.mxu0 %v7439_v43  ;;  %5729 = vmatprep.subr.bf16.mxu1 %v8192_v44 }
 0xaa4   :  { %5702 = vmatpush1.bf16.msra.mxu0 %v7442_v61  ;;  %5731 = vmatpush3.bf16.msra.mxu1 %v7445_v38 }
 0xaa5   :  { %5704 = vmatprep.subr.bf16.mxu0 %v7449_v13  ;;  %5732 = vmatprep.subr.bf16.mxu1 %v8192_v44 }
 0xaa8   :  { %5706 = vmatpush1.bf16.msra.mxu0 %v7452_v6  ;;  %5734 = vmatpush3.bf16.msra.mxu1 %v7455_v47 }
 0xaa9   :  { %5708 = vmatprep.subr.bf16.mxu0 %v7459_v52  ;;  %5735 = vmatprep.subr.bf16.mxu1 %v8192_v44 }
 0xaac   :  { %5710 = vmatpush1.bf16.msra.mxu0 %v7462_v11  ;;  %5737 = vmatpush3.bf16.msra.mxu1 %v7465_v22 }
 0xaad   :  { %5712 = vmatprep.subr.bf16.mxu0 %v7468_v46  ;;  %5738 = vmatprep.subr.bf16.mxu1 %v8192_v44 }
 0xab0   :  { %5714 = vmatpush1.bf16.msra.mxu0 %v7471_v37  ;;  %5740 = vmatpush3.bf16.msra.mxu1 %v7473_v45 }
 0xab1   :  { %5716 = vmatprep.subr.bf16.mxu0 %v7477_v60  ;;  %5741 = vmatprep.subr.bf16.mxu1 %v8192_v44 }
 0xab4   :  { %5718 = vmatpush1.bf16.msra.mxu0 %v7480_v4  ;;  %5743 = vmatpush3.bf16.msra.mxu1 %v7484_v3 }
 0xab5   :  { %5720 = vmatprep.subr.bf16.mxu0 %v7486_v19  ;;  %5744 = vmatprep.subr.bf16.mxu1 %v8192_v44 }
 0xab8   :  { %5722 = vmatpush1.bf16.msra.mxu0 %v7490_v20  ;;  %5746 = vmatpush3.bf16.msra.mxu1 %v7494_v27 }
 0xab9   :  { %5748 = vmatprep.subr.bf16.mxu0 %v7420_v56  ;;  %5779 = vmatprep.subr.bf16.mxu1 %v8192_v44 }
 0xb6e   :  { %v2561_v34 = vpop.f32.mrb[4].mxu0  ;;  %v2632_v49 = vpop.f32.mrb[52].mxu1 }
 0xb6f   :  { %v6039_v54 = vadd.f32 %v2561_v34, %v7551_v17  ;;  %v2563_v50 = vpop.f32.mrb[5].mxu0  ;;  %v4771_v26 = vpop.f32.mrb[53].mxu1  ;;  %v2650_v29 = vadd.f32 %v7561_v21, %v2632_v49 }
 0xb70   :  { %v6040_v48 = vadd.f32 %v2563_v50, %v7554_v15 }
 0xb71   :  { %v3967_v12 = vmul.f32 -1.442695, %v6039_v54 }
 0xb72   :  { %v3968_v59 = vmul.f32 -1.442695, %v6040_v48 }
 0xb73   :  { %6181 = vpow2.f32 %v3967_v12 }
 0xb74   :  { %6183 = vpow2.f32 %v3968_v59  ;;  %v8199_v59 = vld [vmem:[#allocation15_spill] sm:$0xff] }
 0xb7d   :  { %v6182_v63 = vpop.eup %6181 }
 0xb7e   :  { %v2640_v10 = vadd.f32 1.0, %v6182_v63  ;;  %v6184_v62 = vpop.eup %6183 }
 0xb7f   :  { %v2647_v18 = vadd.f32 1.0, %v6184_v62 }
 0xb80   :  { %6185 = vrcp.f32 %v2640_v10 }
 0xb81   :  { %6187 = vrcp.f32 %v2647_v18 }
 0xb8a   :  { %v6186_v55 = vpop.eup %6185 }
 0xb8b   :  { %v2651_v33 = vmul.f32 %v6186_v55, %v2650_v29  ;;  %v6188_v1 = vpop.eup %6187 }
 0xb8c   :  { %v2654_v9 = vsub.f32 1.0, %v6188_v1  ;;  %v2656_v8 = vmul.f32 %v6188_v1, %v7610_v39 }
 0xb8d   :  { %v2652_v57 = vadd.f32 %v2651_v33, %v8198_v41 }
 0xb8f   :  { %6189 = vtanh.f32 %v2652_v57 }
 0xb99   :  { %v6190_v2 = vpop.eup %6189 }
 0xb9a   :  { %v2655_v40 = vmul.f32 %v6190_v2, %v2654_v9 }
 0xb9c   :  { %v7654_v24 = vadd.f32 %v2656_v8, %v2655_v40 }
 0xb9e   :  { %2730 = vmatmul.mubr.f32.vlgmr.msra.gmra.mrb[6].mxu0 %v7654_v24  ;;  %4805 = vmatmul.mubr.f32.vlgmr.msra.gmra.mrb[54].mxu1 %v7654_v24 }
 0xb9f   :  { %5750 = vmatpush1.bf16.msra.mxu0 %v7422_v36  ;;  %5781 = vmatpush3.bf16.msra.mxu1 %v7425_v35 }
 0xba0   :  { %5752 = vmatprep.subr.bf16.mxu0 %v7429_v42  ;;  %5782 = vmatprep.subr.bf16.mxu1 %v8192_v44 }
 0xba1   :  { %2899 = vmatprep.mubr.f32.mxu0 %v8193_v5  ;;  %4839 = vmatprep.mubr.msk.f32.mxu1 %vm6344_vm0, %v8193_v5 }
 0xba3   :  { %5754 = vmatpush1.bf16.msra.mxu0 %v7432_v16  ;;  %5784 = vmatpush3.bf16.msra.mxu1 %v7435_v32 }
 0xba4   :  { %5756 = vmatprep.subr.bf16.mxu0 %v7439_v43  ;;  %5785 = vmatprep.subr.bf16.mxu1 %v8192_v44 }
 0xba7   :  { %5758 = vmatpush1.bf16.msra.mxu0 %v7442_v61  ;;  %5787 = vmatpush3.bf16.msra.mxu1 %v7445_v38 }
 0xba8   :  { %5760 = vmatprep.subr.bf16.mxu0 %v7449_v13  ;;  %5788 = vmatprep.subr.bf16.mxu1 %v8192_v44 }
 0xbab   :  { %5762 = vmatpush1.bf16.msra.mxu0 %v7452_v6  ;;  %5790 = vmatpush3.bf16.msra.mxu1 %v7455_v47 }
 0xbac   :  { %5764 = vmatprep.subr.bf16.mxu0 %v7459_v52  ;;  %5791 = vmatprep.subr.bf16.mxu1 %v8192_v44 }
 0xbaf   :  { %5766 = vmatpush1.bf16.msra.mxu0 %v7462_v11  ;;  %5793 = vmatpush3.bf16.msra.mxu1 %v7465_v22 }
 0xbb0   :  { %5768 = vmatprep.subr.bf16.mxu0 %v7468_v46  ;;  %5794 = vmatprep.subr.bf16.mxu1 %v8192_v44 }
 0xbb3   :  { %5770 = vmatpush1.bf16.msra.mxu0 %v7471_v37  ;;  %5796 = vmatpush3.bf16.msra.mxu1 %v7473_v45 }
 0xbb4   :  { %5772 = vmatprep.subr.bf16.mxu0 %v7477_v60  ;;  %5797 = vmatprep.subr.bf16.mxu1 %v8192_v44 }
 0xbb7   :  { %5774 = vmatpush1.bf16.msra.mxu0 %v7480_v4  ;;  %5799 = vmatpush3.bf16.msra.mxu1 %v7484_v3 }
 0xbb8   :  { %5776 = vmatprep.subr.bf16.mxu0 %v7486_v19  ;;  %5800 = vmatprep.subr.bf16.mxu1 %v8192_v44 }
 0xbbb   :  { %5778 = vmatpush1.bf16.msra.mxu0 %v7490_v20  ;;  %5802 = vmatpush3.bf16.msra.mxu1 %v7494_v27 }
 0xbbc   :  { %5804 = vmatprep.subr.bf16.mxu0 %v7420_v56  ;;  %5835 = vmatprep.subr.bf16.mxu1 %v8192_v44 }
 0xc71   :  { %v2731_v53 = vpop.f32.mrb[6].mxu0  ;;  %v2802_v23 = vpop.f32.mrb[54].mxu1 }
 0xc72   :  { %v6041_v31 = vadd.f32 %v2731_v53, %v7551_v17  ;;  %v2733_v25 = vpop.f32.mrb[7].mxu0  ;;  %v4806_v14 = vpop.f32.mrb[55].mxu1  ;;  %v2820_v26 = vadd.f32 %v7561_v21, %v2802_v23 }
 0xc73   :  { %v6042_v0 = vadd.f32 %v2733_v25, %v7554_v15 }
 0xc74   :  { %v3969_v51 = vmul.f32 -1.442695, %v6041_v31 }
 0xc75   :  { %v3970_v30 = vmul.f32 -1.442695, %v6042_v0 }
 0xc76   :  { %6191 = vpow2.f32 %v3969_v51 }
 0xc77   :  { %6193 = vpow2.f32 %v3970_v30 }
 0xc80   :  { %v6192_v34 = vpop.eup %6191 }
 0xc81   :  { %v2810_v49 = vadd.f32 1.0, %v6192_v34  ;;  %v6194_v54 = vpop.eup %6193  ;;  %v8200_v34 = vld [vmem:[#allocation18_spill] sm:$0xff] }
 0xc82   :  { %v2817_v50 = vadd.f32 1.0, %v6194_v54 }
 0xc83   :  { %6195 = vrcp.f32 %v2810_v49 }
 0xc84   :  { %6197 = vrcp.f32 %v2817_v50 }
 0xc8d   :  { %v6196_v12 = vpop.eup %6195 }
 0xc8e   :  { %v2821_v48 = vmul.f32 %v6196_v12, %v2820_v26  ;;  %v6198_v10 = vpop.eup %6197 }
 0xc8f   :  { %v2824_v62 = vsub.f32 1.0, %v6198_v10  ;;  %v2826_v55 = vmul.f32 %v6198_v10, %v7654_v24 }
 0xc90   :  { %v2822_v63 = vadd.f32 %v2821_v48, %v8199_v59 }
 0xc92   :  { %6199 = vtanh.f32 %v2822_v63 }
 0xc9c   :  { %v6200_v18 = vpop.eup %6199 }
 0xc9d   :  { %v2825_v29 = vmul.f32 %v6200_v18, %v2824_v62 }
 0xc9f   :  { %v7698_v33 = vadd.f32 %v2826_v55, %v2825_v29 }
 0xca1   :  { %2900 = vmatmul.mubr.f32.vlgmr.msra.gmra.mrb[8].mxu0 %v7698_v33  ;;  %4840 = vmatmul.mubr.f32.vlgmr.msra.gmra.mrb[56].mxu1 %v7698_v33 }
 0xca2   :  { %5806 = vmatpush1.bf16.msra.mxu0 %v7422_v36  ;;  %5837 = vmatpush3.bf16.msra.mxu1 %v7425_v35 }
 0xca3   :  { %5808 = vmatprep.subr.bf16.mxu0 %v7429_v42  ;;  %5838 = vmatprep.subr.bf16.mxu1 %v8192_v44 }
 0xca4   :  { %3069 = vmatprep.mubr.f32.mxu0 %v8193_v5  ;;  %4874 = vmatprep.mubr.msk.f32.mxu1 %vm6344_vm0, %v8193_v5 }
 0xca6   :  { %5810 = vmatpush1.bf16.msra.mxu0 %v7432_v16  ;;  %5840 = vmatpush3.bf16.msra.mxu1 %v7435_v32 }
 0xca7   :  { %5812 = vmatprep.subr.bf16.mxu0 %v7439_v43  ;;  %5841 = vmatprep.subr.bf16.mxu1 %v8192_v44 }
 0xcaa   :  { %5814 = vmatpush1.bf16.msra.mxu0 %v7442_v61  ;;  %5843 = vmatpush3.bf16.msra.mxu1 %v7445_v38 }
 0xcab   :  { %5816 = vmatprep.subr.bf16.mxu0 %v7449_v13  ;;  %5844 = vmatprep.subr.bf16.mxu1 %v8192_v44 }
 0xcae   :  { %5818 = vmatpush1.bf16.msra.mxu0 %v7452_v6  ;;  %5846 = vmatpush3.bf16.msra.mxu1 %v7455_v47 }
 0xcaf   :  { %5820 = vmatprep.subr.bf16.mxu0 %v7459_v52  ;;  %5847 = vmatprep.subr.bf16.mxu1 %v8192_v44 }
 0xcb2   :  { %5822 = vmatpush1.bf16.msra.mxu0 %v7462_v11  ;;  %5849 = vmatpush3.bf16.msra.mxu1 %v7465_v22 }
 0xcb3   :  { %5824 = vmatprep.subr.bf16.mxu0 %v7468_v46  ;;  %5850 = vmatprep.subr.bf16.mxu1 %v8192_v44 }
 0xcb6   :  { %5826 = vmatpush1.bf16.msra.mxu0 %v7471_v37  ;;  %5852 = vmatpush3.bf16.msra.mxu1 %v7473_v45 }
 0xcb7   :  { %5828 = vmatprep.subr.bf16.mxu0 %v7477_v60  ;;  %5853 = vmatprep.subr.bf16.mxu1 %v8192_v44 }
 0xcba   :  { %5830 = vmatpush1.bf16.msra.mxu0 %v7480_v4  ;;  %5855 = vmatpush3.bf16.msra.mxu1 %v7484_v3 }
 0xcbb   :  { %5832 = vmatprep.subr.bf16.mxu0 %v7486_v19  ;;  %5856 = vmatprep.subr.bf16.mxu1 %v8192_v44 }
 0xcbe   :  { %5834 = vmatpush1.bf16.msra.mxu0 %v7490_v20  ;;  %5858 = vmatpush3.bf16.msra.mxu1 %v7494_v27 }
 0xcbf   :  { %5860 = vmatprep.subr.bf16.mxu0 %v7420_v56  ;;  %5891 = vmatprep.subr.bf16.mxu1 %v8192_v44 }
 0xd74   :  { %v2901_v41 = vpop.f32.mrb[8].mxu0  ;;  %v2972_v57 = vpop.f32.mrb[56].mxu1 }
 0xd75   :  { %v6043_v1 = vadd.f32 %v2901_v41, %v7551_v17  ;;  %v2903_v9 = vpop.f32.mrb[9].mxu0  ;;  %v4841_v2 = vpop.f32.mrb[57].mxu1  ;;  %v2990_v51 = vadd.f32 %v7561_v21, %v2972_v57 }
 0xd76   :  { %v6044_v8 = vadd.f32 %v2903_v9, %v7554_v15 }
 0xd77   :  { %v3971_v40 = vmul.f32 -1.442695, %v6043_v1 }
 0xd78   :  { %v3972_v53 = vmul.f32 -1.442695, %v6044_v8 }
 0xd79   :  { %6201 = vpow2.f32 %v3971_v40 }
 0xd7a   :  { %6203 = vpow2.f32 %v3972_v53 }
 0xd83   :  { %v6202_v23 = vpop.eup %6201 }
 0xd84   :  { %v2980_v31 = vadd.f32 1.0, %v6202_v23  ;;  %v6204_v25 = vpop.eup %6203  ;;  %v8201_v23 = vld [vmem:[#allocation17_spill] sm:$0xff] }
 0xd85   :  { %v2987_v14 = vadd.f32 1.0, %v6204_v25 }
 0xd86   :  { %6205 = vrcp.f32 %v2980_v31 }
 0xd87   :  { %6207 = vrcp.f32 %v2987_v14 }
 0xd90   :  { %v6206_v0 = vpop.eup %6205 }
 0xd91   :  { %v2991_v30 = vmul.f32 %v6206_v0, %v2990_v51  ;;  %v6208_v54 = vpop.eup %6207 }
 0xd92   :  { %v2994_v50 = vsub.f32 1.0, %v6208_v54  ;;  %v2996_v48 = vmul.f32 %v6208_v54, %v7698_v33  ;;  %v3523_v54 = vld [vmem:[%s8170_s11 + $0x28] sm:$0xff] }
 0xd93   :  { %v2992_v49 = vadd.f32 %v2991_v30, %v8200_v34 }
 0xd95   :  { %6209 = vtanh.f32 %v2992_v49 }
 0xd9f   :  { %v6210_v26 = vpop.eup %6209 }
 0xda0   :  { %v2995_v12 = vmul.f32 %v6210_v26, %v2994_v50  ;;  %v3525_v50 = vld [vmem:[%s8170_s11 + $0x38] sm:$0xff] }
 0xda2   :  { %v7742_v59 = vadd.f32 %v2996_v48, %v2995_v12 }
 0xda4   :  { %3070 = vmatmul.mubr.f32.vlgmr.msra.gmra.mrb[10].mxu0 %v7742_v59  ;;  %4875 = vmatmul.mubr.f32.vlgmr.msra.gmra.mrb[58].mxu1 %v7742_v59 }
 0xda5   :  { %5862 = vmatpush1.bf16.msra.mxu0 %v7422_v36  ;;  %5893 = vmatpush3.bf16.msra.mxu1 %v7425_v35 }
 0xda6   :  { %5864 = vmatprep.subr.bf16.mxu0 %v7429_v42  ;;  %5894 = vmatprep.subr.bf16.mxu1 %v8192_v44 }
 0xda7   :  { %3239 = vmatprep.mubr.f32.mxu0 %v8193_v5  ;;  %4909 = vmatprep.mubr.msk.f32.mxu1 %vm6344_vm0, %v8193_v5 }
 0xda9   :  { %5866 = vmatpush1.bf16.msra.mxu0 %v7432_v16  ;;  %5896 = vmatpush3.bf16.msra.mxu1 %v7435_v32 }
 0xdaa   :  { %5868 = vmatprep.subr.bf16.mxu0 %v7439_v43  ;;  %5897 = vmatprep.subr.bf16.mxu1 %v8192_v44 }
 0xdad   :  { %5870 = vmatpush1.bf16.msra.mxu0 %v7442_v61  ;;  %5899 = vmatpush3.bf16.msra.mxu1 %v7445_v38 }
 0xdae   :  { %5872 = vmatprep.subr.bf16.mxu0 %v7449_v13  ;;  %5900 = vmatprep.subr.bf16.mxu1 %v8192_v44 }
 0xdb1   :  { %5874 = vmatpush1.bf16.msra.mxu0 %v7452_v6  ;;  %5902 = vmatpush3.bf16.msra.mxu1 %v7455_v47 }
 0xdb2   :  { %5876 = vmatprep.subr.bf16.mxu0 %v7459_v52  ;;  %5903 = vmatprep.subr.bf16.mxu1 %v8192_v44 }
 0xdb5   :  { %5878 = vmatpush1.bf16.msra.mxu0 %v7462_v11  ;;  %5905 = vmatpush3.bf16.msra.mxu1 %v7465_v22 }
 0xdb6   :  { %5880 = vmatprep.subr.bf16.mxu0 %v7468_v46  ;;  %5906 = vmatprep.subr.bf16.mxu1 %v8192_v44 }
 0xdb9   :  { %5882 = vmatpush1.bf16.msra.mxu0 %v7471_v37  ;;  %5908 = vmatpush3.bf16.msra.mxu1 %v7473_v45 }
 0xdba   :  { %5884 = vmatprep.subr.bf16.mxu0 %v7477_v60  ;;  %5909 = vmatprep.subr.bf16.mxu1 %v8192_v44 }
 0xdbd   :  { %5886 = vmatpush1.bf16.msra.mxu0 %v7480_v4  ;;  %5911 = vmatpush3.bf16.msra.mxu1 %v7484_v3 }
 0xdbe   :  { %5888 = vmatprep.subr.bf16.mxu0 %v7486_v19  ;;  %5912 = vmatprep.subr.bf16.mxu1 %v8192_v44 }
 0xdc1   :  { %5890 = vmatpush1.bf16.msra.mxu0 %v7490_v20  ;;  %5914 = vmatpush3.bf16.msra.mxu1 %v7494_v27 }
 0xdc2   :  { %5916 = vmatprep.subr.bf16.mxu0 %v7420_v56  ;;  %5947 = vmatprep.subr.bf16.mxu1 %v8192_v44 }
 0xe77   :  { %v3071_v63 = vpop.f32.mrb[10].mxu0  ;;  %v3142_v10 = vpop.f32.mrb[58].mxu1 }
 0xe78   :  { %v6045_v62 = vadd.f32 %v3071_v63, %v7551_v17  ;;  %v3073_v18 = vpop.f32.mrb[11].mxu0  ;;  %v4876_v29 = vpop.f32.mrb[59].mxu1  ;;  %v3160_v56 = vadd.f32 %v7561_v21, %v3142_v10  ;;  %v5975_v10 = vpack.c.bf16 %v3525_v50, %v3523_v54 }
 0xe79   :  { %v6046_v41 = vadd.f32 %v3073_v18, %v7554_v15  ;;  %v3524_v18 = vld [vmem:[%s8170_s11 + $0x30] sm:$0xff]  ;;  %v3527_v29 = vld [vmem:[%s8170_s11 + $0x48] sm:$0xff] }
 0xe7a   :  { %v3973_v55 = vmul.f32 -1.442695, %v6045_v62  ;;  %v3522_v62 = vld [vmem:[%s8170_s11 + $0x20] sm:$0xff] }
 0xe7b   :  { %v3974_v57 = vmul.f32 -1.442695, %v6046_v41  ;;  %v5977_v41 = vpack.c.bf16 %v3524_v18, %v3522_v62 }
 0xe7c   :  { %6211 = vpow2.f32 %v3973_v55  ;;  %v3529_v55 = vld [vmem:[%s8170_s11 + $0x58] sm:$0xff] }
 0xe7d   :  { %6213 = vpow2.f32 %v3974_v57  ;;  %v5979_v57 = vpack.c.bf16 %v3529_v55, %v3527_v29 }
 0xe86   :  { %v6212_v1 = vpop.eup %6211 }
 0xe87   :  { %v3150_v9 = vadd.f32 1.0, %v6212_v1  ;;  %v6214_v2 = vpop.eup %6213  ;;  %v3526_v1 = vld [vmem:[%s8170_s11 + $0x40] sm:$0xff] }
 0xe88   :  { %v3157_v40 = vadd.f32 1.0, %v6214_v2  ;;  %v3531_v2 = vld [vmem:[%s8170_s11 + $0x68] sm:$0xff] }
 0xe89   :  { %6215 = vrcp.f32 %v3150_v9  ;;  %v3528_v9 = vld [vmem:[%s8170_s11 + $0x50] sm:$0xff] }
 0xe8a   :  { %6217 = vrcp.f32 %v3157_v40  ;;  %v3533_v40 = vld [vmem:[%s8170_s11 + $0x78] sm:$0xff] }
 0xe93   :  { %v6216_v8 = vpop.eup %6215 }
 0xe94   :  { %v3161_v53 = vmul.f32 %v6216_v8, %v3160_v56  ;;  %v6218_v25 = vpop.eup %6217  ;;  %v5981_v56 = vpack.c.bf16 %v3528_v9, %v3526_v1  ;;  %v5983_v8 = vpack.c.bf16 %v3533_v40, %v3531_v2 }
 0xe95   :  { %v3164_v14 = vsub.f32 1.0, %v6218_v25  ;;  %v3166_v30 = vmul.f32 %v6218_v25, %v7742_v59  ;;  %v3537_v25 = vld [vmem:[%s8170_s11 + $0x98] sm:$0xff] }
 0xe96   :  { %v3162_v31 = vadd.f32 %v3161_v53, %v8201_v23  ;;  %v3530_v53 = vld [vmem:[%s8170_s11 + $0x60] sm:$0xff]  ;;  %v3532_v23 = vld [vmem:[%s8170_s11 + $0x70] sm:$0xff] }
 0xe98   :  { %6219 = vtanh.f32 %v3162_v31  ;;  %v3535_v31 = vld [vmem:[%s8170_s11 + $0x88] sm:$0xff] }
 0xea2   :  { %v6220_v51 = vpop.eup %6219 }
 0xea3   :  { %v3165_v0 = vmul.f32 %v6220_v51, %v3164_v14  ;;  %v5985_v14 = vpack.c.bf16 %v3532_v23, %v3530_v53  ;;  %v5987_v51 = vpack.c.bf16 %v3537_v25, %v3535_v31 }
 0xea5   :  { %v7786_v34 = vadd.f32 %v3166_v30, %v3165_v0  ;;  %v3534_v0 = vld [vmem:[%s8170_s11 + $0x80] sm:$0xff]  ;;  %v3536_v30 = vld [vmem:[%s8170_s11 + $0x90] sm:$0xff] }
 0xea7   :  { %3240 = vmatmul.mubr.f32.vlgmr.msra.gmra.mrb[12].mxu0 %v7786_v34  ;;  %4910 = vmatmul.mubr.f32.vlgmr.msra.gmra.mrb[60].mxu1 %v7786_v34 }
 0xea8   :  { %5918 = vmatpush1.bf16.msra.mxu0 %v7422_v36  ;;  %5949 = vmatpush3.bf16.msra.mxu1 %v7425_v35  ;;  %v3519_v36 = vld [vmem:[%s8170_s11 + $0x8] sm:$0xff]  ;;  %v3521_v35 = vld [vmem:[%s8170_s11 + $0x18] sm:$0xff] }
 0xea9   :  { %5920 = vmatprep.subr.bf16.mxu0 %v7429_v42  ;;  %5950 = vmatprep.subr.bf16.mxu1 %v8192_v44  ;;  %v5971_v42 = vpack.c.bf16 %v3521_v35, %v3519_v36  ;;  %v3539_v36 = vld [vmem:[%s8170_s11 + $0xa8] sm:$0xff]  ;;  %v3541_v35 = vld [vmem:[%s8170_s11 + $0xb8] sm:$0xff] }
 0xeaa   :  { %3409 = vmatprep.mubr.f32.mxu0 %v8193_v5  ;;  %4944 = vmatprep.mubr.msk.f32.mxu1 %vm6344_vm0, %v8193_v5 }
 0xeac   :  { %5922 = vmatpush1.bf16.msra.mxu0 %v7432_v16  ;;  %5952 = vmatpush3.bf16.msra.mxu1 %v7435_v32 }
 0xead   :  { %5924 = vmatprep.subr.bf16.mxu0 %v7439_v43  ;;  %5953 = vmatprep.subr.bf16.mxu1 %v8192_v44 }
 0xeb0   :  { %5926 = vmatpush1.bf16.msra.mxu0 %v7442_v61  ;;  %5955 = vmatpush3.bf16.msra.mxu1 %v7445_v38 }
 0xeb1   :  { %5928 = vmatprep.subr.bf16.mxu0 %v7449_v13  ;;  %5956 = vmatprep.subr.bf16.mxu1 %v8192_v44 }
 0xeb4   :  { %5930 = vmatpush1.bf16.msra.mxu0 %v7452_v6  ;;  %5958 = vmatpush3.bf16.msra.mxu1 %v7455_v47 }
 0xeb5   :  { %5932 = vmatprep.subr.bf16.mxu0 %v7459_v52  ;;  %5959 = vmatprep.subr.bf16.mxu1 %v8192_v44 }
 0xeb8   :  { %5934 = vmatpush1.bf16.msra.mxu0 %v7462_v11  ;;  %5961 = vmatpush3.bf16.msra.mxu1 %v7465_v22 }
 0xeb9   :  { %5936 = vmatprep.subr.bf16.mxu0 %v7468_v46  ;;  %5962 = vmatprep.subr.bf16.mxu1 %v8192_v44 }
 0xebc   :  { %5938 = vmatpush1.bf16.msra.mxu0 %v7471_v37  ;;  %5964 = vmatpush3.bf16.msra.mxu1 %v7473_v45 }
 0xebd   :  { %5940 = vmatprep.subr.bf16.mxu0 %v7477_v60  ;;  %5965 = vmatprep.subr.bf16.mxu1 %v8192_v44  ;;  %v8202_v60 = vld [vmem:[#allocation20_spill] sm:$0xff] }
 0xec0   :  { %5942 = vmatpush1.bf16.msra.mxu0 %v7480_v4  ;;  %5967 = vmatpush3.bf16.msra.mxu1 %v7484_v3 }
 0xec1   :  { %5944 = vmatprep.subr.bf16.mxu0 %v7486_v19  ;;  %5968 = vmatprep.subr.bf16.mxu1 %v8192_v44 }
 0xec4   :  { %5946 = vmatpush1.bf16.msra.mxu0 %v7490_v20  ;;  %5970 = vmatpush3.bf16.msra.mxu1 %v7494_v27  ;;  %v3518_v20 = vld [vmem:[%s8170_s11] sm:$0xff]  ;;  %v3520_v27 = vld [vmem:[%s8170_s11 + $0x10] sm:$0xff] }
 0xec5   :  { %5972 = vmatprep.subr.bf16.mxu0 %v5971_v42  ;;  %v5973_v48 = vpack.c.bf16 %v3520_v27, %v3518_v20  ;;  %v5989_v42 = vpack.c.bf16 %v3536_v30, %v3534_v0 }
 0xf7a   :  { %v3241_v16 = vpop.f32.mrb[12].mxu0  ;;  %v3312_v32 = vpop.f32.mrb[60].mxu1 }
 0xf7b   :  { %v6047_v43 = vadd.f32 %v3241_v16, %v7551_v17  ;;  %v3243_v61 = vpop.f32.mrb[13].mxu0  ;;  %v4911_v44 = vpop.f32.mrb[61].mxu1  ;;  %v3330_v46 = vadd.f32 %v7561_v21, %v3312_v32  ;;  %v5991_v16 = vpack.c.bf16 %v3541_v35, %v3539_v36  ;;  %v3538_v32 = vld [vmem:[%s8170_s11 + $0xa0] sm:$0xff] }
 0xf7c   :  { %v6048_v13 = vadd.f32 %v3243_v61, %v7554_v15  ;;  %v3543_v61 = vld [vmem:[%s8170_s11 + $0xc8] sm:$0xff]  ;;  %v3545_v44 = vld [vmem:[%s8170_s11 + $0xd8] sm:$0xff] }
 0xf7d   :  { %v3975_v38 = vmul.f32 -1.442695, %v6047_v43  ;;  %v3540_v43 = vld [vmem:[%s8170_s11 + $0xb0] sm:$0xff] }
 0xf7e   :  { %v3976_v6 = vmul.f32 -1.442695, %v6048_v13  ;;  %v5995_v13 = vpack.c.bf16 %v3545_v44, %v3543_v61 }
 0xf7f   :  { %6221 = vpow2.f32 %v3975_v38  ;;  %v5993_v38 = vpack.c.bf16 %v3540_v43, %v3538_v32 }
 0xf80   :  { %6223 = vpow2.f32 %v3976_v6  ;;  %v3542_v6 = vld [vmem:[%s8170_s11 + $0xc0] sm:$0xff] }
 0xf89   :  { %v6222_v47 = vpop.eup %6221 }
 0xf8a   :  { %v3320_v52 = vadd.f32 1.0, %v6222_v47  ;;  %v6224_v11 = vpop.eup %6223  ;;  %v3544_v47 = vld [vmem:[%s8170_s11 + $0xd0] sm:$0xff] }
 0xf8b   :  { %v3327_v22 = vadd.f32 1.0, %v6224_v11  ;;  %v3549_v11 = vld [vmem:[%s8170_s11 + $0xf8] sm:$0xff] }
 0xf8c   :  { %6225 = vrcp.f32 %v3320_v52  ;;  %v3547_v52 = vld [vmem:[%s8170_s11 + $0xe8] sm:$0xff] }
 0xf8d   :  { %6227 = vrcp.f32 %v3327_v22  ;;  %v5997_v22 = vpack.c.bf16 %v3544_v47, %v3542_v6 }
 0xf96   :  { %v6226_v37 = vpop.eup %6225 }
 0xf97   :  { %v3331_v45 = vmul.f32 %v6226_v37, %v3330_v46  ;;  %v6228_v3 = vpop.eup %6227  ;;  %v5999_v46 = vpack.c.bf16 %v3549_v11, %v3547_v52  ;;  %v3546_v37 = vld [vmem:[%s8170_s11 + $0xe0] sm:$0xff] }
 0xf98   :  { %v3334_v19 = vsub.f32 1.0, %v6228_v3  ;;  %v3336_v12 = vmul.f32 %v6228_v3, %v7786_v34 }
 0xf99   :  { %v3332_v4 = vadd.f32 %v3331_v45, %v8202_v60  ;;  %v3548_v45 = vld [vmem:[%s8170_s11 + $0xf0] sm:$0xff] }
 0xf9a   :  { %v6001_v60 = vpack.c.bf16 %v3548_v45, %v3546_v37  ;;  %v6345_v37 = vmov 0  }
 0xf9b   :  { %6229 = vtanh.f32 %v3332_v4  ;;  %6079 = vset.pattern.permute.xlu0 %v6345_v37  ;;  %6080 = vset.pattern.permute.xlu1 %v6345_v37 }
 0xfa5   :  { %v6230_v49 = vpop.eup %6229 }
 0xfa6   :  { %v3335_v26 = vmul.f32 %v6230_v49, %v3334_v19 }
 0xfa8   :  { %v7846_v63 = vadd.f32 %v3336_v12, %v3335_v26  ;;  %v8203_v12 = vld [vmem:[#allocation19_spill] sm:$0xff] }
 0xfaa   :  { %3410 = vmatmul.mubr.f32.vlgmr.msra.gmra.mrb[14].mxu0 %v7846_v63  ;;  %4945 = vmatmul.mubr.f32.vlgmr.msra.gmra.mrb[62].mxu1 %v7846_v63 }
 0xfab   :  { %5974 = vmatpush1.bf16.msra.mxu0 %v5973_v48  ;;  %3626 = vmatprep.mubr.f32.mxu0 %v8193_v5 }
 0xfac   :  { %5976 = vmatprep.subr.bf16.mxu0 %v5975_v10 }
 0xfaf   :  { %5978 = vmatpush1.bf16.msra.mxu0 %v5977_v41 }
 0xfb0   :  { %5980 = vmatprep.subr.bf16.mxu0 %v5979_v57 }
 0xfb3   :  { %5982 = vmatpush1.bf16.msra.mxu0 %v5981_v56 }
 0xfb4   :  { %5984 = vmatprep.subr.bf16.mxu0 %v5983_v8 }
 0xfb7   :  { %5986 = vmatpush1.bf16.msra.mxu0 %v5985_v14 }
 0xfb8   :  { %5988 = vmatprep.subr.bf16.mxu0 %v5987_v51 }
 0xfbb   :  { %5990 = vmatpush1.bf16.msra.mxu0 %v5989_v42 }
 0xfbc   :  { %5992 = vmatprep.subr.bf16.mxu0 %v5991_v16 }
 0xfbf   :  { %5994 = vmatpush1.bf16.msra.mxu0 %v5993_v38 }
 0xfc0   :  { %5996 = vmatprep.subr.bf16.mxu0 %v5995_v13 }
 0xfc3   :  { %5998 = vmatpush1.bf16.msra.mxu0 %v5997_v22 }
 0xfc4   :  { %6000 = vmatprep.subr.bf16.mxu0 %v5999_v46 }
 0xfc7   :  { %6002 = vmatpush1.bf16.msra.mxu0 %v6001_v60 }
 0xfca   :  { %3627 = vmatmul.mubr.f32.vlgmr.msra.gmra.mrb[32].mxu0 %v7566_v7 }
 0xfcb   :  { %3632 = vmatprep.mubr.f32.mxu0 %v8193_v5 }
 0xfce   :  { %3633 = vmatmul.mubr.f32.gmra.mrb[34].mxu0 %v7610_v39 }
 0xfcf   :  { %3638 = vmatprep.mubr.f32.mxu0 %v8193_v5 }
 0xfd2   :  { %3639 = vmatmul.mubr.f32.gmra.mrb[36].mxu0 %v7654_v24 }
 0xfd3   :  { %3644 = vmatprep.mubr.f32.mxu0 %v8193_v5 }
 0xfd6   :  { %3645 = vmatmul.mubr.f32.gmra.mrb[38].mxu0 %v7698_v33 }
 0xfd7   :  { %3650 = vmatprep.mubr.f32.mxu0 %v8193_v5 }
 0xfda   :  { %3651 = vmatmul.mubr.f32.gmra.mrb[40].mxu0 %v7742_v59 }
 0xfdb   :  { %3656 = vmatprep.mubr.f32.mxu0 %v8193_v5 }
 0xfde   :  { %3657 = vmatmul.mubr.f32.gmra.mrb[42].mxu0 %v7786_v34 }
 0xfdf   :  { %3662 = vmatprep.mubr.f32.mxu0 %v8193_v5 }
 0xfe2   :  { %3663 = vmatmul.mubr.f32.gmra.mrb[44].mxu0 %v7846_v63 }
 0xfe3   :  { %3668 = vmatprep.mubr.f32.mxu0 %v8193_v5  ;;  %v3550_v5 = vld [vmem:[%s8171_s12] sm:$0x3] }
 0xfe4   :  { %v7950_v26 = vrot.slane %v3550_v5, %v8195_v58 }
0x107d   :  { %v3411_v7 = vpop.f32.mrb[14].mxu0  ;;  %v3482_v39 = vpop.f32.mrb[62].mxu1 }
0x107e   :  { %v6049_v24 = vadd.f32 %v3411_v7, %v7551_v17  ;;  %v3413_v4 = vpop.f32.mrb[15].mxu0  ;;  %v4946_v33 = vpop.f32.mrb[63].mxu1  ;;  %v3500_v54 = vadd.f32 %v7561_v21, %v3482_v39 }
0x107f   :  { %v6050_v19 = vadd.f32 %v3413_v4, %v7554_v15  ;;  %v7953_v15 = vrot.slane %v3550_v5, %v8196_v28 }
0x1080   :  { %v3977_v3 = vmul.f32 -1.442695, %v6049_v24 }
0x1081   :  { %v3978_v59 = vmul.f32 -1.442695, %v6050_v19 }
0x1082   :  { %6231 = vpow2.f32 %v3977_v3 }
0x1083   :  { %6233 = vpow2.f32 %v3978_v59 }
0x108c   :  { %v6232_v20 = vpop.eup %6231 }
0x108d   :  { %v3490_v34 = vadd.f32 1.0, %v6232_v20  ;;  %v6234_v27 = vpop.eup %6233 }
0x108e   :  { %v3497_v49 = vadd.f32 1.0, %v6234_v27 }
0x108f   :  { %6235 = vrcp.f32 %v3490_v34 }
0x1090   :  { %6237 = vrcp.f32 %v3497_v49 }
0x1099   :  { %v6236_v17 = vpop.eup %6235 }
0x109a   :  { %v3501_v50 = vmul.f32 %v6236_v17, %v3500_v54  ;;  %v6238_v57 = vpop.eup %6237 }
0x109b   :  { %v3504_v8 = vsub.f32 1.0, %v6238_v57  ;;  %v3506_v14 = vmul.f32 %v6238_v57, %v7846_v63 }
0x109c   :  { %v3502_v48 = vadd.f32 %v3501_v50, %v8203_v12  ;;  %v3798_v50 = vld [vmem:[%s8161_s2] sm:$0xff] }
0x109d   :  { %v3628_v10 = vpop.f32.mrb[32].mxu0 }
0x109e   :  { %6239 = vtanh.f32 %v3502_v48  ;;  %v7957_v62 = vadd.f32 %v3628_v10, %v7950_v26  ;;  %v3630_v18 = vpop.f32.mrb[33].mxu0 }
0x109f   :  { %v7960_v29 = vadd.f32 %v3630_v18, %v7953_v15 }
0x10a1   :  { %v3634_v21 = vpop.f32.mrb[34].mxu0  ;;  %v3675_v55 = vmax.f32 %v7957_v62, %v7960_v29 }
0x10a2   :  { %v7965_v58 = vadd.f32 %v3634_v21, %v7950_v26  ;;  %v3636_v28 = vpop.f32.mrb[35].mxu0 }
0x10a3   :  { %v7968_v41 = vadd.f32 %v3636_v28, %v7953_v15  ;;  %3676 = vmax.xlane.f32.xlu0 %v3675_v55 }
0x10a5   :  { %v3640_v1 = vpop.f32.mrb[36].mxu0  ;;  %v3678_v9 = vmax.f32 %v7965_v58, %v7968_v41 }
0x10a6   :  { %v7973_v2 = vadd.f32 %v3640_v1, %v7950_v26  ;;  %v3642_v40 = vpop.f32.mrb[37].mxu0 }
0x10a7   :  { %v7976_v56 = vadd.f32 %v3642_v40, %v7953_v15  ;;  %3679 = vmax.xlane.f32.xlu0 %v3678_v9 }
0x10a8   :  { %v6240_v53 = vpop.eup %6239 }
0x10a9   :  { %v3646_v23 = vpop.f32.mrb[38].mxu0  ;;  %v3681_v31 = vmax.f32 %v7973_v2, %v7976_v56  ;;  %v3505_v25 = vmul.f32 %v6240_v53, %v3504_v8 }
0x10aa   :  { %v7982_v51 = vadd.f32 %v3646_v23, %v7950_v26  ;;  %v3648_v0 = vpop.f32.mrb[39].mxu0 }
0x10ab   :  { %v7985_v30 = vadd.f32 %v3648_v0, %v7953_v15  ;;  %3682 = vmax.xlane.f32.xlu1 %v3681_v31  ;;  %v3507_v36 = vadd.f32 %v3506_v14, %v3505_v25 }
0x10ad   :  { %v3652_v35 = vpop.f32.mrb[40].mxu0  ;;  %3669 = vmatmul.mubr.f32.gmra.mrb[46].mxu0 %v3507_v36  ;;  %v3684_v42 = vmax.f32 %v7982_v51, %v7985_v30 }
0x10ae   :  { %v7990_v16 = vadd.f32 %v3652_v35, %v7950_v26  ;;  %v3654_v32 = vpop.f32.mrb[41].mxu0 }
0x10af   :  { %v7993_v63 = vadd.f32 %v3654_v32, %v7953_v15  ;;  %3685 = vmax.xlane.f32.xlu1 %v3684_v42 }
0x10b1   :  { %v3658_v43 = vpop.f32.mrb[42].mxu0  ;;  %v3687_v61 = vmax.f32 %v7990_v16, %v7993_v63 }
0x10b2   :  { %v7998_v44 = vadd.f32 %v3658_v43, %v7950_v26  ;;  %v3660_v38 = vpop.f32.mrb[43].mxu0 }
0x10b3   :  { %v8001_v13 = vadd.f32 %v3660_v38, %v7953_v15  ;;  %3688 = vmax.xlane.f32.xlu0 %v3687_v61 }
0x10b5   :  { %v3664_v6 = vpop.f32.mrb[44].mxu0  ;;  %v3690_v47 = vmax.f32 %v7998_v44, %v8001_v13 }
0x10b6   :  { %v8006_v52 = vadd.f32 %v3664_v6, %v7950_v26  ;;  %v3666_v11 = vpop.f32.mrb[45].mxu0 }
0x10b7   :  { %v8009_v22 = vadd.f32 %v3666_v11, %v7953_v15  ;;  %3691 = vmax.xlane.f32.xlu1 %v3690_v47 }
0x10b9   :  { %v3693_v46 = vmax.f32 %v8006_v52, %v8009_v22 }
0x10bb   :  { %3694 = vmax.xlane.f32.xlu0 %v3693_v46 }
0x1130   :  { %v8013_v45 = vpop.xlane.xlu0 %3676 }
0x1131   :  { %v3699_v60 = vsub.f32 %v7957_v62, %v8013_v45  ;;  %v3700_v7 = vsub.f32 %v7960_v29, %v8013_v45 }
0x1133   :  { %v3715_v39 = vmul.f32 1.442695, %v3699_v60  ;;  %v3717_v24 = vmul.f32 1.442695, %v3700_v7 }
0x1134   :  { %v8025_v17 = vpop.xlane.xlu0 %3679 }
0x1135   :  { %6241 = vpow2.f32 %v3715_v39  ;;  %v3701_v28 = vsub.f32 %v7965_v58, %v8025_v17  ;;  %v3702_v57 = vsub.f32 %v7968_v41, %v8025_v17 }
0x1136   :  { %6243 = vpow2.f32 %v3717_v24 }
0x1137   :  { %v3719_v9 = vmul.f32 1.442695, %v3701_v28  ;;  %v3721_v8 = vmul.f32 1.442695, %v3702_v57 }
0x1138   :  { %v8019_v4 = vpop.xlane.xlu1 %3682 }
0x1139   :  { %v3703_v33 = vsub.f32 %v7973_v2, %v8019_v4  ;;  %v3704_v3 = vsub.f32 %v7976_v56, %v8019_v4 }
0x113b   :  { %v3723_v19 = vmul.f32 1.442695, %v3703_v33  ;;  %v3725_v59 = vmul.f32 1.442695, %v3704_v3 }
0x113c   :  { %v8042_v1 = vpop.xlane.xlu1 %3685 }
0x113d   :  { %6245 = vpow2.f32 %v3723_v19  ;;  %v3705_v40 = vsub.f32 %v7982_v51, %v8042_v1  ;;  %v3706_v53 = vsub.f32 %v7985_v30, %v8042_v1 }
0x113e   :  { %6247 = vpow2.f32 %v3725_v59 }
0x113f   :  { %v6242_v20 = vpop.eup %6241  ;;  %v3727_v31 = vmul.f32 1.442695, %v3705_v40  ;;  %v3729_v0 = vmul.f32 1.442695, %v3706_v53 }
0x1140   :  { %v6244_v34 = vpop.eup %6243  ;;  %v8030_v12 = vpop.xlane.xlu0 %3688 }
0x1141   :  { %v3747_v27 = vadd.f32 %v6244_v34, %v6242_v20  ;;  %v3707_v25 = vsub.f32 %v7990_v16, %v8030_v12  ;;  %v3708_v36 = vsub.f32 %v7993_v63, %v8030_v12 }
0x1143   :  { %3748 = vadd.xlane.f32.xlu0 %v3747_v27  ;;  %v3731_v42 = vmul.f32 1.442695, %v3707_v25  ;;  %v3733_v61 = vmul.f32 1.442695, %v3708_v36 }
0x1144   :  { %v8052_v35 = vpop.xlane.xlu1 %3691 }
0x1145   :  { %v3709_v32 = vsub.f32 %v7998_v44, %v8052_v35  ;;  %v3710_v38 = vsub.f32 %v8001_v13, %v8052_v35 }
0x1147   :  { %v6246_v49 = vpop.eup %6245  ;;  %v3735_v46 = vmul.f32 1.442695, %v3709_v32  ;;  %v3737_v60 = vmul.f32 1.442695, %v3710_v38 }
0x1148   :  { %v6248_v5 = vpop.eup %6247  ;;  %v8032_v48 = vpop.xlane.xlu0 %3694 }
0x1149   :  { %v3753_v54 = vadd.f32 %v6248_v5, %v6246_v49  ;;  %v3711_v10 = vsub.f32 %v8006_v52, %v8032_v48  ;;  %v3712_v18 = vsub.f32 %v8009_v22, %v8032_v48  ;;  %v3801_v49 = vld [vmem:[%s8161_s2 + $0x18] sm:$0xff] }
0x114b   :  { %3754 = vadd.xlane.f32.xlu0 %v3753_v54  ;;  %v3739_v21 = vmul.f32 1.442695, %v3711_v10  ;;  %v3741_v55 = vmul.f32 1.442695, %v3712_v18  ;;  %v3802_v54 = vld [vmem:[%s8161_s2 + $0x20] sm:$0xff]  ;;  %v3804_v10 = vld [vmem:[%s8161_s2 + $0x30] sm:$0xff] }
0x114c   :  { %v3805_v18 = vld [vmem:[%s8161_s2 + $0x38] sm:$0xff] }
0x114d   :  { %6249 = vpow2.f32 %v3739_v21  ;;  %v3799_v21 = vld [vmem:[%s8161_s2 + $0x8] sm:$0xff] }
0x114e   :  { %6251 = vpow2.f32 %v3741_v55  ;;  %v3800_v55 = vld [vmem:[%s8161_s2 + $0x10] sm:$0xff] }
0x114f   :  { %6253 = vpow2.f32 %v3719_v9 }
0x1150   :  { %6255 = vpow2.f32 %v3721_v8 }
0x1151   :  { %6257 = vpow2.f32 %v3727_v31 }
0x1152   :  { %6259 = vpow2.f32 %v3729_v0 }
0x1153   :  { %6261 = vpow2.f32 %v3731_v42 }
0x1154   :  { %6263 = vpow2.f32 %v3733_v61 }
0x1155   :  { %6265 = vpow2.f32 %v3735_v46 }
0x1156   :  { %6267 = vpow2.f32 %v3737_v60 }
0x1157   :  { %v6250_v23 = vpop.eup %6249 }
0x1158   :  { %v6252_v14 = vpop.eup %6251 }
0x1159   :  { %v3765_v43 = vadd.f32 %v6252_v14, %v6250_v23  ;;  %v6254_v7 = vpop.eup %6253  ;;  %v8204_v14 = vlaneseq }
0x115a   :  { %v6256_v24 = vpop.eup %6255 }
0x115b   :  { %v6258_v33 = vpop.eup %6257  ;;  %v3750_v3 = vadd.f32 %v6256_v24, %v6254_v7  ;;  %v8094_v0 = vand.u32 127, %v8204_v14 }
0x1161   :  { %3807 = vperm.xlu0 %6079, %v3798_v50   ;;  %v3803_v50 = vld [vmem:[%s8161_s2 + $0x28] sm:$0xff] }
0x1180   :  { %3766 = vadd.xlane.f32.xlu0 %v3765_v43  ;;  %v3670_v6 = vpop.f32.mrb[46].mxu0  ;;  %v8097_v43 = vadd.s32 128, %v8094_v0 }
0x1181   :  { %v8059_v47 = vadd.f32 %v3670_v6, %v7950_v26  ;;  %v3672_v11 = vpop.f32.mrb[47].mxu0  ;;  %v6260_v26 = vpop.eup %6259 }
0x1182   :  { %v8062_v37 = vadd.f32 %v3672_v11, %v7953_v15  ;;  %v6262_v19 = vpop.eup %6261  ;;  %v3756_v59 = vadd.f32 %v6260_v26, %v6258_v33 }
0x1183   :  { %v6264_v20 = vpop.eup %6263 }
0x1184   :  { %v3696_v39 = vmax.f32 %v8059_v47, %v8062_v37  ;;  %v6266_v15 = vpop.eup %6265  ;;  %v3759_v34 = vadd.f32 %v6264_v20, %v6262_v19 }
0x1185   :  { %v6268_v27 = vpop.eup %6267 }
0x1186   :  { %3697 = vmax.xlane.f32.xlu1 %v3696_v39  ;;  %v3762_v5 = vadd.f32 %v6268_v27, %v6266_v15 }
0x118a   :  { %3751 = vadd.xlane.f32.xlu1 %v3750_v3 }
0x118e   :  { %3757 = vadd.xlane.f32.xlu1 %v3756_v59 }
0x1192   :  { %3760 = vadd.xlane.f32.xlu1 %v3759_v34 }
0x1196   :  { %3816 = vperm.xlu0 %6079, %v3801_v49   ;;  %3763 = vadd.xlane.f32.xlu1 %v3762_v5 }
0x119a   :  { %3819 = vperm.xlu0 %6079, %v3802_v54  }
0x119e   :  { %3822 = vperm.xlu0 %6079, %v3803_v50  }
0x11a2   :  { %3825 = vperm.xlu0 %6079, %v3804_v10  }
0x11a6   :  { %3828 = vperm.xlu0 %6079, %v3805_v18  }
0x11a7   :  { %3810 = vperm.xlu1 %6080, %v3799_v21  }
0x11ab   :  { %3813 = vperm.xlu1 %6080, %v3800_v55  }
0x11d0   :  { %v3749_v28 = vpop.xlane.xlu0 %3748 }
0x11d1   :  { %6269 = vlog2.f32 %v3749_v28 }
0x11d8   :  { %v3755_v57 = vpop.xlane.xlu0 %3754 }
0x11d9   :  { %6271 = vlog2.f32 %v3755_v57 }
0x11db   :  { %v6270_v32 = vpop.eup %6269 }
0x11dc   :  { %v3772_v6 = vmul.f32 0.6931472, %v6270_v32 }
0x11de   :  { %v3787_v3 = vadd.f32 %v3772_v6, %v8013_v45 }
0x11e0   :  { %v3808_v25 = vpop.permute.xlu0 %3807 }
0x11e1   :  { %vm3830_vm1 = vcmp.eq.s32.totalorder %v8094_v0, %v3808_v25  ;;  %vm3831_vm2 = vcmp.eq.s32.totalorder %v8097_v43, %v3808_v25 }
0x11e2   :  { %v3846_v26 = vsel %vm3830_vm1, %v7957_v62, 0.0  ;;  %v3847_v19 = vsel %vm3831_vm2, %v7960_v29, 0.0  ;;  %v3888_v62 = vsel %vm3887_vm3, %v3787_v3, 0.0  ;;  %vm3914_vm2 = vcmask 0  }
0x11e3   :  { %v6272_v38 = vpop.eup %6271  ;;  %v3862_v5 = vadd.f32 %v3847_v19, %v3846_v26 }
0x11e4   :  { %v3776_v60 = vmul.f32 0.6931472, %v6272_v38 }
0x11e6   :  { %v3789_v15 = vadd.f32 %v3776_v60, %v8019_v4 }
0x11e8   :  { %v3891_v21 = vsel %vm3887_vm3, %v3789_v15, 0.0 }
0x120d   :  { %v3767_v42 = vpop.xlane.xlu0 %3766 }
0x1213   :  { %v8087_v9 = vpop.xlane.xlu1 %3697 }
0x1214   :  { %v3713_v40 = vsub.f32 %v8059_v47, %v8087_v9  ;;  %v3714_v8 = vsub.f32 %v8062_v37, %v8087_v9 }
0x1215   :  { %v3817_v7 = vpop.permute.xlu0 %3816 }
0x1216   :  { %v3743_v53 = vmul.f32 1.442695, %v3713_v40  ;;  %v3745_v23 = vmul.f32 1.442695, %v3714_v8  ;;  %vm3836_vm8 = vcmp.eq.s32.totalorder %v8094_v0, %v3817_v7  ;;  %vm3837_vm9 = vcmp.eq.s32.totalorder %v8097_v43, %v3817_v7 }
0x1217   :  { %v3752_v31 = vpop.xlane.xlu1 %3751 }
0x1218   :  { %6273 = vpow2.f32 %v3743_v53 }
0x1219   :  { %6275 = vpow2.f32 %v3745_v23  ;;  %v3820_v54 = vpop.permute.xlu0 %3819 }
0x121a   :  { %6277 = vlog2.f32 %v3752_v31  ;;  %vm3838_vm10 = vcmp.eq.s32.totalorder %v8094_v0, %v3820_v54  ;;  %vm3839_vm11 = vcmp.eq.s32.totalorder %v8097_v43, %v3820_v54 }
0x121b   :  { %v3758_v36 = vpop.xlane.xlu1 %3757  ;;  %v3854_v7 = vsel %vm3838_vm10, %v7990_v16, 0.0 }
0x121c   :  { %6279 = vlog2.f32 %v3758_v36 }
0x121d   :  { %6281 = vlog2.f32 %v3767_v42  ;;  %v3823_v36 = vpop.permute.xlu0 %3822 }
0x121e   :  { %vm3840_vm12 = vcmp.eq.s32.totalorder %v8094_v0, %v3823_v36  ;;  %vm3841_vm13 = vcmp.eq.s32.totalorder %v8097_v43, %v3823_v36 }
0x121f   :  { %v3761_v61 = vpop.xlane.xlu1 %3760  ;;  %v3856_v3 = vsel %vm3840_vm12, %v7998_v44, 0.0  ;;  %v3857_v19 = vsel %vm3841_vm13, %v8001_v13, 0.0 }
0x1220   :  { %6283 = vlog2.f32 %v3761_v61 }
0x1222   :  { %v6274_v11 = vpop.eup %6273 }
0x1223   :  { %v6276_v46 = vpop.eup %6275  ;;  %v3764_v39 = vpop.xlane.xlu1 %3763 }
0x1224   :  { %v6278_v24 = vpop.eup %6277  ;;  %6285 = vlog2.f32 %v3764_v39  ;;  %v3768_v33 = vadd.f32 %v6276_v46, %v6274_v11  ;;  %v3853_v46 = vsel %vm3837_vm9, %v7985_v30, 0.0 }
0x1225   :  { %v3774_v59 = vmul.f32 0.6931472, %v6278_v24  ;;  %v3826_v24 = vpop.permute.xlu0 %3825 }
0x1226   :  { %v6280_v20 = vpop.eup %6279  ;;  %3769 = vadd.xlane.f32.xlu1 %v3768_v33  ;;  %v3855_v33 = vsel %vm3839_vm11, %v7993_v63, 0.0  ;;  %vm3842_vm14 = vcmp.eq.s32.totalorder %v8094_v0, %v3826_v24  ;;  %vm3843_vm15 = vcmp.eq.s32.totalorder %v8097_v43, %v3826_v24 }
0x1227   :  { %v3788_v34 = vadd.f32 %v3774_v59, %v8025_v17  ;;  %v3778_v27 = vmul.f32 0.6931472, %v6280_v20  ;;  %v3811_v49 = vpop.permute.xlu1 %3810  ;;  %v6282_v45 = vpop.eup %6281  ;;  %v3858_v20 = vsel %vm3842_vm14, %v8006_v52, 0.0  ;;  %v3859_v63 = vsel %vm3843_vm15, %v8009_v22, 0.0 }
0x1228   :  { %vm3832_vm4 = vcmp.eq.s32.totalorder %v8094_v0, %v3811_v49  ;;  %vm3833_vm5 = vcmp.eq.s32.totalorder %v8097_v43, %v3811_v49 }
0x1229   :  { %v3889_v29 = vsel %vm3887_vm3, %v3788_v34, 0.0  ;;  %v3790_v50 = vadd.f32 %v3778_v27, %v8042_v1  ;;  %v3848_v10 = vsel %vm3832_vm4, %v7965_v58, 0.0  ;;  %v3849_v57 = vsel %vm3833_vm5, %v7968_v41, 0.0  ;;  %v3829_v16 = vpop.permute.xlu0 %3828 }
0x122a   :  { %v6284_v4 = vpop.eup %6283  ;;  %v3890_v18 = vadd.f32 %v3889_v29, %v3888_v62  ;;  %v3863_v17 = vadd.f32 %v3862_v5, %v3848_v10  ;;  %v3784_v1 = vmul.f32 0.6931472, %v6282_v45  ;;  %vm3844_vm0 = vcmp.eq.s32.totalorder %v8094_v0, %v3829_v16 }
0x122b   :  { %v3893_v55 = vsel %vm3887_vm3, %v3790_v50, 0.0  ;;  %v3780_v28 = vmul.f32 0.6931472, %v6284_v4  ;;  %v3814_v40 = vpop.permute.xlu1 %3813  ;;  %vm3845_vm1 = vcmp.eq.s32.totalorder %v8097_v43, %v3829_v16  ;;  %v3860_v44 = vsel %vm3844_vm0, %v8059_v47, 0.0 }
0x122c   :  { %v3892_v8 = vadd.f32 %v3891_v21, %v3890_v18  ;;  %v3864_v53 = vadd.f32 %v3863_v17, %v3849_v57  ;;  %vm3834_vm6 = vcmp.eq.s32.totalorder %v8094_v0, %v3814_v40  ;;  %vm3835_vm7 = vcmp.eq.s32.totalorder %v8097_v43, %v3814_v40 }
0x122d   :  { %v3791_v58 = vadd.f32 %v3780_v28, %v8030_v12  ;;  %v3850_v23 = vsel %vm3834_vm6, %v7973_v2, 0.0  ;;  %v3851_v32 = vsel %vm3835_vm7, %v7976_v56, 0.0  ;;  %v3793_v6 = vadd.f32 %v3784_v1, %v8032_v48 }
0x122e   :  { %v6286_v31 = vpop.eup %6285  ;;  %v3894_v25 = vadd.f32 %v3893_v55, %v3892_v8  ;;  %v3865_v14 = vadd.f32 %v3864_v53, %v3850_v23  ;;  %v3852_v12 = vsel %vm3836_vm8, %v7982_v51, 0.0  ;;  %v3861_v49 = vsel %vm3845_vm1, %v8062_v37, 0.0 }
0x122f   :  { %v3895_v41 = vsel %vm3887_vm3, %v3791_v58, 0.0  ;;  %v3782_v42 = vmul.f32 0.6931472, %v6286_v31  ;;  %v3899_v48 = vsel %vm3887_vm3, %v3793_v6, 0.0 }
0x1230   :  { %v3866_v61 = vadd.f32 %v3865_v14, %v3851_v32  ;;  %v3896_v38 = vadd.f32 %v3895_v41, %v3894_v25 }
0x1231   :  { %v3792_v2 = vadd.f32 %v3782_v42, %v8052_v35 }
0x1232   :  { %v3867_v11 = vadd.f32 %v3866_v61, %v3852_v12 }
0x1233   :  { %v3897_v60 = vsel %vm3887_vm3, %v3792_v2, 0.0 }
0x1234   :  { %v3868_v56 = vadd.f32 %v3867_v11, %v3853_v46  ;;  %v3898_v39 = vadd.f32 %v3897_v60, %v3896_v38 }
0x1236   :  { %v3869_v51 = vadd.f32 %v3868_v56, %v3854_v7  ;;  %v3900_v35 = vadd.f32 %v3899_v48, %v3898_v39 }
0x1238   :  { %v3870_v30 = vadd.f32 %v3869_v51, %v3855_v33 }
0x123a   :  { %v3871_v26 = vadd.f32 %v3870_v30, %v3856_v3 }
0x123c   :  { %v3872_v59 = vadd.f32 %v3871_v26, %v3857_v19 }
0x123e   :  { %v3873_v15 = vadd.f32 %v3872_v59, %v3858_v20 }
0x1240   :  { %v3874_v34 = vadd.f32 %v3873_v15, %v3859_v63 }
0x1242   :  { %v3875_v27 = vadd.f32 %v3874_v34, %v3860_v44 }
0x1244   :  { %v3876_v13 = vadd.f32 %v3875_v27, %v3861_v49 }
0x1246   :  { %3877 = vadd.xlane.f32.xlu1 %v3876_v13 }
0x12b3   :  { %v3770_v5 = vpop.xlane.xlu1 %3769 }
0x12b4   :  { %6287 = vlog2.f32 %v3770_v5 }
0x12be   :  { %v6288_v45 = vpop.eup %6287 }
0x12bf   :  { %v3786_v62 = vmul.f32 0.6931472, %v6288_v45 }
0x12c1   :  { %v3794_v52 = vadd.f32 %v3786_v62, %v8087_v9 }
0x12c3   :  { %v3901_v0 = vsel %vm3887_vm3, %v3794_v52, 0.0 }
0x12c4   :  { %v3902_v54 = vadd.f32 %v3901_v0, %v3900_v35 }
0x12c6   :  { %3903 = vadd.xlane.f32.xlu0 %v3902_v54 }
0x12d3   :  { %v3878_v22 = vpop.xlane.xlu1 %3877 }
0x12d4   :  { %v3879_v43 = vrot.slane %v3878_v22, 4 }
0x12d6   :  { %v3880_v29 = vadd.f32 %v3879_v43, %v3878_v22 }
0x12d8   :  { %v3881_v50 = vrot.slane %v3880_v29, 2 }
0x12da   :  { %v3882_v47 = vadd.f32 %v3881_v50, %v3880_v29 }
0x12dc   :  { %v3883_v10 = vrot.slane %v3882_v47, 1 }
0x12de   :  { %v3884_v4 = vadd.f32 %v3883_v10, %v3882_v47 }
0x12e0   :  { %6067 = vpush %v3884_v4 }
0x1311   :  { %s6068_s2 = spop %6067 }
0x1312   :  { %v3886_v9 = vstv %s6068_s2 }
0x1353   :  { %v3904_v37 = vpop.xlane.xlu0 %3903 }
0x1354   :  { %v3905_v18 = vrot.slane %v3904_v37, 4 }
0x1356   :  { %v3906_v17 = vadd.f32 %v3905_v18, %v3904_v37 }
0x1358   :  { %v3907_v21 = vrot.slane %v3906_v17, 2 }
0x135a   :  { %v3908_v55 = vadd.f32 %v3907_v21, %v3906_v17 }
0x135c   :  { %v3909_v28 = vrot.slane %v3908_v55, 1 }
0x135e   :  { %v3910_v57 = vadd.f32 %v3909_v28, %v3908_v55 }
0x1360   :  { %6069 = vpush %v3910_v57 }
0x1391   :  { %s6070_s30 = spop %6069 }
0x1392   :  { %v3912_v40 = vstv %s6070_s30 }
0x1393   :  { %v3913_v8 = vsub.f32 %v3912_v40, %v3886_v9 }
0x1395   :  { %3915 = vst.msk [vmem:[#allocation8] sm:$0x1] %vm3914_vm2, %v3913_v8 }
0x1396   :  { %6324 = shalt.err (!%p6321_p12)
}
0x1397   :  { %s6325_s16 = scalar_lea.hbm %s8172_s13, 16 }
0x1398   :  { %p6326_p13 = scmp.ne.s32.totalorder %s8172_s13, %s6325_s16  ;;  %p6329_p0 = scmp.lt.u32.totalorder %s6325_s16, %s8172_s13 }
0x139a   :  { %p6331_p1 = pnand %p6329_p0, %p6326_p13 }
0x139c   :  { %6334 = shalt.err (!%p6331_p1)
}
0x139d   :  { %3925 = dma.vmem_to_hbm [thread:$0]  %s3923_s10, 16, %s8172_s13, [#allocation7]  }
0x139e   :  { %6337 = dma.done.wait [#allocation7], 16  }
0x139f   :  { %6338 = vsyncadd [#allocation7], 4294967280 }
0x13a0   :  { %3929 = vsyncpa [#allocation6], 1 }
0x13a1   :  { %3930 = vsyncpa [#allocation7], 1 }

</bundles_post_ra>
